<compile_context>
chip_gen: v5e
topology: v5e:2x2
jax: 0.10.0
libtpu: 0.0.40
codegen_flags: <defaults>
</compile_context>

<pallas_src>
import jax
import jax.numpy as jnp
from jax import lax
from jax.experimental import pallas as pl
from jax.experimental.pallas import tpu as pltpu

jax.config.update("jax_default_matmul_precision", "highest")

# ---- hyper-parameters (small, consistent with the module) -------------------
T = 8            # sequence length
B = 2            # batch
D = 32           # opt.model_size
H = 4            # opt.n_heads
DH = D // H      # head dim
INNER = 64       # opt.inner_size
R = 2 * T - 1    # relative position range (15)
RP = 16          # R padded to a multiple of 8 sublanes
N = B * T        # folded batch*time rows
EPS = 1e-5       # nn.LayerNorm default eps


# ---- packed-parameter layouts (each field kept inside one 128-lane tile) ----
def _pack_layout(fields):
    off, cur = {}, 0
    for name, w in fields:
        if (cur % 128) + w > 128:          # don't straddle a lane-tile boundary
            cur = (cur // 128 + 1) * 128
        off[name] = (cur, w)
        cur += w
    total = ((cur + 127) // 128) * 128
    return off, total


W_OFF, W_WIDTH = _pack_layout([
    ("in_w", 3 * D), ("pos_w", D), ("out_w", D), ("w1", INNER),
])
V_OFF, V_WIDTH = _pack_layout([
    ("in_b", 3 * D), ("b1", INNER), ("layer_vec", D),
    ("ln1_g", D), ("ln1_b", D), ("ln2_g", D), ("ln2_b", D),
    ("rw", D), ("rr", D), ("out_b", D), ("b2", D),
])


def _layernorm(x, g, b):
    mu = jnp.mean(x, axis=-1, keepdims=True)
    var = jnp.mean((x - mu) * (x - mu), axis=-1, keepdims=True)
    return (x - mu) * lax.rsqrt(var + EPS) * g + b


def _encoder_layer_kernel(x_ref, mask_ref, pos_ref, wa_ref, w2_ref, vv_ref, o_ref):
    f32 = jnp.float32

    def W(name):
        s, w = W_OFF[name]
        return wa_ref[:, s:s + w]

    def V(name):
        s, w = V_OFF[name]
        return vv_ref[:, s:s + w]

    # ---- input = input + layer_vector (all batch rows at once) ----
    x = x_ref[...].reshape(N, D) + V("layer_vec")                        # [N, D]

    # ---- preprocess_attn: LayerNorm ----
    h = _layernorm(x, V("ln1_g"), V("ln1_b"))                            # [N, D]

    # ---- fused QKV projection over batch*time ----
    qkv = jnp.dot(h, W("in_w"), preferred_element_type=f32) + V("in_b")  # [N, 3D]
    q = qkv[:, :D]                                                       # [N, D]
    k = qkv[:, D:2 * D].reshape(B, T, D)
    v = qkv[:, 2 * D:3 * D].reshape(B, T, D)
    qrw = (q + V("rw")).reshape(B, T, D)     # r_w_bias added once for all heads
    qrr = q + V("rr")                        # kept flat [N, D] for the BD matmul

    # ---- batch-independent work, hoisted (done once, not per batch) ----
    rproj = jnp.dot(pos_ref[...], W("pos_w"), preferred_element_type=f32)  # [RP, D]
    mask_bias = jnp.where(mask_ref[...] > 0, f32(-1e30), f32(0.0))         # [B, 1, T]

    # constant one-hot relative-shift selector: sel[i, j, r] = (r == T-1-i+j)
    ii = lax.broadcasted_iota(jnp.int32, (T, T, RP), 0)
    jj = lax.broadcasted_iota(jnp.int32, (T, T, RP), 1)
    rix = lax.broadcasted_iota(jnp.int32, (T, T, RP), 2)
    shift_sel = (rix == (T - 1) - ii + jj).astype(f32)                     # [T, T, RP]

    scale = f32(1.0 / float(DH) ** 0.5)
    out_w = W("out_w")                                                     # [D, D]
    attn = jnp.zeros((N, D), f32)

    for hh in range(H):                       # H=4: small static unroll
        sl = slice(hh * DH, (hh + 1) * DH)
        qrw_h = qrw[:, :, sl]                 # [B, T, DH]
        k_h = k[:, :, sl]                     # [B, T, DH]
        v_h = v[:, :, sl]                     # [B, T, DH]

        # AC term: one batched (over B) contraction, no transpose
        ac = lax.dot_general(qrw_h, k_h, (((2,), (2,)), ((0,), (0,))),
                             preferred_element_type=f32)                  # [B, T, T]

        # BD term: single matmul across batch*time, contraction on axis 1 of both
        bd_raw = lax.dot_general(qrr[:, sl], rproj[:, sl],
                                 (((1,), (1,)), ((), ())),
                                 preferred_element_type=f32)              # [N, RP]
        bd = jnp.sum(bd_raw.reshape(B, T, 1, RP) * shift_sel[None], axis=-1)  # [B,T,T]

        scores = (ac + bd) * scale + mask_bias
        scores = scores - jnp.max(scores, axis=-1, keepdims=True)
        p = jnp.exp(scores)
        p = p / jnp.sum(p, axis=-1, keepdims=True)

        # context, batched over B
        ctx = lax.dot_general(p, v_h, (((2,), (1,)), ((0,), (0,))),
                              preferred_element_type=f32)                 # [B, T, DH]
        # per-head output-projection accumulate (no lane concat of heads)
        attn = attn + jnp.dot(ctx.reshape(N, DH), out_w[sl, :],
                              preferred_element_type=f32)                 # [N, D]

    attn = attn + V("out_b")

    # ---- postprocess_attn: dropout (identity at eval) + residual ----
    x = x + attn

    # ---- preprocess_ffn: LayerNorm; PositionWiseFeedForward; residual ----
    h2 = _layernorm(x, V("ln2_g"), V("ln2_b"))
    ff = jnp.maximum(jnp.dot(h2, W("w1"), preferred_element_type=f32) + V("b1"), 0.0)
    ff = jnp.dot(ff, w2_ref[...], preferred_element_type=f32) + V("b2")

    o_ref[...] = (x + ff).reshape(B, T, D).astype(o_ref.dtype)


@jax.jit
def relative_universal_encoder_layer(x_tbd, pos_emb, layer_vec, attn_mask, params):
    """x_tbd: [T,B,D], pos_emb: [R,D], layer_vec: [1,D], attn_mask: [B,1,T] int32."""
    p = params
    # cheap XLA-side layout plumbing (2 KiB): batch-major rows let the kernel fold
    # B into the matmul M dimension and use batched dot_generals for attention.
    x_btd = jnp.transpose(x_tbd, (1, 0, 2))                              # [B, T, D]
    pos_p = jnp.concatenate(
        [pos_emb, jnp.zeros((RP - R, D), pos_emb.dtype)], axis=0)        # [RP, D]

    # pack weights into one [D, W_WIDTH] slab
    wa = jnp.zeros((D, W_WIDTH), jnp.float32)
    for name, arr in (("in_w", p["in_w_t"]), ("pos_w", p["pos_w_t"]),
                      ("out_w", p["out_w_t"]), ("w1", p["w1_t"])):
        s, w = W_OFF[name]
        wa = wa.at[:, s:s + w].set(arr)

    # pack all row vectors (LN params, biases, layer vec, rel-attn biases)
    vv = jnp.zeros((1, V_WIDTH), jnp.float32)
    for name, arr in (("in_b", p["in_b"]), ("b1", p["b1"]),
                      ("layer_vec", layer_vec),
                      ("ln1_g", p["ln1_g"]), ("ln1_b", p["ln1_b"]),
                      ("ln2_g", p["ln2_g"]), ("ln2_b", p["ln2_b"]),
                      ("rw", p["r_w_bias"].reshape(1, D)),
                      ("rr", p["r_r_bias"].reshape(1, D)),
                      ("out_b", p["out_b"]), ("b2", p["b2"])):
        s, w = V_OFF[name]
        vv = vv.at[:, s:s + w].set(arr)

    out_btd = pl.pallas_call(
        _encoder_layer_kernel,
        out_shape=jax.ShapeDtypeStruct((B, T, D), jnp.float32),
        grid=(1,),
        in_specs=[
            pl.BlockSpec((B, T, D), lambda i: (0, 0, 0)),       # x (batch-major)
            pl.BlockSpec((B, 1, T), lambda i: (0, 0, 0)),       # key padding mask
            pl.BlockSpec((RP, D), lambda i: (0, 0)),            # padded pos_emb
            pl.BlockSpec((D, W_WIDTH), lambda i: (0, 0)),       # packed weights
            pl.BlockSpec((INNER, D), lambda i: (0, 0)),         # ffn W2^T
            pl.BlockSpec((1, V_WIDTH), lambda i: (0, 0)),       # packed vectors
        ],
        out_specs=pl.BlockSpec((B, T, D), lambda i: (0, 0, 0)),
        compiler_params=pltpu.CompilerParams(dimension_semantics=("arbitrary",)),
    )(x_btd, attn_mask, pos_p, wa, p["w2_t"], vv)
    return jnp.transpose(out_btd, (1, 0, 2))                             # [T, B, D]


# ------------------------- pure-JAX reference -------------------------------
def reference(x_tbd, pos_emb, layer_vec, attn_mask, p):
    x = jnp.transpose(x_tbd, (1, 0, 2)) + layer_vec                      # [B, T, D]
    h = _layernorm(x, p["ln1_g"], p["ln1_b"])
    qkv = h @ p["in_w_t"] + p["in_b"]
    q = qkv[..., :D].reshape(B, T, H, DH)
    k = qkv[..., D:2 * D].reshape(B, T, H, DH)
    v = qkv[..., 2 * D:].reshape(B, T, H, DH)
    r = (pos_emb @ p["pos_w_t"]).reshape(R, H, DH)
    ac = jnp.einsum("bihd,bjhd->bhij", q + p["r_w_bias"][None, None], k)
    bd_raw = jnp.einsum("bihd,rhd->bhir", q + p["r_r_bias"][None, None], r)
    idx = (T - 1) - jnp.arange(T)[:, None] + jnp.arange(T)[None, :]
    bd = jnp.take_along_axis(bd_raw, jnp.broadcast_to(idx, (B, H, T, T)), axis=-1)
    scores = (ac + bd) / float(DH) ** 0.5
    scores = jnp.where(attn_mask[:, :, None, :] > 0, jnp.float32(-1e30), scores)
    probs = jax.nn.softmax(scores, axis=-1)
    ctx = jnp.einsum("bhij,bjhd->bihd", probs, v).reshape(B, T, D)
    attn_out = ctx @ p["out_w_t"] + p["out_b"]
    x = x + attn_out
    h2 = _layernorm(x, p["ln2_g"], p["ln2_b"])
    ff = jax.nn.relu(h2 @ p["w1_t"] + p["b1"]) @ p["w2_t"] + p["b2"]
    return jnp.transpose(x + ff, (1, 0, 2))


def init_params(key):
    ks = jax.random.split(key, 12)
    s = 0.05
    return dict(
        ln1_g=jnp.ones((1, D), jnp.float32) + 0.1 * jax.random.normal(ks[0], (1, D)),
        ln1_b=0.1 * jax.random.normal(ks[1], (1, D)),
        in_w_t=s * jax.random.normal(ks[2], (D, 3 * D)),
        in_b=s * jax.random.normal(ks[3], (1, 3 * D)),
        pos_w_t=s * jax.random.normal(ks[4], (D, D)),
        r_w_bias=s * jax.random.normal(ks[5], (H, DH)),
        r_r_bias=s * jax.random.normal(ks[6], (H, DH)),
        out_w_t=s * jax.random.normal(ks[7], (D, D)),
        out_b=jnp.zeros((1, D), jnp.float32),
        ln2_g=jnp.ones((1, D), jnp.float32),
        ln2_b=jnp.zeros((1, D), jnp.float32),
        w1_t=s * jax.random.normal(ks[8], (D, INNER)),
        b1=s * jax.random.normal(ks[9], (1, INNER)),
        w2_t=s * jax.random.normal(ks[10], (INNER, D)),
        b2=s * jax.random.normal(ks[11], (1, D)),
    )


if __name__ == "__main__":
    key = jax.random.PRNGKey(0)
    k_x, k_lv, k_p = jax.random.split(key, 3)

    x_tbd = jax.random.normal(k_x, (T, B, D), jnp.float32)               # [T, B, D]

    # sinusoidal relative positional embedding for distances T-1 .. -(T-1)
    positions = jnp.arange(T - 1, -T, -1, dtype=jnp.float32)             # [R]
    inv_freq = 1.0 / (10000.0 ** (jnp.arange(0, D, 2, dtype=jnp.float32) / D))
    sinusoid = positions[:, None] * inv_freq[None, :]
    pos_emb = jnp.concatenate([jnp.sin(sinusoid), jnp.cos(sinusoid)], axis=-1)  # [R, D]

    layer_vec = 0.1 * jax.random.normal(k_lv, (1, D), jnp.float32)       # layer/time emb
    # padding mask: batch element 1 has its last two key positions padded
    attn_mask = jnp.zeros((B, 1, T), jnp.int32).at[1, 0, T - 2:].set(1)

    params = init_params(k_p)

    out = relative_universal_encoder_layer(x_tbd, pos_emb, layer_vec, attn_mask, params)
    out = jax.block_until_ready(out)

    ref = reference(x_tbd, pos_emb, layer_vec, attn_mask, params)
    assert out.shape == (T, B, D)
    assert jnp.allclose(out, ref, atol=1e-3, rtol=1e-3), float(jnp.max(jnp.abs(out - ref)))

    print("KERNEL_OK")
</pallas_src>

<mosaic_0001>
module attributes {stable_mosaic.version = 11 : i64} {
  func.func @_encoder_layer_kernel(%arg0: i32, %arg1: memref<2x8x32xf32, #tpu.memory_space<vmem>>, %arg2: memref<2x1x8xi32, #tpu.memory_space<vmem>>, %arg3: memref<16x32xf32, #tpu.memory_space<vmem>>, %arg4: memref<32x256xf32, #tpu.memory_space<vmem>>, %arg5: memref<64x32xf32, #tpu.memory_space<vmem>>, %arg6: memref<1x512xf32, #tpu.memory_space<vmem>>, %arg7: memref<2x8x32xf32, #tpu.memory_space<vmem>>) attributes {dimension_semantics = [#tpu.dimension_semantics<arbitrary>], iteration_bounds = array<i64: 1>, scalar_prefetch = 0 : i64, scratch_operands = 0 : i64, tpu.core_type = #tpu.core_type<tc>, window_params = [{pipeline_mode = #tpu.pipeline_mode<synchronous>, transform_indices = @transform_0, window_bounds = array<i64: 2, 8, 32>}, {pipeline_mode = #tpu.pipeline_mode<synchronous>, transform_indices = @transform_1, window_bounds = array<i64: 2, 1, 8>}, {pipeline_mode = #tpu.pipeline_mode<synchronous>, transform_indices = @transform_2, window_bounds = array<i64: 16, 32>}, {pipeline_mode = #tpu.pipeline_mode<synchronous>, transform_indices = @transform_3, window_bounds = array<i64: 32, 256>}, {pipeline_mode = #tpu.pipeline_mode<synchronous>, transform_indices = @transform_4, window_bounds = array<i64: 64, 32>}, {pipeline_mode = #tpu.pipeline_mode<synchronous>, transform_indices = @transform_5, window_bounds = array<i64: 1, 512>}, {pipeline_mode = #tpu.pipeline_mode<synchronous>, transform_indices = @transform_6, window_bounds = array<i64: 2, 8, 32>}]} {
    %c0 = arith.constant 0 : index
    %c0_0 = arith.constant 0 : index
    %c0_1 = arith.constant 0 : index
    %0 = vector.load %arg1[%c0, %c0_0, %c0_1] : memref<2x8x32xf32, #tpu.memory_space<vmem>>, vector<2x8x32xf32>
    %1 = vector.shape_cast %0 : vector<2x8x32xf32> to vector<16x32xf32>
    %c0_2 = arith.constant 0 : index
    %c192 = arith.constant 192 : index
    %2 = vector.load %arg6[%c0_2, %c192] : memref<1x512xf32, #tpu.memory_space<vmem>>, vector<1x32xf32>
    %3 = vector.broadcast %2 : vector<1x32xf32> to vector<16x32xf32>
    %4 = arith.addf %1, %3 : vector<16x32xf32>
    %c0_3 = arith.constant 0 : index
    %c224 = arith.constant 224 : index
    %5 = vector.load %arg6[%c0_3, %c224] : memref<1x512xf32, #tpu.memory_space<vmem>>, vector<1x32xf32>
    %c0_4 = arith.constant 0 : index
    %c256 = arith.constant 256 : index
    %6 = vector.load %arg6[%c0_4, %c256] : memref<1x512xf32, #tpu.memory_space<vmem>>, vector<1x32xf32>
    %cst = arith.constant dense<0.000000e+00> : vector<16xf32>
    %7 = vector.multi_reduction <add>, %4, %cst [1] : vector<16x32xf32> to vector<16xf32>
    %8 = vector.shape_cast %7 : vector<16xf32> to vector<16x1xf32>
    %cst_5 = arith.constant 3.200000e+01 : f32
    %9 = vector.broadcast %cst_5 : f32 to vector<16x1xf32>
    %10 = arith.divf %8, %9 : vector<16x1xf32>
    %11 = vector.broadcast %10 : vector<16x1xf32> to vector<16x32xf32>
    %12 = arith.subf %4, %11 : vector<16x32xf32>
    %13 = vector.broadcast %10 : vector<16x1xf32> to vector<16x32xf32>
    %14 = arith.subf %4, %13 : vector<16x32xf32>
    %15 = arith.mulf %12, %14 : vector<16x32xf32>
    %cst_6 = arith.constant dense<0.000000e+00> : vector<16xf32>
    %16 = vector.multi_reduction <add>, %15, %cst_6 [1] : vector<16x32xf32> to vector<16xf32>
    %17 = vector.shape_cast %16 : vector<16xf32> to vector<16x1xf32>
    %cst_7 = arith.constant 3.200000e+01 : f32
    %18 = vector.broadcast %cst_7 : f32 to vector<16x1xf32>
    %19 = arith.divf %17, %18 : vector<16x1xf32>
    %20 = vector.broadcast %10 : vector<16x1xf32> to vector<16x32xf32>
    %21 = arith.subf %4, %20 : vector<16x32xf32>
    %cst_8 = arith.constant 9.99999974E-6 : f32
    %22 = vector.broadcast %cst_8 : f32 to vector<16x1xf32>
    %23 = arith.addf %19, %22 : vector<16x1xf32>
    %24 = math.rsqrt %23 : vector<16x1xf32>
    %25 = vector.broadcast %24 : vector<16x1xf32> to vector<16x32xf32>
    %26 = arith.mulf %21, %25 : vector<16x32xf32>
    %27 = vector.broadcast %5 : vector<1x32xf32> to vector<16x32xf32>
    %28 = arith.mulf %26, %27 : vector<16x32xf32>
    %29 = vector.broadcast %6 : vector<1x32xf32> to vector<16x32xf32>
    %30 = arith.addf %28, %29 : vector<16x32xf32>
    %c0_9 = arith.constant 0 : index
    %c0_10 = arith.constant 0 : index
    %31 = vector.load %arg4[%c0_9, %c0_10] : memref<32x256xf32, #tpu.memory_space<vmem>>, vector<32x96xf32>
    %cst_11 = arith.constant dense<0.000000e+00> : vector<16x96xf32>
    %32 = tpu.matmul %30, %31, %cst_11 {dimension_numbers = #tpu.dot_dimension_numbers<[1], [0], [0], [1], [0, 0, 1, 1], [], []>, precision = #tpu.contract_precision<fp32>} : vector<16x32xf32>, vector<32x96xf32>, vector<16x96xf32> -> vector<16x96xf32>
    %c0_12 = arith.constant 0 : index
    %c0_13 = arith.constant 0 : index
    %33 = vector.load %arg6[%c0_12, %c0_13] : memref<1x512xf32, #tpu.memory_space<vmem>>, vector<1x96xf32>
    %34 = vector.broadcast %33 : vector<1x96xf32> to vector<16x96xf32>
    %35 = arith.addf %32, %34 : vector<16x96xf32>
    %36 = vector.extract_strided_slice %35 {offsets = [0, 0], sizes = [16, 32], strides = [1, 1]} : vector<16x96xf32> to vector<16x32xf32>
    %37 = vector.extract_strided_slice %35 {offsets = [0, 32], sizes = [16, 32], strides = [1, 1]} : vector<16x96xf32> to vector<16x32xf32>
    %38 = vector.shape_cast %37 : vector<16x32xf32> to vector<2x8x32xf32>
    %39 = vector.extract_strided_slice %35 {offsets = [0, 64], sizes = [16, 32], strides = [1, 1]} : vector<16x96xf32> to vector<16x32xf32>
    %40 = vector.shape_cast %39 : vector<16x32xf32> to vector<2x8x32xf32>
    %c0_14 = arith.constant 0 : index
    %c352 = arith.constant 352 : index
    %41 = vector.load %arg6[%c0_14, %c352] : memref<1x512xf32, #tpu.memory_space<vmem>>, vector<1x32xf32>
    %42 = vector.broadcast %41 : vector<1x32xf32> to vector<16x32xf32>
    %43 = arith.addf %36, %42 : vector<16x32xf32>
    %44 = vector.shape_cast %43 : vector<16x32xf32> to vector<2x8x32xf32>
    %c0_15 = arith.constant 0 : index
    %c384 = arith.constant 384 : index
    %45 = vector.load %arg6[%c0_15, %c384] : memref<1x512xf32, #tpu.memory_space<vmem>>, vector<1x32xf32>
    %46 = vector.broadcast %45 : vector<1x32xf32> to vector<16x32xf32>
    %47 = arith.addf %36, %46 : vector<16x32xf32>
    %c0_16 = arith.constant 0 : index
    %c0_17 = arith.constant 0 : index
    %48 = vector.load %arg3[%c0_16, %c0_17] : memref<16x32xf32, #tpu.memory_space<vmem>>, vector<16x32xf32>
    %c0_18 = arith.constant 0 : index
    %c96 = arith.constant 96 : index
    %49 = vector.load %arg4[%c0_18, %c96] : memref<32x256xf32, #tpu.memory_space<vmem>>, vector<32x32xf32>
    %cst_19 = arith.constant dense<0.000000e+00> : vector<16x32xf32>
    %50 = tpu.matmul %48, %49, %cst_19 {dimension_numbers = #tpu.dot_dimension_numbers<[1], [0], [0], [1], [0, 0, 1, 1], [], []>, precision = #tpu.contract_precision<fp32>} : vector<16x32xf32>, vector<32x32xf32>, vector<16x32xf32> -> vector<16x32xf32>
    %c0_20 = arith.constant 0 : index
    %c0_21 = arith.constant 0 : index
    %c0_22 = arith.constant 0 : index
    %51 = vector.load %arg2[%c0_20, %c0_21, %c0_22] : memref<2x1x8xi32, #tpu.memory_space<vmem>>, vector<2x1x8xi32>
    %c0_i32 = arith.constant 0 : i32
    %52 = vector.broadcast %c0_i32 : i32 to vector<2x1x8xi32>
    %53 = arith.cmpi sgt, %51, %52 : vector<2x1x8xi32>
    %cst_23 = arith.constant -1.000000e+30 : f32
    %cst_24 = arith.constant 0.000000e+00 : f32
    %54 = vector.broadcast %cst_23 : f32 to vector<2x1x8xf32>
    %55 = vector.broadcast %cst_24 : f32 to vector<2x1x8xf32>
    %56 = arith.select %53, %54, %55 : vector<2x1x8xi1>, vector<2x1x8xf32>
    %57 = tpu.iota {dimensions = array<i32: 0>} : vector<8x8x16xi32>
    %58 = tpu.iota {dimensions = array<i32: 1>} : vector<8x8x16xi32>
    %59 = tpu.iota {dimensions = array<i32: 2>} : vector<8x8x16xi32>
    %c7_i32 = arith.constant 7 : i32
    %60 = vector.broadcast %c7_i32 : i32 to vector<8x8x16xi32>
    %61 = arith.subi %60, %57 : vector<8x8x16xi32>
    %62 = arith.addi %61, %58 : vector<8x8x16xi32>
    %63 = arith.cmpi eq, %59, %62 : vector<8x8x16xi32>
    %64 = arith.extui %63 : vector<8x8x16xi1> to vector<8x8x16xi32>
    %65 = arith.sitofp %64 : vector<8x8x16xi32> to vector<8x8x16xf32>
    %c0_25 = arith.constant 0 : index
    %c128 = arith.constant 128 : index
    %66 = vector.load %arg4[%c0_25, %c128] : memref<32x256xf32, #tpu.memory_space<vmem>>, vector<32x32xf32>
    %cst_26 = arith.constant 0.000000e+00 : f32
    %67 = vector.broadcast %cst_26 : f32 to vector<16x32xf32>
    %68 = vector.extract_strided_slice %44 {offsets = [0, 0, 0], sizes = [2, 8, 8], strides = [1, 1, 1]} : vector<2x8x32xf32> to vector<2x8x8xf32>
    %69 = vector.extract_strided_slice %38 {offsets = [0, 0, 0], sizes = [2, 8, 8], strides = [1, 1, 1]} : vector<2x8x32xf32> to vector<2x8x8xf32>
    %70 = vector.extract_strided_slice %40 {offsets = [0, 0, 0], sizes = [2, 8, 8], strides = [1, 1, 1]} : vector<2x8x32xf32> to vector<2x8x8xf32>
    %cst_27 = arith.constant dense<0.000000e+00> : vector<2x8x8xf32>
    %71 = tpu.matmul %68, %69, %cst_27 {dimension_numbers = #tpu.dot_dimension_numbers<[2], [2], [1], [1], [0, 0, 0, 1, 1, 1], [0], [0]>, precision = #tpu.contract_precision<fp32>} : vector<2x8x8xf32>, vector<2x8x8xf32>, vector<2x8x8xf32> -> vector<2x8x8xf32>
    %72 = vector.extract_strided_slice %47 {offsets = [0, 0], sizes = [16, 8], strides = [1, 1]} : vector<16x32xf32> to vector<16x8xf32>
    %73 = vector.extract_strided_slice %50 {offsets = [0, 0], sizes = [16, 8], strides = [1, 1]} : vector<16x32xf32> to vector<16x8xf32>
    %cst_28 = arith.constant dense<0.000000e+00> : vector<16x16xf32>
    %74 = tpu.matmul %72, %73, %cst_28 {dimension_numbers = #tpu.dot_dimension_numbers<[1], [1], [0], [0], [0, 0, 1, 0], [], []>, precision = #tpu.contract_precision<fp32>} : vector<16x8xf32>, vector<16x8xf32>, vector<16x16xf32> -> vector<16x16xf32>
    %75 = vector.shape_cast %74 : vector<16x16xf32> to vector<2x8x1x16xf32>
    %76 = vector.shape_cast %65 : vector<8x8x16xf32> to vector<1x8x8x16xf32>
    %77 = vector.broadcast %75 : vector<2x8x1x16xf32> to vector<2x8x8x16xf32>
    %78 = vector.broadcast %76 : vector<1x8x8x16xf32> to vector<2x8x8x16xf32>
    %79 = arith.mulf %77, %78 : vector<2x8x8x16xf32>
    %cst_29 = arith.constant dense<0.000000e+00> : vector<2x8x8xf32>
    %80 = vector.multi_reduction <add>, %79, %cst_29 [3] : vector<2x8x8x16xf32> to vector<2x8x8xf32>
    %81 = arith.addf %71, %80 : vector<2x8x8xf32>
    %cst_30 = arith.constant 0.353553385 : f32
    %82 = vector.broadcast %cst_30 : f32 to vector<2x8x8xf32>
    %83 = arith.mulf %81, %82 : vector<2x8x8xf32>
    %84 = vector.broadcast %56 : vector<2x1x8xf32> to vector<2x8x8xf32>
    %85 = arith.addf %83, %84 : vector<2x8x8xf32>
    %cst_31 = arith.constant dense<0xFF800000> : vector<2x8xf32>
    %86 = vector.multi_reduction <maximumf>, %85, %cst_31 [2] : vector<2x8x8xf32> to vector<2x8xf32>
    %87 = vector.shape_cast %86 : vector<2x8xf32> to vector<2x8x1xf32>
    %88 = vector.broadcast %87 : vector<2x8x1xf32> to vector<2x8x8xf32>
    %89 = arith.subf %85, %88 : vector<2x8x8xf32>
    %90 = math.exp %89 : vector<2x8x8xf32>
    %cst_32 = arith.constant dense<0.000000e+00> : vector<2x8xf32>
    %91 = vector.multi_reduction <add>, %90, %cst_32 [2] : vector<2x8x8xf32> to vector<2x8xf32>
    %92 = vector.shape_cast %91 : vector<2x8xf32> to vector<2x8x1xf32>
    %93 = vector.broadcast %92 : vector<2x8x1xf32> to vector<2x8x8xf32>
    %94 = arith.divf %90, %93 : vector<2x8x8xf32>
    %cst_33 = arith.constant dense<0.000000e+00> : vector<2x8x8xf32>
    %95 = tpu.matmul %94, %70, %cst_33 {dimension_numbers = #tpu.dot_dimension_numbers<[2], [1], [1], [2], [0, 0, 0, 1, 1, 2], [0], [0]>, precision = #tpu.contract_precision<fp32>} : vector<2x8x8xf32>, vector<2x8x8xf32>, vector<2x8x8xf32> -> vector<2x8x8xf32>
    %96 = vector.shape_cast %95 : vector<2x8x8xf32> to vector<16x8xf32>
    %97 = vector.extract_strided_slice %66 {offsets = [0, 0], sizes = [8, 32], strides = [1, 1]} : vector<32x32xf32> to vector<8x32xf32>
    %cst_34 = arith.constant dense<0.000000e+00> : vector<16x32xf32>
    %98 = tpu.matmul %96, %97, %cst_34 {dimension_numbers = #tpu.dot_dimension_numbers<[1], [0], [0], [1], [0, 0, 1, 1], [], []>, precision = #tpu.contract_precision<fp32>} : vector<16x8xf32>, vector<8x32xf32>, vector<16x32xf32> -> vector<16x32xf32>
    %99 = arith.addf %67, %98 : vector<16x32xf32>
    %100 = vector.extract_strided_slice %44 {offsets = [0, 0, 8], sizes = [2, 8, 8], strides = [1, 1, 1]} : vector<2x8x32xf32> to vector<2x8x8xf32>
    %101 = vector.extract_strided_slice %38 {offsets = [0, 0, 8], sizes = [2, 8, 8], strides = [1, 1, 1]} : vector<2x8x32xf32> to vector<2x8x8xf32>
    %102 = vector.extract_strided_slice %40 {offsets = [0, 0, 8], sizes = [2, 8, 8], strides = [1, 1, 1]} : vector<2x8x32xf32> to vector<2x8x8xf32>
    %cst_35 = arith.constant dense<0.000000e+00> : vector<2x8x8xf32>
    %103 = tpu.matmul %100, %101, %cst_35 {dimension_numbers = #tpu.dot_dimension_numbers<[2], [2], [1], [1], [0, 0, 0, 1, 1, 1], [0], [0]>, precision = #tpu.contract_precision<fp32>} : vector<2x8x8xf32>, vector<2x8x8xf32>, vector<2x8x8xf32> -> vector<2x8x8xf32>
    %104 = vector.extract_strided_slice %47 {offsets = [0, 8], sizes = [16, 8], strides = [1, 1]} : vector<16x32xf32> to vector<16x8xf32>
    %105 = vector.extract_strided_slice %50 {offsets = [0, 8], sizes = [16, 8], strides = [1, 1]} : vector<16x32xf32> to vector<16x8xf32>
    %cst_36 = arith.constant dense<0.000000e+00> : vector<16x16xf32>
    %106 = tpu.matmul %104, %105, %cst_36 {dimension_numbers = #tpu.dot_dimension_numbers<[1], [1], [0], [0], [0, 0, 1, 0], [], []>, precision = #tpu.contract_precision<fp32>} : vector<16x8xf32>, vector<16x8xf32>, vector<16x16xf32> -> vector<16x16xf32>
    %107 = vector.shape_cast %106 : vector<16x16xf32> to vector<2x8x1x16xf32>
    %108 = vector.shape_cast %65 : vector<8x8x16xf32> to vector<1x8x8x16xf32>
    %109 = vector.broadcast %107 : vector<2x8x1x16xf32> to vector<2x8x8x16xf32>
    %110 = vector.broadcast %108 : vector<1x8x8x16xf32> to vector<2x8x8x16xf32>
    %111 = arith.mulf %109, %110 : vector<2x8x8x16xf32>
    %cst_37 = arith.constant dense<0.000000e+00> : vector<2x8x8xf32>
    %112 = vector.multi_reduction <add>, %111, %cst_37 [3] : vector<2x8x8x16xf32> to vector<2x8x8xf32>
    %113 = arith.addf %103, %112 : vector<2x8x8xf32>
    %cst_38 = arith.constant 0.353553385 : f32
    %114 = vector.broadcast %cst_38 : f32 to vector<2x8x8xf32>
    %115 = arith.mulf %113, %114 : vector<2x8x8xf32>
    %116 = vector.broadcast %56 : vector<2x1x8xf32> to vector<2x8x8xf32>
    %117 = arith.addf %115, %116 : vector<2x8x8xf32>
    %cst_39 = arith.constant dense<0xFF800000> : vector<2x8xf32>
    %118 = vector.multi_reduction <maximumf>, %117, %cst_39 [2] : vector<2x8x8xf32> to vector<2x8xf32>
    %119 = vector.shape_cast %118 : vector<2x8xf32> to vector<2x8x1xf32>
    %120 = vector.broadcast %119 : vector<2x8x1xf32> to vector<2x8x8xf32>
    %121 = arith.subf %117, %120 : vector<2x8x8xf32>
    %122 = math.exp %121 : vector<2x8x8xf32>
    %cst_40 = arith.constant dense<0.000000e+00> : vector<2x8xf32>
    %123 = vector.multi_reduction <add>, %122, %cst_40 [2] : vector<2x8x8xf32> to vector<2x8xf32>
    %124 = vector.shape_cast %123 : vector<2x8xf32> to vector<2x8x1xf32>
    %125 = vector.broadcast %124 : vector<2x8x1xf32> to vector<2x8x8xf32>
    %126 = arith.divf %122, %125 : vector<2x8x8xf32>
    %cst_41 = arith.constant dense<0.000000e+00> : vector<2x8x8xf32>
    %127 = tpu.matmul %126, %102, %cst_41 {dimension_numbers = #tpu.dot_dimension_numbers<[2], [1], [1], [2], [0, 0, 0, 1, 1, 2], [0], [0]>, precision = #tpu.contract_precision<fp32>} : vector<2x8x8xf32>, vector<2x8x8xf32>, vector<2x8x8xf32> -> vector<2x8x8xf32>
    %128 = vector.shape_cast %127 : vector<2x8x8xf32> to vector<16x8xf32>
    %129 = vector.extract_strided_slice %66 {offsets = [8, 0], sizes = [8, 32], strides = [1, 1]} : vector<32x32xf32> to vector<8x32xf32>
    %cst_42 = arith.constant dense<0.000000e+00> : vector<16x32xf32>
    %130 = tpu.matmul %128, %129, %cst_42 {dimension_numbers = #tpu.dot_dimension_numbers<[1], [0], [0], [1], [0, 0, 1, 1], [], []>, precision = #tpu.contract_precision<fp32>} : vector<16x8xf32>, vector<8x32xf32>, vector<16x32xf32> -> vector<16x32xf32>
    %131 = arith.addf %99, %130 : vector<16x32xf32>
    %132 = vector.extract_strided_slice %44 {offsets = [0, 0, 16], sizes = [2, 8, 8], strides = [1, 1, 1]} : vector<2x8x32xf32> to vector<2x8x8xf32>
    %133 = vector.extract_strided_slice %38 {offsets = [0, 0, 16], sizes = [2, 8, 8], strides = [1, 1, 1]} : vector<2x8x32xf32> to vector<2x8x8xf32>
    %134 = vector.extract_strided_slice %40 {offsets = [0, 0, 16], sizes = [2, 8, 8], strides = [1, 1, 1]} : vector<2x8x32xf32> to vector<2x8x8xf32>
    %cst_43 = arith.constant dense<0.000000e+00> : vector<2x8x8xf32>
    %135 = tpu.matmul %132, %133, %cst_43 {dimension_numbers = #tpu.dot_dimension_numbers<[2], [2], [1], [1], [0, 0, 0, 1, 1, 1], [0], [0]>, precision = #tpu.contract_precision<fp32>} : vector<2x8x8xf32>, vector<2x8x8xf32>, vector<2x8x8xf32> -> vector<2x8x8xf32>
    %136 = vector.extract_strided_slice %47 {offsets = [0, 16], sizes = [16, 8], strides = [1, 1]} : vector<16x32xf32> to vector<16x8xf32>
    %137 = vector.extract_strided_slice %50 {offsets = [0, 16], sizes = [16, 8], strides = [1, 1]} : vector<16x32xf32> to vector<16x8xf32>
    %cst_44 = arith.constant dense<0.000000e+00> : vector<16x16xf32>
    %138 = tpu.matmul %136, %137, %cst_44 {dimension_numbers = #tpu.dot_dimension_numbers<[1], [1], [0], [0], [0, 0, 1, 0], [], []>, precision = #tpu.contract_precision<fp32>} : vector<16x8xf32>, vector<16x8xf32>, vector<16x16xf32> -> vector<16x16xf32>
    %139 = vector.shape_cast %138 : vector<16x16xf32> to vector<2x8x1x16xf32>
    %140 = vector.shape_cast %65 : vector<8x8x16xf32> to vector<1x8x8x16xf32>
    %141 = vector.broadcast %139 : vector<2x8x1x16xf32> to vector<2x8x8x16xf32>
    %142 = vector.broadcast %140 : vector<1x8x8x16xf32> to vector<2x8x8x16xf32>
    %143 = arith.mulf %141, %142 : vector<2x8x8x16xf32>
    %cst_45 = arith.constant dense<0.000000e+00> : vector<2x8x8xf32>
    %144 = vector.multi_reduction <add>, %143, %cst_45 [3] : vector<2x8x8x16xf32> to vector<2x8x8xf32>
    %145 = arith.addf %135, %144 : vector<2x8x8xf32>
    %cst_46 = arith.constant 0.353553385 : f32
    %146 = vector.broadcast %cst_46 : f32 to vector<2x8x8xf32>
    %147 = arith.mulf %145, %146 : vector<2x8x8xf32>
    %148 = vector.broadcast %56 : vector<2x1x8xf32> to vector<2x8x8xf32>
    %149 = arith.addf %147, %148 : vector<2x8x8xf32>
    %cst_47 = arith.constant dense<0xFF800000> : vector<2x8xf32>
    %150 = vector.multi_reduction <maximumf>, %149, %cst_47 [2] : vector<2x8x8xf32> to vector<2x8xf32>
    %151 = vector.shape_cast %150 : vector<2x8xf32> to vector<2x8x1xf32>
    %152 = vector.broadcast %151 : vector<2x8x1xf32> to vector<2x8x8xf32>
    %153 = arith.subf %149, %152 : vector<2x8x8xf32>
    %154 = math.exp %153 : vector<2x8x8xf32>
    %cst_48 = arith.constant dense<0.000000e+00> : vector<2x8xf32>
    %155 = vector.multi_reduction <add>, %154, %cst_48 [2] : vector<2x8x8xf32> to vector<2x8xf32>
    %156 = vector.shape_cast %155 : vector<2x8xf32> to vector<2x8x1xf32>
    %157 = vector.broadcast %156 : vector<2x8x1xf32> to vector<2x8x8xf32>
    %158 = arith.divf %154, %157 : vector<2x8x8xf32>
    %cst_49 = arith.constant dense<0.000000e+00> : vector<2x8x8xf32>
    %159 = tpu.matmul %158, %134, %cst_49 {dimension_numbers = #tpu.dot_dimension_numbers<[2], [1], [1], [2], [0, 0, 0, 1, 1, 2], [0], [0]>, precision = #tpu.contract_precision<fp32>} : vector<2x8x8xf32>, vector<2x8x8xf32>, vector<2x8x8xf32> -> vector<2x8x8xf32>
    %160 = vector.shape_cast %159 : vector<2x8x8xf32> to vector<16x8xf32>
    %161 = vector.extract_strided_slice %66 {offsets = [16, 0], sizes = [8, 32], strides = [1, 1]} : vector<32x32xf32> to vector<8x32xf32>
    %cst_50 = arith.constant dense<0.000000e+00> : vector<16x32xf32>
    %162 = tpu.matmul %160, %161, %cst_50 {dimension_numbers = #tpu.dot_dimension_numbers<[1], [0], [0], [1], [0, 0, 1, 1], [], []>, precision = #tpu.contract_precision<fp32>} : vector<16x8xf32>, vector<8x32xf32>, vector<16x32xf32> -> vector<16x32xf32>
    %163 = arith.addf %131, %162 : vector<16x32xf32>
    %164 = vector.extract_strided_slice %44 {offsets = [0, 0, 24], sizes = [2, 8, 8], strides = [1, 1, 1]} : vector<2x8x32xf32> to vector<2x8x8xf32>
    %165 = vector.extract_strided_slice %38 {offsets = [0, 0, 24], sizes = [2, 8, 8], strides = [1, 1, 1]} : vector<2x8x32xf32> to vector<2x8x8xf32>
    %166 = vector.extract_strided_slice %40 {offsets = [0, 0, 24], sizes = [2, 8, 8], strides = [1, 1, 1]} : vector<2x8x32xf32> to vector<2x8x8xf32>
    %cst_51 = arith.constant dense<0.000000e+00> : vector<2x8x8xf32>
    %167 = tpu.matmul %164, %165, %cst_51 {dimension_numbers = #tpu.dot_dimension_numbers<[2], [2], [1], [1], [0, 0, 0, 1, 1, 1], [0], [0]>, precision = #tpu.contract_precision<fp32>} : vector<2x8x8xf32>, vector<2x8x8xf32>, vector<2x8x8xf32> -> vector<2x8x8xf32>
    %168 = vector.extract_strided_slice %47 {offsets = [0, 24], sizes = [16, 8], strides = [1, 1]} : vector<16x32xf32> to vector<16x8xf32>
    %169 = vector.extract_strided_slice %50 {offsets = [0, 24], sizes = [16, 8], strides = [1, 1]} : vector<16x32xf32> to vector<16x8xf32>
    %cst_52 = arith.constant dense<0.000000e+00> : vector<16x16xf32>
    %170 = tpu.matmul %168, %169, %cst_52 {dimension_numbers = #tpu.dot_dimension_numbers<[1], [1], [0], [0], [0, 0, 1, 0], [], []>, precision = #tpu.contract_precision<fp32>} : vector<16x8xf32>, vector<16x8xf32>, vector<16x16xf32> -> vector<16x16xf32>
    %171 = vector.shape_cast %170 : vector<16x16xf32> to vector<2x8x1x16xf32>
    %172 = vector.shape_cast %65 : vector<8x8x16xf32> to vector<1x8x8x16xf32>
    %173 = vector.broadcast %171 : vector<2x8x1x16xf32> to vector<2x8x8x16xf32>
    %174 = vector.broadcast %172 : vector<1x8x8x16xf32> to vector<2x8x8x16xf32>
    %175 = arith.mulf %173, %174 : vector<2x8x8x16xf32>
    %cst_53 = arith.constant dense<0.000000e+00> : vector<2x8x8xf32>
    %176 = vector.multi_reduction <add>, %175, %cst_53 [3] : vector<2x8x8x16xf32> to vector<2x8x8xf32>
    %177 = arith.addf %167, %176 : vector<2x8x8xf32>
    %cst_54 = arith.constant 0.353553385 : f32
    %178 = vector.broadcast %cst_54 : f32 to vector<2x8x8xf32>
    %179 = arith.mulf %177, %178 : vector<2x8x8xf32>
    %180 = vector.broadcast %56 : vector<2x1x8xf32> to vector<2x8x8xf32>
    %181 = arith.addf %179, %180 : vector<2x8x8xf32>
    %cst_55 = arith.constant dense<0xFF800000> : vector<2x8xf32>
    %182 = vector.multi_reduction <maximumf>, %181, %cst_55 [2] : vector<2x8x8xf32> to vector<2x8xf32>
    %183 = vector.shape_cast %182 : vector<2x8xf32> to vector<2x8x1xf32>
    %184 = vector.broadcast %183 : vector<2x8x1xf32> to vector<2x8x8xf32>
    %185 = arith.subf %181, %184 : vector<2x8x8xf32>
    %186 = math.exp %185 : vector<2x8x8xf32>
    %cst_56 = arith.constant dense<0.000000e+00> : vector<2x8xf32>
    %187 = vector.multi_reduction <add>, %186, %cst_56 [2] : vector<2x8x8xf32> to vector<2x8xf32>
    %188 = vector.shape_cast %187 : vector<2x8xf32> to vector<2x8x1xf32>
    %189 = vector.broadcast %188 : vector<2x8x1xf32> to vector<2x8x8xf32>
    %190 = arith.divf %186, %189 : vector<2x8x8xf32>
    %cst_57 = arith.constant dense<0.000000e+00> : vector<2x8x8xf32>
    %191 = tpu.matmul %190, %166, %cst_57 {dimension_numbers = #tpu.dot_dimension_numbers<[2], [1], [1], [2], [0, 0, 0, 1, 1, 2], [0], [0]>, precision = #tpu.contract_precision<fp32>} : vector<2x8x8xf32>, vector<2x8x8xf32>, vector<2x8x8xf32> -> vector<2x8x8xf32>
    %192 = vector.shape_cast %191 : vector<2x8x8xf32> to vector<16x8xf32>
    %193 = vector.extract_strided_slice %66 {offsets = [24, 0], sizes = [8, 32], strides = [1, 1]} : vector<32x32xf32> to vector<8x32xf32>
    %cst_58 = arith.constant dense<0.000000e+00> : vector<16x32xf32>
    %194 = tpu.matmul %192, %193, %cst_58 {dimension_numbers = #tpu.dot_dimension_numbers<[1], [0], [0], [1], [0, 0, 1, 1], [], []>, precision = #tpu.contract_precision<fp32>} : vector<16x8xf32>, vector<8x32xf32>, vector<16x32xf32> -> vector<16x32xf32>
    %195 = arith.addf %163, %194 : vector<16x32xf32>
    %c0_59 = arith.constant 0 : index
    %c416 = arith.constant 416 : index
    %196 = vector.load %arg6[%c0_59, %c416] : memref<1x512xf32, #tpu.memory_space<vmem>>, vector<1x32xf32>
    %197 = vector.broadcast %196 : vector<1x32xf32> to vector<16x32xf32>
    %198 = arith.addf %195, %197 : vector<16x32xf32>
    %199 = arith.addf %4, %198 : vector<16x32xf32>
    %c0_60 = arith.constant 0 : index
    %c288 = arith.constant 288 : index
    %200 = vector.load %arg6[%c0_60, %c288] : memref<1x512xf32, #tpu.memory_space<vmem>>, vector<1x32xf32>
    %c0_61 = arith.constant 0 : index
    %c320 = arith.constant 320 : index
    %201 = vector.load %arg6[%c0_61, %c320] : memref<1x512xf32, #tpu.memory_space<vmem>>, vector<1x32xf32>
    %cst_62 = arith.constant dense<0.000000e+00> : vector<16xf32>
    %202 = vector.multi_reduction <add>, %199, %cst_62 [1] : vector<16x32xf32> to vector<16xf32>
    %203 = vector.shape_cast %202 : vector<16xf32> to vector<16x1xf32>
    %cst_63 = arith.constant 3.200000e+01 : f32
    %204 = vector.broadcast %cst_63 : f32 to vector<16x1xf32>
    %205 = arith.divf %203, %204 : vector<16x1xf32>
    %206 = vector.broadcast %205 : vector<16x1xf32> to vector<16x32xf32>
    %207 = arith.subf %199, %206 : vector<16x32xf32>
    %208 = vector.broadcast %205 : vector<16x1xf32> to vector<16x32xf32>
    %209 = arith.subf %199, %208 : vector<16x32xf32>
    %210 = arith.mulf %207, %209 : vector<16x32xf32>
    %cst_64 = arith.constant dense<0.000000e+00> : vector<16xf32>
    %211 = vector.multi_reduction <add>, %210, %cst_64 [1] : vector<16x32xf32> to vector<16xf32>
    %212 = vector.shape_cast %211 : vector<16xf32> to vector<16x1xf32>
    %cst_65 = arith.constant 3.200000e+01 : f32
    %213 = vector.broadcast %cst_65 : f32 to vector<16x1xf32>
    %214 = arith.divf %212, %213 : vector<16x1xf32>
    %215 = vector.broadcast %205 : vector<16x1xf32> to vector<16x32xf32>
    %216 = arith.subf %199, %215 : vector<16x32xf32>
    %cst_66 = arith.constant 9.99999974E-6 : f32
    %217 = vector.broadcast %cst_66 : f32 to vector<16x1xf32>
    %218 = arith.addf %214, %217 : vector<16x1xf32>
    %219 = math.rsqrt %218 : vector<16x1xf32>
    %220 = vector.broadcast %219 : vector<16x1xf32> to vector<16x32xf32>
    %221 = arith.mulf %216, %220 : vector<16x32xf32>
    %222 = vector.broadcast %200 : vector<1x32xf32> to vector<16x32xf32>
    %223 = arith.mulf %221, %222 : vector<16x32xf32>
    %224 = vector.broadcast %201 : vector<1x32xf32> to vector<16x32xf32>
    %225 = arith.addf %223, %224 : vector<16x32xf32>
    %c0_67 = arith.constant 0 : index
    %c160 = arith.constant 160 : index
    %226 = vector.load %arg4[%c0_67, %c160] : memref<32x256xf32, #tpu.memory_space<vmem>>, vector<32x64xf32>
    %cst_68 = arith.constant dense<0.000000e+00> : vector<16x64xf32>
    %227 = tpu.matmul %225, %226, %cst_68 {dimension_numbers = #tpu.dot_dimension_numbers<[1], [0], [0], [1], [0, 0, 1, 1], [], []>, precision = #tpu.contract_precision<fp32>} : vector<16x32xf32>, vector<32x64xf32>, vector<16x64xf32> -> vector<16x64xf32>
    %c0_69 = arith.constant 0 : index
    %c128_70 = arith.constant 128 : index
    %228 = vector.load %arg6[%c0_69, %c128_70] : memref<1x512xf32, #tpu.memory_space<vmem>>, vector<1x64xf32>
    %229 = vector.broadcast %228 : vector<1x64xf32> to vector<16x64xf32>
    %230 = arith.addf %227, %229 : vector<16x64xf32>
    %cst_71 = arith.constant 0.000000e+00 : f32
    %231 = vector.broadcast %cst_71 : f32 to vector<16x64xf32>
    %232 = arith.maximumf %230, %231 : vector<16x64xf32>
    %c0_72 = arith.constant 0 : index
    %c0_73 = arith.constant 0 : index
    %233 = vector.load %arg5[%c0_72, %c0_73] : memref<64x32xf32, #tpu.memory_space<vmem>>, vector<64x32xf32>
    %cst_74 = arith.constant dense<0.000000e+00> : vector<16x32xf32>
    %234 = tpu.matmul %232, %233, %cst_74 {dimension_numbers = #tpu.dot_dimension_numbers<[1], [0], [0], [1], [0, 0, 1, 1], [], []>, precision = #tpu.contract_precision<fp32>} : vector<16x64xf32>, vector<64x32xf32>, vector<16x32xf32> -> vector<16x32xf32>
    %c0_75 = arith.constant 0 : index
    %c448 = arith.constant 448 : index
    %235 = vector.load %arg6[%c0_75, %c448] : memref<1x512xf32, #tpu.memory_space<vmem>>, vector<1x32xf32>
    %236 = vector.broadcast %235 : vector<1x32xf32> to vector<16x32xf32>
    %237 = arith.addf %234, %236 : vector<16x32xf32>
    %238 = arith.addf %199, %237 : vector<16x32xf32>
    %239 = vector.shape_cast %238 : vector<16x32xf32> to vector<2x8x32xf32>
    %c0_76 = arith.constant 0 : index
    %c0_77 = arith.constant 0 : index
    %c0_78 = arith.constant 0 : index
    %240 = vector.load %arg7[%c0_76, %c0_77, %c0_78] : memref<2x8x32xf32, #tpu.memory_space<vmem>>, vector<2x8x32xf32>
    tpu.vector_store %arg7[%c0_76, %c0_77, %c0_78], %239 {strides = array<i32>} : memref<2x8x32xf32, #tpu.memory_space<vmem>>, vector<2x8x32xf32>,
    return
  }
  func.func @transform_0(%arg0: i32) -> (i32, i32, i32) {
    %c0_i32 = arith.constant 0 : i32
    %c0_i32_0 = arith.constant 0 : i32
    %c0_i32_1 = arith.constant 0 : i32
    %c0_i32_2 = arith.constant 0 : i32
    return %c0_i32, %c0_i32_0, %c0_i32_1 : i32, i32, i32
  }
  func.func @transform_1(%arg0: i32) -> (i32, i32, i32) {
    %c0_i32 = arith.constant 0 : i32
    %c0_i32_0 = arith.constant 0 : i32
    %c0_i32_1 = arith.constant 0 : i32
    %c0_i32_2 = arith.constant 0 : i32
    return %c0_i32, %c0_i32_0, %c0_i32_1 : i32, i32, i32
  }
  func.func @transform_2(%arg0: i32) -> (i32, i32) {
    %c0_i32 = arith.constant 0 : i32
    %c0_i32_0 = arith.constant 0 : i32
    %c0_i32_1 = arith.constant 0 : i32
    return %c0_i32, %c0_i32_0 : i32, i32
  }
  func.func @transform_3(%arg0: i32) -> (i32, i32) {
    %c0_i32 = arith.constant 0 : i32
    %c0_i32_0 = arith.constant 0 : i32
    %c0_i32_1 = arith.constant 0 : i32
    return %c0_i32, %c0_i32_0 : i32, i32
  }
  func.func @transform_4(%arg0: i32) -> (i32, i32) {
    %c0_i32 = arith.constant 0 : i32
    %c0_i32_0 = arith.constant 0 : i32
    %c0_i32_1 = arith.constant 0 : i32
    return %c0_i32, %c0_i32_0 : i32, i32
  }
  func.func @transform_5(%arg0: i32) -> (i32, i32) {
    %c0_i32 = arith.constant 0 : i32
    %c0_i32_0 = arith.constant 0 : i32
    %c0_i32_1 = arith.constant 0 : i32
    return %c0_i32, %c0_i32_0 : i32, i32
  }
  func.func @transform_6(%arg0: i32) -> (i32, i32, i32) {
    %c0_i32 = arith.constant 0 : i32
    %c0_i32_0 = arith.constant 0 : i32
    %c0_i32_1 = arith.constant 0 : i32
    %c0_i32_2 = arith.constant 0 : i32
    return %c0_i32, %c0_i32_0, %c0_i32_1 : i32, i32, i32
  }
}

</mosaic_0001>

<bundles_post_ra>
// kernel: relative_universal_encoder_layer.1
= control target key start
LH: loop header
LB: loop body
LE: loop exit
PB: predicated region body
PF: predicated region fallthrough
CT: control target
= control target key end

     0   :  { %s6167_s23 = smov 64   ;;  %s6168_s24 = smov 32   ;;  %vm34_vm0 = vcmask 261120   ;;  %v6169_v9 = vmov 32.0   ;;  %vm622_vm8 = vcmask 64512   ;;  %vm889_vm12 = vcmask 130048   ;;  %s7185_s5 = inlined_call_operand.vmem [shape: f32[1,512], index: 5, kind: input, shape index: {}]   ;;  %s7186_s3 = inlined_call_operand.vmem [shape: f32[32,256], index: 3, kind: input, shape index: {}]   ;;  %s7187_s0 = inlined_call_operand.vmem [shape: f32[2,8,32], index: 0, kind: input, shape index: {}]   ;;  %s7188_s2 = inlined_call_operand.vmem [shape: f32[16,32], index: 2, kind: input, shape index: {}]   ;;  %s7189_s1 = inlined_call_operand.vmem [shape: s32[2,1,8], index: 1, kind: input, shape index: {}]   ;;  %s7190_s4 = inlined_call_operand.vmem [shape: f32[64,32], index: 4, kind: input, shape index: {}]   ;;  %s7191_s6 = inlined_call_operand.vmem [shape: f32[2,8,32], index: 6, kind: output, shape index: {}]  }
   0x1   :  { %v6115_v0 = vld [vmem:[%s7185_s5 + $0x1] ss:$0 sm:$0xff]  ;;  %v24_v3 = vld [vmem:[%s7187_s0 + $0x8] sm:$0xff]  ;;  %6119 = vrcp.f32 %v6169_v9  ;;  %v99_v10 = vld [vmem:[%s7186_s3 + $0x30] sm:$0xff]  ;;  %s6170_s19 = smov 96   ;;  %s6172_s27 = smov 120  }
   0x2   :  { %28 = vrot.lane.b32.xlu0 %v6115_v0, %s6167_s23  ;;  %86 = vrot.lane.b32.xlu2 %v6115_v0, %s6168_s24  ;;  %v98_v1 = vld [vmem:[%s7186_s3 + $0x20] sm:$0xff]  ;;  %v6242_v11 = vand.u32 4294901760, %v99_v10  ;;  %v97_v29 = vld [vmem:[%s7186_s3 + $0x10] sm:$0xff]  ;;  %s6174_s28 = smov 56   ;;  %s6175_s29 = smov 112  }
   0x3   :  { %v23_v2 = vld [vmem:[%s7187_s0] sm:$0xff]  ;;  %v6244_v13 = vand.u32 4294901760, %v98_v1  ;;  %v126_v30 = vand.u32 4294901760, %v97_v29  ;;  %s6176_s30 = smov 80   ;;  %s6177_s10 = smov 48  }
   0x4   :  { %123 = vmatpush.msra.mxu0 %v6242_v11  ;;  %6093 = vmatpush.msra.mxu2 %v6242_v11  ;;  %v96_v31 = vld [vmem:[%s7186_s3] sm:$0xff]  ;;  %v160_v33 = vsub.f32 %v99_v10, %v6242_v11  ;;  %s6178_s11 = smov 104   ;;  %s6179_s12 = smov 72  }
   0x5   :  { %v128_v32 = vand.u32 4294901760, %v96_v31  ;;  %v166_v34 = vsub.f32 %v98_v1, %v6244_v13  ;;  %v172_v35 = vsub.f32 %v97_v29, %v126_v30  ;;  %v6279_v37 = vld [vmem:[%s7185_s5 + $0x2] ss:$0 sm:$0xff]  ;;  %s6180_s15 = smov 40  }
   0x6   :  { %125 = vmatpush.msra.mxu0 %v6244_v13  ;;  %6094 = vmatpush.msra.mxu2 %v6244_v13  ;;  %v161_v38 = vand.u32 4294901760, %v160_v33 }
   0x7   :  { %v6120_v12 = vpop.eup %6119  ;;  %v178_v36 = vsub.f32 %v96_v31, %v128_v32  ;;  %v167_v41 = vand.u32 4294901760, %v166_v34  ;;  %v173_v44 = vand.u32 4294901760, %v172_v35 }
   0x8   :  { %v42_v14 = vmul.f32 32.0, %v6120_v12  ;;  %vm46_vm1 = vweird.f32 %v6120_v12  ;;  %127 = vmatpush.msra.mxu0 %v126_v30  ;;  %6095 = vmatpush.msra.mxu2 %v126_v30  ;;  %v162_v40 = vsub.f32 %v160_v33, %v161_v38 }
   0x9   :  { %v168_v43 = vsub.f32 %v166_v34, %v167_v41  ;;  %v174_v46 = vsub.f32 %v172_v35, %v173_v44  ;;  %v179_v47 = vand.u32 4294901760, %v178_v36 }
   0xa   :  { %347 = vrot.lane.b32.xlu2 %v98_v1, %s6168_s24  ;;  %v43_v15 = vsub.f32 1.0, %v42_v14  ;;  %129 = vmatpush.msra.mxu0 %v128_v32  ;;  %v163_v42 = vand.u32 4294901760, %v162_v40 }
   0xb   :  { %6096 = vmatpush.msra.mxu2 %v128_v32  ;;  %v169_v45 = vand.u32 4294901760, %v168_v43  ;;  %v175_v48 = vand.u32 4294901760, %v174_v46  ;;  %v180_v49 = vsub.f32 %v178_v36, %v179_v47 }
   0xc   :  { %v44_v16 = vmul.f32 %v6120_v12, %v43_v15  ;;  %275 = vmatpush.msrb.mxu0 %v161_v38  ;;  %164 = vmatpush.msra.mxu1 %v163_v42 }
   0xd   :  { %206 = vmatpush.msrb.mxu2 %v160_v33  ;;  %6097 = vmatpush.msra.mxu3 %v163_v42  ;;  %v181_v50 = vand.u32 4294901760, %v180_v49 }
   0xe   :  { %v45_v17 = vadd.f32 %v6120_v12, %v44_v16  ;;  %279 = vmatpush.msrb.mxu0 %v167_v41  ;;  %170 = vmatpush.msra.mxu1 %v169_v45 }
   0xf   :  { %209 = vmatpush.msrb.mxu2 %v166_v34  ;;  %6098 = vmatpush.msra.mxu3 %v169_v45 }
  0x10   :  { %v6250_v18 = vsel %vm46_vm1, %v6120_v12, %v45_v17  ;;  %283 = vmatpush.msrb.mxu0 %v173_v44  ;;  %176 = vmatpush.msra.mxu1 %v175_v48 }
  0x11   :  { %7198 = vst [vmem:[#allocation4_spill] sm:$0xff] %v6250_v18  ;;  %212 = vmatpush.msrb.mxu2 %v172_v35  ;;  %6099 = vmatpush.msra.mxu3 %v175_v48 }
  0x12   :  { %287 = vmatpush.msrb.mxu0 %v179_v47  ;;  %182 = vmatpush.msra.mxu1 %v181_v50 }
  0x13   :  { %215 = vmatpush.msrb.mxu2 %v178_v36  ;;  %6100 = vmatpush.msra.mxu3 %v181_v50 }
  0x14   :  { %310 = vmatpush.msrb.mxu1 %v6242_v11 }
  0x15   :  { %240 = vmatpush.msrb.mxu3 %v6242_v11 }
  0x16   :  { %312 = vmatpush.msrb.mxu1 %v6244_v13 }
  0x17   :  { %242 = vmatpush.msrb.mxu3 %v6244_v13 }
  0x18   :  { %314 = vmatpush.msrb.mxu1 %v126_v30 }
  0x19   :  { %244 = vmatpush.msrb.mxu3 %v126_v30 }
  0x1a   :  { %316 = vmatpush.msrb.mxu1 %v128_v32 }
  0x1b   :  { %246 = vmatpush.msrb.mxu3 %v128_v32 }
  0x5c   :  { %v6284_v39 = vpop.permute.xlu2 %86 }
  0x64   :  { %v348_v51 = vpop.permute.xlu2 %347 }
  0x74   :  { %v29_v4 = vpop.permute.xlu0 %28 }
  0x75   :  { %v6231_v5 = vadd.f32 %v29_v4, %v23_v2  ;;  %v6233_v6 = vadd.f32 %v29_v4, %v24_v3  ;;  %v6292_v4 = vand.u32 4294901760, %v348_v51 }
  0x77   :  { %7196 = vst [vmem:[#allocation2_spill] sm:$0xff] %v6231_v5  ;;  %v38_v7 = vsel %vm34_vm0, %v6233_v6, 0.0  ;;  %v35_v8 = vsel %vm34_vm0, %v6231_v5, 0.0  ;;  %v6297_v12 = vsub.f32 %v348_v51, %v6292_v4  ;;  %v337_v51 = vld [vmem:[%s7188_s2] sm:$0xff] }
  0x78   :  { %7197 = vst [vmem:[#allocation3_spill] sm:$0xff] %v6233_v6  ;;  %39 = vadd.xlane.f32.xlu0 %v38_v7  ;;  %36 = vadd.xlane.f32.xlu1 %v35_v8 }
  0xeb   :  { %v40_v19 = vpop.xlane.xlu0 %39  ;;  %v37_v20 = vpop.xlane.xlu1 %36 }
  0xec   :  { %v49_v21 = vmul.f32 %v6250_v18, %v40_v19  ;;  %v48_v22 = vmul.f32 %v6250_v18, %v37_v20 }
  0xee   :  { %v6255_v23 = vsub.f32 %v6233_v6, %v49_v21  ;;  %v6258_v24 = vsub.f32 %v6231_v5, %v48_v22  ;;  %v418_v22 = vand.u32 4294901760, %v6297_v12 }
  0xf0   :  { %v53_v25 = vmul.f32 %v6255_v23, %v6255_v23  ;;  %v52_v26 = vmul.f32 %v6258_v24, %v6258_v24  ;;  %v419_v33 = vsub.f32 %v6297_v12, %v418_v22 }
  0xf2   :  { %v57_v27 = vsel %vm34_vm0, %v53_v25, 0.0  ;;  %v54_v28 = vsel %vm34_vm0, %v52_v26, 0.0  ;;  %v420_v42 = vand.u32 4294901760, %v419_v33 }
  0xf3   :  { %58 = vadd.xlane.f32.xlu1 %v57_v27  ;;  %55 = vadd.xlane.f32.xlu2 %v54_v28 }
 0x10b   :  { %345 = vrot.lane.b32.xlu2 %v97_v29, %s6168_s24 }
 0x10c   :  { %349 = vrot.lane.b32.xlu1 %v99_v10, %s6168_s24 }
 0x113   :  { %326 = vrot.lane.b32.xlu2 %v6279_v37, %s6168_s24 }
 0x114   :  { %343 = vrot.lane.b32.xlu1 %v96_v31, %s6168_s24 }
 0x166   :  { %v56_v52 = vpop.xlane.xlu2 %55  ;;  %v59_v53 = vpop.xlane.xlu1 %58 }
 0x167   :  { %v60_v54 = vmul.f32 %v56_v52, %v6250_v18  ;;  %v61_v55 = vmul.f32 %v59_v53, %v6250_v18  ;;  %v356_v53 = vsel %vm34_vm0, %v337_v51, 0 }
 0x169   :  { %v62_v56 = vadd.f32 1e-05, %v60_v54  ;;  %v63_v57 = vadd.f32 1e-05, %v61_v55  ;;  %v381_v54 = vand.u32 4294901760, %v356_v53  ;;  %v338_v55 = vld [vmem:[%s7188_s2 + $0x8] sm:$0xff] }
 0x16b   :  { %6121 = vrsqrt.f32 %v62_v56  ;;  %vm70_vm4 = vweird.f32 %v62_v56  ;;  %vm80_vm6 = vweird.f32 %v63_v57 }
 0x16c   :  { %6123 = vrsqrt.f32 %v63_v57 }
 0x16e   :  { %v346_v1 = vpop.permute.xlu2 %345 }
 0x16f   :  { %v6294_v8 = vand.u32 4294901760, %v346_v1 }
 0x171   :  { %v6122_v58 = vpop.eup %6121  ;;  %v6301_v15 = vsub.f32 %v346_v1, %v6294_v8 }
 0x172   :  { %v6124_v59 = vpop.eup %6123  ;;  %v65_v60 = vmul.f32 %v6122_v58, %v62_v56  ;;  %vm71_vm2 = vweird.f32 %v6122_v58  ;;  %v382_v56 = vsub.f32 %v356_v53, %v381_v54 }
 0x173   :  { %v75_v61 = vmul.f32 %v6124_v59, %v63_v57  ;;  %vm81_vm3 = vweird.f32 %v6124_v59  ;;  %vm72_vm5 = vmor %vm70_vm4, %vm71_vm2  ;;  %v424_v26 = vand.u32 4294901760, %v6301_v15  ;;  %v359_v57 = vsel %vm34_vm0, %v338_v55, 0 }
 0x174   :  { %v66_v62 = vmul.f32 %v6122_v58, %v65_v60  ;;  %vm82_vm7 = vmor %vm80_vm6, %vm81_vm3  ;;  %vm957_vm3 = vcmask 1041409   ;;  %vm959_vm4 = vcmask 1042434   ;;  %vm963_vm6 = vcmask 1044484  }
 0x175   :  { %v76_v63 = vmul.f32 %v6124_v59, %v75_v61  ;;  %v425_v34 = vsub.f32 %v6301_v15, %v424_v26 }
 0x176   :  { %v67_v0 = vmul.f32 0.5, %v66_v62 }
 0x177   :  { %v77_v2 = vmul.f32 0.5, %v76_v63  ;;  %v426_v44 = vand.u32 4294901760, %v425_v34 }
 0x178   :  { %v68_v3 = vsub.f32 1.5, %v67_v0 }
 0x179   :  { %v78_v7 = vsub.f32 1.5, %v77_v2 }
 0x17a   :  { %v69_v9 = vmul.f32 %v6122_v58, %v68_v3  ;;  %v6118_v3 = vld [vmem:[%s7185_s5] ss:$0 sm:$0xff] }
 0x17b   :  { %v79_v10 = vmul.f32 %v6124_v59, %v78_v7 }
 0x17c   :  { %v73_v11 = vsel %vm72_vm5, %v6122_v58, %v69_v9  ;;  %v383_v58 = vand.u32 4294901760, %v382_v56  ;;  %vm961_vm5 = vcmask 1043459  }
 0x17d   :  { %v84_v13 = vmul.f32 %v73_v11, %v6258_v24  ;;  %v83_v14 = vsel %vm82_vm7, %v6124_v59, %v79_v10  ;;  %v389_v59 = vand.u32 4294901760, %v359_v57  ;;  %vm965_vm7 = vcmask 1045509  }
 0x17e   :  { %v85_v16 = vmul.f32 %v83_v14, %v6255_v23  ;;  %v350_v17 = vpop.permute.xlu1 %349  ;;  %v384_v60 = vsub.f32 %v382_v56, %v383_v58 }
 0x17f   :  { %v89_v19 = vmul.f32 %v6284_v39, %v84_v13  ;;  %v373_v20 = vand.u32 4294901760, %v350_v17  ;;  %v390_v61 = vsub.f32 %v359_v57, %v389_v59 }
 0x180   :  { %v90_v21 = vmul.f32 %v6284_v39, %v85_v16  ;;  %v385_v62 = vand.u32 4294901760, %v384_v60 }
 0x181   :  { %v411_v25 = vsub.f32 %v350_v17, %v373_v20  ;;  %v94_v27 = vadd.f32 %v6279_v37, %v89_v19  ;;  %v391_v63 = vand.u32 4294901760, %v390_v61 }
 0x182   :  { %v95_v24 = vadd.f32 %v6279_v37, %v90_v21 }
 0x183   :  { %v412_v28 = vand.u32 4294901760, %v411_v25  ;;  %v105_v29 = vsel %vm34_vm0, %v94_v27, 0  ;;  %v392_v0 = vsub.f32 %v390_v61, %v391_v63 }
 0x184   :  { %v130_v30 = vand.u32 4294901760, %v105_v29  ;;  %v108_v23 = vsel %vm34_vm0, %v95_v24, 0 }
 0x185   :  { %v413_v31 = vsub.f32 %v411_v25, %v412_v28  ;;  %v138_v32 = vand.u32 4294901760, %v108_v23  ;;  %v393_v1 = vand.u32 4294901760, %v392_v0 }
 0x186   :  { %184 = vmatmul.f32.vlgmr.msra.gmra.mxu1 %v130_v30  ;;  %v344_v35 = vpop.permute.xlu1 %343  ;;  %v131_v36 = vsub.f32 %v105_v29, %v130_v30 }
 0x187   :  { %v414_v37 = vand.u32 4294901760, %v413_v31  ;;  %188 = vmatmul.f32.vlgmr.msra.gmra.mxu3 %v138_v32  ;;  %491 = vmatpush.msra.mxu1 %v373_v20  ;;  %v379_v38 = vand.u32 4294901760, %v344_v35  ;;  %v139_v39 = vsub.f32 %v108_v23, %v138_v32 }
 0x188   :  { %v132_v40 = vand.u32 4294901760, %v131_v36 }
 0x189   :  { %v429_v41 = vsub.f32 %v344_v35, %v379_v38  ;;  %493 = vmatpush.msra.mxu1 %v6292_v4  ;;  %415 = vmatpush.msra.mxu3 %v414_v37  ;;  %v140_v43 = vand.u32 4294901760, %v139_v39 }
 0x18a   :  { %v133_v45 = vsub.f32 %v131_v36, %v132_v40 }
 0x18b   :  { %v430_v46 = vand.u32 4294901760, %v429_v41  ;;  %421 = vmatpush.msra.mxu3 %v420_v42  ;;  %v141_v47 = vsub.f32 %v139_v39, %v140_v43  ;;  %495 = vmatpush.msra.mxu1 %v6294_v8 }
 0x18c   :  { %v134_v48 = vand.u32 4294901760, %v133_v45 }
 0x18d   :  { %v142_v49 = vand.u32 4294901760, %v141_v47  ;;  %427 = vmatpush.msra.mxu3 %v426_v44  ;;  %v431_v50 = vsub.f32 %v429_v41, %v430_v46  ;;  %497 = vmatpush.msra.mxu1 %v379_v38 }
 0x18e   :  { %135 = vmatmul.f32.vlgmr.msra.gmra.mxu0 %v134_v48  ;;  %318 = vmatmul.f32.vlgmr.msrb.gmra.mxu1 %v130_v30 }
 0x18f   :  { %143 = vmatmul.f32.vlgmr.msra.gmra.mxu2 %v142_v49  ;;  %250 = vmatmul.f32.vlgmr.msrb.gmra.mxu3 %v132_v40  ;;  %v432_v52 = vand.u32 4294901760, %v431_v50 }
 0x190   :  { %374 = vmatpush.msra.mxu2 %v373_v20  ;;  %457 = vmatpush.msra.mxu0 %v411_v25 }
 0x191   :  { %433 = vmatpush.msra.mxu3 %v432_v52 }
 0x192   :  { %376 = vmatpush.msra.mxu2 %v6292_v4  ;;  %460 = vmatpush.msra.mxu0 %v6297_v12 }
 0x193   :  { %561 = vmatpush.msrb.mxu3 %v373_v20 }
 0x194   :  { %378 = vmatpush.msra.mxu2 %v6294_v8  ;;  %463 = vmatpush.msra.mxu0 %v6301_v15 }
 0x195   :  { %563 = vmatpush.msrb.mxu3 %v6292_v4 }
 0x196   :  { %380 = vmatpush.msra.mxu2 %v379_v38  ;;  %289 = vmatmul.f32.vlgmr.msrb.gmra.mxu0 %v130_v30 }
 0x197   :  { %218 = vmatmul.f32.vlgmr.msrb.gmra.mxu2 %v131_v36  ;;  %256 = vmatmul.f32.gmra.mxu3 %v140_v43  ;;  %v6117_v36 = vld [vmem:[%s7185_s5 + $0x3] ss:$0 sm:$0xff] }
 0x198   :  { %322 = vmatmul.f32.gmra.mxu1 %v138_v32  ;;  %526 = vmatpush.msrb.mxu2 %v412_v28 }
 0x199   :  { %565 = vmatpush.msrb.mxu3 %v6294_v8  ;;  %466 = vmatpush.msra.mxu0 %v429_v41 }
 0x19a   :  { %530 = vmatpush.msrb.mxu2 %v418_v22 }
 0x19b   :  { %567 = vmatpush.msrb.mxu3 %v379_v38 }
 0x19c   :  { %534 = vmatpush.msrb.mxu2 %v424_v26 }
 0x19e   :  { %293 = vmatmul.f32.gmra.mxu0 %v138_v32  ;;  %538 = vmatpush.msrb.mxu2 %v430_v46 }
 0x19f   :  { %223 = vmatmul.f32.gmra.mxu2 %v139_v39  ;;  %435 = vmatmul.f32.vlgmr.msra.gmra.mxu3 %v381_v54 }
 0x1a0   :  { %501 = vmatmul.f32.vlgmr.msra.gmra.mxu1 %v383_v58 }
 0x1a6   :  { %469 = vmatmul.f32.vlgmr.msra.gmra.mxu0 %v382_v56 }
 0x1a7   :  { %386 = vmatmul.f32.vlgmr.msra.gmra.mxu2 %v385_v62  ;;  %439 = vmatmul.f32.gmra.mxu3 %v389_v59 }
 0x1a8   :  { %507 = vmatmul.f32.gmra.mxu1 %v391_v63 }
 0x1ae   :  { %474 = vmatmul.f32.gmra.mxu0 %v390_v61 }
 0x1af   :  { %394 = vmatmul.f32.gmra.mxu2 %v393_v1  ;;  %569 = vmatmul.f32.vlgmr.msrb.gmra.mxu3 %v381_v54 }
 0x1b7   :  { %540 = vmatmul.f32.vlgmr.msrb.gmra.mxu2 %v381_v54  ;;  %573 = vmatmul.f32.gmra.mxu3 %v389_v59 }
 0x1bf   :  { %544 = vmatmul.f32.gmra.mxu2 %v389_v59 }
 0x203   :  { %v185_v8 = vpop.f32.mrf.mxu1 }
 0x20a   :  { %v189_v2 = vpop.f32.mrf.mxu3 }
 0x20b   :  { %v136_v4 = vpop.f32.mrf.mxu0  ;;  %v319_v17 = vpop.f32.mrf.mxu1 }
 0x20c   :  { %v137_v10 = vadd.f32 %v6118_v3, %v136_v4 }
 0x20e   :  { %v186_v11 = vadd.f32 %v185_v8, %v137_v10 }
 0x212   :  { %v144_v7 = vpop.f32.mrf.mxu2  ;;  %v251_v9 = vpop.f32.mrf.mxu3 }
 0x213   :  { %v290_v14 = vpop.f32.mrf.mxu0  ;;  %v145_v15 = vadd.f32 %v6118_v3, %v144_v7 }
 0x215   :  { %v190_v22 = vadd.f32 %v189_v2, %v145_v15  ;;  %v323_v30 = vpop.f32.mrf.mxu1 }
 0x21a   :  { %v219_v12 = vpop.f32.mrf.mxu2  ;;  %v257_v19 = vpop.f32.mrf.mxu3 }
 0x21b   :  { %v220_v13 = vadd.f32 %v219_v12, %v186_v11  ;;  %v294_v24 = vpop.f32.mrf.mxu0 }
 0x21d   :  { %v252_v16 = vadd.f32 %v251_v9, %v220_v13  ;;  %v502_v37 = vpop.f32.mrf.mxu1 }
 0x21f   :  { %v291_v20 = vadd.f32 %v290_v14, %v252_v16 }
 0x221   :  { %v6341_v21 = vadd.f32 %v319_v17, %v291_v20  ;;  %v327_v17 = vpop.permute.xlu2 %326 }
 0x222   :  { %v224_v25 = vpop.f32.mrf.mxu2  ;;  %v436_v28 = vpop.f32.mrf.mxu3 }
 0x223   :  { %v225_v26 = vadd.f32 %v224_v25, %v190_v22  ;;  %939 = vrot.lane.b32.xlu1 %v6341_v21, %s6170_s19  ;;  %v470_v32 = vpop.f32.mrf.mxu0  ;;  %v6353_v40 = vadd.f32 %v6117_v36, %v6341_v21 }
 0x225   :  { %v258_v27 = vadd.f32 %v257_v19, %v225_v26  ;;  %v624_v46 = vsel %vm622_vm8, %v6353_v40, 0  ;;  %v508_v49 = vpop.f32.mrf.mxu1  ;;  %v6371_v19 = vadd.f32 %v327_v17, %v6341_v21 }
 0x226   :  { %v653_v50 = vand.u32 4294901760, %v624_v46 }
 0x227   :  { %v295_v29 = vadd.f32 %v294_v24, %v258_v27  ;;  %v973_v20 = vsel %vm622_vm8, %v6371_v19, 0 }
 0x228   :  { %v654_v57 = vsub.f32 %v624_v46, %v653_v50  ;;  %v994_v22 = vand.u32 4294901760, %v973_v20 }
 0x229   :  { %v6345_v23 = vadd.f32 %v323_v30, %v295_v29 }
 0x22a   :  { %v387_v31 = vpop.f32.mrf.mxu2  ;;  %v440_v33 = vpop.f32.mrf.mxu3  ;;  %v655_v62 = vand.u32 4294901760, %v654_v57  ;;  %v995_v25 = vsub.f32 %v973_v20, %v994_v22 }
 0x22b   :  { %1124 = vrot.lane.b32.xlu0 %v6345_v23, %s6170_s19  ;;  %v437_v34 = vadd.f32 %v436_v28, %v387_v31  ;;  %v475_v43 = vpop.f32.mrf.mxu0  ;;  %v6360_v51 = vadd.f32 %v6117_v36, %v6345_v23  ;;  %v6376_v27 = vadd.f32 %v327_v17, %v6345_v23 }
 0x22c   :  { %v656_v3 = vsub.f32 %v654_v57, %v655_v62  ;;  %v996_v26 = vand.u32 4294901760, %v995_v25 }
 0x22d   :  { %v471_v38 = vadd.f32 %v470_v32, %v437_v34  ;;  %v627_v59 = vsel %vm622_vm8, %v6360_v51, 0  ;;  %v1151_v31 = vsel %vm622_vm8, %v6376_v27, 0 }
 0x22e   :  { %v661_v63 = vand.u32 4294901760, %v627_v59  ;;  %v657_v10 = vand.u32 4294901760, %v656_v3  ;;  %v997_v29 = vsub.f32 %v995_v25, %v996_v26  ;;  %v1172_v34 = vand.u32 4294901760, %v1151_v31 }
 0x22f   :  { %v503_v41 = vadd.f32 %v502_v37, %v471_v38 }
 0x230   :  { %v662_v4 = vsub.f32 %v627_v59, %v661_v63 }
 0x232   :  { %v395_v35 = vpop.f32.mrf.mxu2  ;;  %v570_v39 = vpop.f32.mrf.mxu3  ;;  %v663_v11 = vand.u32 4294901760, %v662_v4 }
 0x233   :  { %v441_v42 = vadd.f32 %v440_v33, %v395_v35  ;;  %v998_v33 = vand.u32 4294901760, %v997_v29 }
 0x234   :  { %v664_v14 = vsub.f32 %v662_v4, %v663_v11 }
 0x235   :  { %v476_v47 = vadd.f32 %v475_v43, %v441_v42 }
 0x236   :  { %v665_v16 = vand.u32 4294901760, %v664_v14  ;;  %v6171_v14 = vmov 0.0  }
 0x237   :  { %v509_v52 = vadd.f32 %v508_v49, %v476_v47 }
 0x23a   :  { %v541_v44 = vpop.f32.mrf.mxu2  ;;  %v574_v55 = vpop.f32.mrf.mxu3 }
 0x23b   :  { %v542_v45 = vadd.f32 %v541_v44, %v503_v41 }
 0x23d   :  { %v6357_v48 = vadd.f32 %v570_v39, %v542_v45  ;;  %v1173_v39 = vsub.f32 %v1151_v31, %v1172_v34 }
 0x23f   :  { %v630_v53 = vsel %vm622_vm8, %v6357_v48, 0  ;;  %v1174_v44 = vand.u32 4294901760, %v1173_v39 }
 0x240   :  { %v651_v58 = vand.u32 4294901760, %v630_v53 }
 0x241   :  { %v1175_v47 = vsub.f32 %v1173_v39, %v1174_v44 }
 0x242   :  { %v545_v54 = vpop.f32.mrf.mxu2  ;;  %v691_v1 = vsub.f32 %v630_v53, %v651_v58 }
 0x243   :  { %v546_v56 = vadd.f32 %v545_v54, %v509_v52 }
 0x244   :  { %v692_v8 = vand.u32 4294901760, %v691_v1 }
 0x245   :  { %v6366_v60 = vadd.f32 %v574_v55, %v546_v56  ;;  %v583_v55 = vlaneseq }
 0x246   :  { %v693_v13 = vsub.f32 %v691_v1, %v692_v8 }
 0x247   :  { %v633_v61 = vsel %vm622_vm8, %v6366_v60, 0 }
 0x248   :  { %v649_v0 = vand.u32 4294901760, %v633_v61  ;;  %v694_v15 = vand.u32 4294901760, %v693_v13 }
 0x24a   :  { %650 = vmatpush.xpose.msrb.mxu0 %v649_v0  ;;  %751 = vmatpush.xpose.msra.mxu3 %v649_v0  ;;  %v685_v2 = vsub.f32 %v633_v61, %v649_v0 }
 0x24c   :  { %721 = vmatpush.xpose.msra.mxu2 %v685_v2  ;;  %v686_v7 = vand.u32 4294901760, %v685_v2 }
 0x24e   :  { %652 = vmatpush.xpose.msrb.mxu0 %v651_v58  ;;  %753 = vmatpush.xpose.msra.mxu3 %v651_v58  ;;  %v687_v9 = vsub.f32 %v685_v2, %v686_v7 }
 0x250   :  { %724 = vmatpush.xpose.msra.mxu2 %v691_v1  ;;  %v688_v12 = vand.u32 4294901760, %v687_v9 }
 0x251   :  { %658 = vmatmul.f32.vlgmr.msrb.gmra.mxu0 %v657_v10  ;;  %757 = vmatmul.f32.vlgmr.msra.gmra.mxu3 %v655_v62 }
 0x252   :  { %784 = vmatpush.xpose.msra.mxu0 %v686_v7  ;;  %689 = vmatpush.xpose.msrb.mxu1 %v688_v12 }
 0x253   :  { %727 = vmatmul.f32.vlgmr.msra.gmra.mxu2 %v654_v57 }
 0x256   :  { %788 = vmatpush.xpose.msra.mxu0 %v692_v8  ;;  %695 = vmatpush.xpose.msrb.mxu1 %v694_v15 }
 0x259   :  { %666 = vmatmul.f32.gmra.mxu0 %v665_v16  ;;  %697 = vmatmul.f32.vlgmr.msrb.gmra.mxu1 %v653_v50 }
 0x25a   :  { %813 = vmatpush.xpose.msra.mxu1 %v649_v0  ;;  %763 = vmatmul.f32.gmra.mxu3 %v663_v11  ;;  %v6382_v0 = vand.u32 127, %v583_v55 }
 0x25b   :  { %732 = vmatmul.f32.gmra.mxu2 %v662_v4 }
 0x25e   :  { %815 = vmatpush.xpose.msra.mxu1 %v651_v58  ;;  %v584_v58 = vshrl.u32 %v583_v55, 7 }
 0x260   :  { %v587_v1 = vadd.s32 7, %v584_v58  ;;  %v589_v2 = vadd.s32 5, %v584_v58  ;;  %v588_v7 = vadd.s32 6, %v584_v58  ;;  %v590_v12 = vadd.s32 4, %v584_v58 }
 0x261   :  { %701 = vmatmul.f32.gmra.mxu1 %v661_v63  ;;  %790 = vmatmul.f32.vlgmr.msra.gmra.mxu0 %v653_v50  ;;  %v591_v17 = vadd.s32 3, %v584_v58  ;;  %vm601_vm14 = vcmp.eq.s32.totalorder %v6382_v0, %v584_v58 }
 0x262   :  { %vm594_vm9 = vcmp.eq.s32.totalorder %v6382_v0, %v587_v1  ;;  %vm596_vm10 = vcmp.eq.s32.totalorder %v6382_v0, %v589_v2  ;;  %vm595_vm11 = vcmp.eq.s32.totalorder %v6382_v0, %v588_v7  ;;  %vm597_vm13 = vcmp.eq.s32.totalorder %v6382_v0, %v590_v12 }
 0x263   :  { %v6388_v15 = vsel %vm594_vm9, 1.0, %v6171_v14  ;;  %v6391_v16 = vsel %vm596_vm10, 1.0, %v6171_v14  ;;  %vm598_vm15 = vcmp.eq.s32.totalorder %v6382_v0, %v591_v17  ;;  %vm967_vm9 = vcmask 1046534  }
 0x264   :  { %vm969_vm10 = vcmask 1047559  }
 0x269   :  { %794 = vmatmul.f32.gmra.mxu0 %v661_v63  ;;  %817 = vmatmul.f32.vlgmr.msra.gmra.mxu1 %v653_v50  ;;  %v1176_v50 = vand.u32 4294901760, %v1175_v47 }
 0x271   :  { %821 = vmatmul.f32.gmra.mxu1 %v661_v63 }
 0x295   :  { %v940_v24 = vpop.permute.xlu1 %939 }
 0x296   :  { %v975_v28 = vsel %vm622_vm8, %v940_v24, 0 }
 0x297   :  { %v992_v30 = vand.u32 4294901760, %v975_v28 }
 0x299   :  { %v1019_v32 = vsub.f32 %v975_v28, %v992_v30  ;;  %993 = vmatpush.xpose.msrb.mxu2 %v992_v30  ;;  %1117 = vmatpush.xpose.msrb.mxu1 %v992_v30 }
 0x29b   :  { %v1020_v35 = vand.u32 4294901760, %v1019_v32 }
 0x29c   :  { %999 = vmatmul.f32.vlgmr.msrb.gmra.mxu2 %v998_v33  ;;  %1119 = vmatmul.f32.vlgmr.msrb.gmra.mxu1 %v994_v22 }
 0x29d   :  { %1046 = vmatpush.xpose.msra.mxu2 %v1019_v32  ;;  %v1021_v36 = vsub.f32 %v1019_v32, %v1020_v35  ;;  %v1125_v37 = vpop.permute.xlu0 %1124  ;;  %1095 = vmatpush.xpose.msrb.mxu0 %v1020_v35 }
 0x29e   :  { %v1153_v38 = vsel %vm622_vm8, %v1125_v37, 0 }
 0x29f   :  { %v1022_v41 = vand.u32 4294901760, %v1021_v36  ;;  %v1170_v42 = vand.u32 4294901760, %v1153_v38 }
 0x2a0   :  { %1097 = vmatmul.f32.vlgmr.msrb.gmra.mxu0 %v994_v22 }
 0x2a1   :  { %v1197_v43 = vsub.f32 %v1153_v38, %v1170_v42  ;;  %1023 = vmatpush.xpose.msrb.mxu3 %v1022_v41  ;;  %1171 = vmatpush.xpose.msrb.mxu2 %v1170_v42 }
 0x2a2   :  { %1247 = vmatpush.xpose.msra.mxu1 %v1170_v42 }
 0x2a3   :  { %v1198_v45 = vand.u32 4294901760, %v1197_v43  ;;  %1224 = vmatpush.xpose.msra.mxu0 %v1197_v43 }
 0x2a4   :  { %1025 = vmatmul.f32.vlgmr.msrb.gmra.mxu3 %v994_v22  ;;  %1049 = vmatmul.f32.vlgmr.msra.gmra.mxu2 %v995_v25 }
 0x2a5   :  { %1069 = vmatpush.xpose.msra.mxu3 %v992_v30  ;;  %v1199_v46 = vsub.f32 %v1197_v43, %v1198_v45  ;;  %1251 = vmatmul.f32.vlgmr.msra.gmra.mxu1 %v1174_v44  ;;  %v6394_v30 = vsel %vm595_vm11, 1.0, %v6171_v14  ;;  %v6404_v43 = vsel %vm597_vm13, 1.0, %v6171_v14 }
 0x2a6   :  { %1273 = vmatpush.xpose.msra.mxu2 %v1198_v45  ;;  %v592_v45 = vadd.s32 2, %v584_v58 }
 0x2a7   :  { %v1200_v49 = vand.u32 4294901760, %v1199_v46 }
 0x2a8   :  { %1227 = vmatmul.f32.vlgmr.msra.gmra.mxu0 %v1173_v39  ;;  %vm599_vm1 = vcmp.eq.s32.totalorder %v6382_v0, %v592_v45 }
 0x2a9   :  { %1201 = vmatpush.xpose.msrb.mxu3 %v1200_v49  ;;  %v6428_v2 = vsel %vm599_vm1, 1.0, %v6171_v14 }
 0x2ac   :  { %1073 = vmatmul.f32.vlgmr.msra.gmra.mxu3 %v996_v26  ;;  %1177 = vmatmul.f32.vlgmr.msrb.gmra.mxu2 %v1176_v50 }
 0x2ad   :  { %1295 = vmatpush.xpose.msra.mxu3 %v1170_v42 }
 0x2b4   :  { %1203 = vmatmul.f32.vlgmr.msrb.gmra.mxu3 %v1172_v34  ;;  %1275 = vmatmul.f32.vlgmr.msra.gmra.mxu2 %v1172_v34 }
 0x2bc   :  { %1297 = vmatmul.f32.vlgmr.msra.gmra.mxu3 %v1172_v34 }
 0x2ce   :  { %v659_v52 = vpop.f32.mrf.mxu0 }
 0x2d4   :  { %v758_v61 = vpop.f32.mrf.mxu3 }
 0x2d6   :  { %v667_v53 = vpop.f32.mrf.mxu0  ;;  %v698_v54 = vpop.f32.mrf.mxu1 }
 0x2d7   :  { %v699_v56 = vadd.f32 %v698_v54, %v659_v52  ;;  %v728_v57 = vpop.f32.mrf.mxu2  ;;  %v6413_v52 = vsel %vm601_vm14, 1.0, %v6171_v14 }
 0x2d9   :  { %v729_v62 = vadd.f32 %v728_v57, %v699_v56  ;;  %v593_v56 = vadd.s32 1, %v584_v58 }
 0x2db   :  { %v759_v4 = vadd.f32 %v758_v61, %v729_v62  ;;  %vm600_vm2 = vcmp.eq.s32.totalorder %v6382_v0, %v593_v56 }
 0x2dd   :  { %v764_v20 = vpop.f32.mrf.mxu3 }
 0x2de   :  { %v702_v59 = vpop.f32.mrf.mxu1  ;;  %v791_v63 = vpop.f32.mrf.mxu0 }
 0x2df   :  { %v703_v3 = vadd.f32 %v702_v59, %v667_v53  ;;  %v733_v8 = vpop.f32.mrf.mxu2  ;;  %v792_v9 = vadd.f32 %v791_v63, %v759_v4  ;;  %v6418_v53 = vsel %vm598_vm15, 1.0, %v6171_v14 }
 0x2e1   :  { %v734_v10 = vadd.f32 %v733_v8, %v703_v3  ;;  %v6433_v8 = vsel %vm600_vm2, 1.0, %v6171_v14 }
 0x2e3   :  { %v765_v29 = vadd.f32 %v764_v20, %v734_v10 }
 0x2e6   :  { %v818_v11 = vpop.f32.mrf.mxu1  ;;  %v795_v22 = vpop.f32.mrf.mxu0 }
 0x2e7   :  { %v819_v13 = vadd.f32 %v818_v11, %v792_v9  ;;  %v796_v36 = vadd.f32 %v795_v22, %v765_v29 }
 0x2e9   :  { %v841_v25 = vperm.slane %v819_v13, 0  ;;  %v828_v26 = vrot.slane %v819_v13, 2  ;;  %v827_v24 = vrot.slane %v819_v13, 1  ;;  %v829_v28 = vrot.slane %v819_v13, 3 }
 0x2ea   :  { %v833_v31 = vrot.slane %v819_v13, 7  ;;  %v830_v35 = vrot.slane %v819_v13, 4  ;;  %v831_v55 = vrot.slane %v819_v13, 5  ;;  %v832_v61 = vrot.slane %v819_v13, 6 }
 0x2eb   :  { %v873_v32 = vmul.f32 %v6388_v15, %v841_v25  ;;  %v843_v33 = vperm.slane %v828_v26, 0  ;;  %v842_v34 = vperm.slane %v827_v24, 0  ;;  %v844_v41 = vperm.slane %v829_v28, 0 }
 0x2ec   :  { %v848_v44 = vperm.slane %v833_v31, 0  ;;  %v845_v50 = vperm.slane %v830_v35, 0  ;;  %v846_v1 = vperm.slane %v831_v55, 0  ;;  %v847_v4 = vperm.slane %v832_v61, 0 }
 0x2ed   :  { %v890_v37 = vsel %vm889_vm12, %v873_v32, 0.0  ;;  %v875_v38 = vmul.f32 %v6391_v16, %v843_v33  ;;  %v874_v39 = vmul.f32 %v6394_v30, %v842_v34  ;;  %v876_v54 = vmul.f32 %v6404_v43, %v844_v41 }
 0x2ee   :  { %v822_v42 = vpop.f32.mrf.mxu1  ;;  %891 = vadd.xlane.f32.xlu2 %v890_v37  ;;  %v880_v57 = vmul.f32 %v6413_v52, %v848_v44  ;;  %v877_v59 = vmul.f32 %v6418_v53, %v845_v50  ;;  %v878_v9 = vmul.f32 %v6428_v2, %v846_v1  ;;  %v879_v10 = vmul.f32 %v6433_v8, %v847_v4 }
 0x2ef   :  { %v6406_v46 = vadd.f32 %v822_v42, %v796_v36  ;;  %v896_v47 = vsel %vm889_vm12, %v875_v38, 0.0  ;;  %v893_v49 = vsel %vm889_vm12, %v874_v39, 0.0  ;;  %v899_v63 = vsel %vm889_vm12, %v876_v54, 0.0 }
 0x2f0   :  { %897 = vadd.xlane.f32.xlu0 %v896_v47  ;;  %894 = vadd.xlane.f32.xlu1 %v893_v49  ;;  %v911_v58 = vsel %vm889_vm12, %v880_v57, 0.0  ;;  %v902_v3 = vsel %vm889_vm12, %v877_v59, 0.0  ;;  %v905_v17 = vsel %vm889_vm12, %v878_v9, 0.0  ;;  %v908_v22 = vsel %vm889_vm12, %v879_v10, 0.0 }
 0x2f1   :  { %v835_v62 = vrot.slane %v6406_v46, 2  ;;  %v838_v12 = vrot.slane %v6406_v46, 5  ;;  %v834_v13 = vrot.slane %v6406_v46, 1  ;;  %v849_v20 = vperm.slane %v6406_v46, 0 }
 0x2f2   :  { %v836_v29 = vrot.slane %v6406_v46, 3  ;;  %v837_v33 = vrot.slane %v6406_v46, 4  ;;  %v839_v41 = vrot.slane %v6406_v46, 6  ;;  %v840_v44 = vrot.slane %v6406_v46, 7 }
 0x2f3   :  { %v851_v7 = vperm.slane %v835_v62, 0  ;;  %v854_v26 = vperm.slane %v838_v12, 0  ;;  %v850_v24 = vperm.slane %v834_v13, 0  ;;  %v881_v28 = vmul.f32 %v6388_v15, %v849_v20 }
 0x2f4   :  { %v852_v35 = vperm.slane %v836_v29, 0  ;;  %v853_v38 = vperm.slane %v837_v33, 0  ;;  %v855_v47 = vperm.slane %v839_v41, 0  ;;  %v856_v50 = vperm.slane %v840_v44, 0 }
 0x2f5   :  { %v883_v11 = vmul.f32 %v6391_v16, %v851_v7  ;;  %v886_v31 = vmul.f32 %v6428_v2, %v854_v26  ;;  %v882_v32 = vmul.f32 %v6394_v30, %v850_v24  ;;  %v914_v34 = vsel %vm889_vm12, %v881_v28, 0.0 }
 0x2f6   :  { %900 = vadd.xlane.f32.xlu2 %v899_v63  ;;  %v884_v39 = vmul.f32 %v6404_v43, %v852_v35  ;;  %v885_v42 = vmul.f32 %v6418_v53, %v853_v38  ;;  %v887_v54 = vmul.f32 %v6433_v8, %v855_v47  ;;  %v888_v55 = vmul.f32 %v6413_v52, %v856_v50  ;;  %v577_v35 = vld [vmem:[%s7189_s1] sm:$0x1] }
 0x2f7   :  { %v920_v25 = vsel %vm889_vm12, %v883_v11, 0.0  ;;  %v929_v36 = vsel %vm889_vm12, %v886_v31, 0.0  ;;  %v917_v37 = vsel %vm889_vm12, %v882_v32, 0.0  ;;  %vm579_vm11 = vcmp.gt.s32.totalorder %v577_v35, 0 }
 0x2f8   :  { %912 = vadd.xlane.f32.xlu0 %v911_v58  ;;  %903 = vadd.xlane.f32.xlu1 %v902_v3  ;;  %v923_v45 = vsel %vm889_vm12, %v884_v39, 0.0  ;;  %v926_v49 = vsel %vm889_vm12, %v885_v42, 0.0  ;;  %v932_v56 = vsel %vm889_vm12, %v887_v54, 0.0  ;;  %v935_v57 = vsel %vm889_vm12, %v888_v55, 0.0 }
 0x2f9   :  { %v581_v50 = vsel %vm579_vm11, -1e+30, %v6171_v14 }
 0x2fe   :  { %906 = vadd.xlane.f32.xlu2 %v905_v17 }
 0x300   :  { %909 = vadd.xlane.f32.xlu1 %v908_v22  ;;  %921 = vadd.xlane.f32.xlu0 %v920_v25 }
 0x306   :  { %915 = vadd.xlane.f32.xlu2 %v914_v34 }
 0x308   :  { %930 = vadd.xlane.f32.xlu0 %v929_v36  ;;  %918 = vadd.xlane.f32.xlu1 %v917_v37 }
 0x30e   :  { %924 = vadd.xlane.f32.xlu2 %v923_v45 }
 0x310   :  { %927 = vadd.xlane.f32.xlu1 %v926_v49 }
 0x316   :  { %933 = vadd.xlane.f32.xlu2 %v932_v56 }
 0x318   :  { %936 = vadd.xlane.f32.xlu1 %v935_v57 }
 0x319   :  { %v1120_v55 = vpop.f32.mrf.mxu1 }
 0x31d   :  { %v1098_v47 = vpop.f32.mrf.mxu0 }
 0x31f   :  { %v1000_v12 = vpop.f32.mrf.mxu2 }
 0x327   :  { %v1026_v22 = vpop.f32.mrf.mxu3  ;;  %v1050_v37 = vpop.f32.mrf.mxu2 }
 0x32f   :  { %v1074_v42 = vpop.f32.mrf.mxu3 }
 0x361   :  { %v892_v59 = vpop.xlane.xlu2 %891 }
 0x362   :  { %v949_v1 = vperm.slane %v892_v59, %v6382_v0 }
 0x363   :  { %v895_v46 = vpop.xlane.xlu1 %894  ;;  %v898_v61 = vpop.xlane.xlu0 %897 }
 0x364   :  { %v950_v62 = vperm.slane %v895_v46, %v6382_v0  ;;  %v951_v58 = vperm.slane %v898_v61, %v6382_v0 }
 0x366   :  { %v958_v4 = vsel %vm957_vm3, %v950_v62, %v949_v1  ;;  %v6486_v62 = vperm.slane %v581_v50, 0 }
 0x367   :  { %v960_v9 = vsel %vm959_vm4, %v951_v58, %v958_v4 }
 0x369   :  { %v901_v63 = vpop.xlane.xlu2 %900 }
 0x36a   :  { %v952_v7 = vperm.slane %v901_v63, %v6382_v0 }
 0x36b   :  { %v904_v3 = vpop.xlane.xlu1 %903  ;;  %v913_v17 = vpop.xlane.xlu0 %912 }
 0x36c   :  { %v953_v10 = vperm.slane %v904_v3, %v6382_v0  ;;  %v962_v11 = vsel %vm961_vm5, %v952_v7, %v960_v9  ;;  %v956_v29 = vperm.slane %v913_v17, %v6382_v0 }
 0x36e   :  { %v964_v25 = vsel %vm963_vm6, %v953_v10, %v962_v11 }
 0x371   :  { %v907_v13 = vpop.xlane.xlu2 %906 }
 0x372   :  { %v954_v20 = vperm.slane %v907_v13, %v6382_v0 }
 0x373   :  { %v910_v26 = vpop.xlane.xlu1 %909  ;;  %v922_v39 = vpop.xlane.xlu0 %921 }
 0x374   :  { %v966_v24 = vsel %vm965_vm7, %v954_v20, %v964_v25  ;;  %v955_v28 = vperm.slane %v910_v26, %v6382_v0  ;;  %v1136_v59 = vperm.slane %v922_v39, %v6382_v0  ;;  %v1178_v25 = vpop.f32.mrf.mxu2 }
 0x376   :  { %v968_v31 = vsel %vm967_vm9, %v955_v28, %v966_v24  ;;  %v1204_v28 = vpop.f32.mrf.mxu3 }
 0x377   :  { %v970_v32 = vsel %vm969_vm10, %v956_v29, %v968_v31 }
 0x378   :  { %v1001_v33 = vadd.f32 %v1000_v12, %v970_v32  ;;  %v578_v32 = vld [vmem:[%s7189_s1 + $0x1] sm:$0x1]  ;;  %s6173_s1 = smov 88  }
 0x379   :  { %v916_v34 = vpop.xlane.xlu2 %915  ;;  %vm580_vm13 = vcmp.gt.s32.totalorder %v578_v32, 0 }
 0x37a   :  { %v1027_v36 = vadd.f32 %v1026_v22, %v1001_v33  ;;  %v1134_v49 = vperm.slane %v916_v34, %v6382_v0  ;;  %v1228_v34 = vpop.f32.mrf.mxu0  ;;  %v582_v39 = vsel %vm580_vm13, -1e+30, %v6171_v14 }
 0x37b   :  { %v919_v38 = vpop.xlane.xlu1 %918  ;;  %v931_v7 = vpop.xlane.xlu0 %930 }
 0x37c   :  { %v1051_v41 = vadd.f32 %v1050_v37, %v1027_v36  ;;  %v1135_v44 = vperm.slane %v919_v38, %v6382_v0  ;;  %v1139_v12 = vperm.slane %v931_v7, %v6382_v0  ;;  %v1252_v36 = vpop.f32.mrf.mxu1  ;;  %v1276_v38 = vpop.f32.mrf.mxu2 }
 0x37e   :  { %v1075_v45 = vadd.f32 %v1074_v42, %v1051_v41  ;;  %v1142_v56 = vsel %vm957_vm3, %v1135_v44, %v1134_v49  ;;  %v1298_v42 = vpop.f32.mrf.mxu3 }
 0x37f   :  { %v1143_v1 = vsel %vm959_vm4, %v1136_v59, %v1142_v56 }
 0x380   :  { %v1099_v54 = vadd.f32 %v1098_v47, %v1075_v45  ;;  %v6504_v45 = vperm.slane %v582_v39, 0 }
 0x381   :  { %v925_v57 = vpop.xlane.xlu2 %924 }
 0x382   :  { %v1137_v46 = vperm.slane %v925_v57, %v6382_v0  ;;  %v1121_v61 = vadd.f32 %v1120_v55, %v1099_v54 }
 0x383   :  { %v928_v63 = vpop.xlane.xlu1 %927 }
 0x384   :  { %v1138_v58 = vperm.slane %v928_v63, %v6382_v0  ;;  %v1301_v3 = vmul.f32 0.35355338, %v1121_v61  ;;  %v1144_v4 = vsel %vm961_vm5, %v1137_v46, %v1143_v1 }
 0x386   :  { %v1309_v9 = vadd.f32 %v6486_v62, %v1301_v3  ;;  %v1145_v10 = vsel %vm963_vm6, %v1138_v58, %v1144_v4 }
 0x387   :  { %v1146_v20 = vsel %vm965_vm7, %v1139_v12, %v1145_v10 }
 0x388   :  { %v1311_v11 = vsel %vm622_vm8, %v1309_v9, -inf }
 0x389   :  { %v934_v13 = vpop.xlane.xlu2 %933  ;;  %1312 = vmax.xlane.f32.xlu0 %v1311_v11 }
 0x38a   :  { %v1140_v17 = vperm.slane %v934_v13, %v6382_v0 }
 0x38b   :  { %v937_v22 = vpop.xlane.xlu1 %936 }
 0x38c   :  { %v1147_v26 = vsel %vm967_vm9, %v1140_v17, %v1146_v20  ;;  %v1141_v24 = vperm.slane %v937_v22, %v6382_v0 }
 0x38e   :  { %v1148_v29 = vsel %vm969_vm10, %v1141_v24, %v1147_v26 }
 0x38f   :  { %v1179_v31 = vadd.f32 %v1178_v25, %v1148_v29 }
 0x391   :  { %v1205_v33 = vadd.f32 %v1204_v28, %v1179_v31 }
 0x393   :  { %v1229_v35 = vadd.f32 %v1228_v34, %v1205_v33 }
 0x395   :  { %v1253_v37 = vadd.f32 %v1252_v36, %v1229_v35 }
 0x397   :  { %v1277_v41 = vadd.f32 %v1276_v38, %v1253_v37 }
 0x399   :  { %v1299_v44 = vadd.f32 %v1298_v42, %v1277_v41 }
 0x39b   :  { %v1302_v47 = vmul.f32 0.35355338, %v1299_v44 }
 0x39d   :  { %1669 = vrot.lane.b32.xlu0 %v6366_v60, %s6172_s27  ;;  %v1310_v49 = vadd.f32 %v6504_v45, %v1302_v47 }
 0x39f   :  { %v1314_v50 = vsel %vm622_vm8, %v1310_v49, -inf }
 0x3a0   :  { %1315 = vmax.xlane.f32.xlu2 %v1314_v50 }
 0x3b8   :  { %1359 = vrot.lane.b32.xlu2 %v6341_v21, %s6167_s23 }
 0x3c0   :  { %1667 = vrot.lane.b32.xlu2 %v6357_v48, %s6172_s27 }
 0x3c8   :  { %1983 = vrot.lane.b32.xlu2 %v6341_v21, %s6173_s1 }
 0x3d0   :  { %2159 = vrot.lane.b32.xlu2 %v6376_v27, %s6172_s27 }
 0x3fc   :  { %v1313_v14 = vpop.xlane.xlu0 %1312 }
 0x3fd   :  { %v1317_v54 = vsub.f32 %v1309_v9, %v1313_v14 }
 0x3ff   :  { %v1319_v55 = vmul.f32 1.442695, %v1317_v54 }
 0x401   :  { %6125 = vpow2.f32 %v1319_v55 }
 0x407   :  { %v6126_v56 = vpop.eup %6125 }
 0x408   :  { %v1323_v57 = vsel %vm622_vm8, %v6126_v56, 0.0 }
 0x409   :  { %1324 = vadd.xlane.f32.xlu1 %v1323_v57 }
 0x40f   :  { %v1670_v17 = vpop.permute.xlu0 %1669 }
 0x410   :  { %v1677_v25 = vsel %vm622_vm8, %v1670_v17, 0 }
 0x411   :  { %v6534_v31 = vand.u32 4294901760, %v1677_v25 }
 0x413   :  { %v1316_v59 = vpop.xlane.xlu2 %1315  ;;  %v6538_v37 = vsub.f32 %v1677_v25, %v6534_v31 }
 0x414   :  { %v1318_v46 = vsub.f32 %v1310_v49, %v1316_v59 }
 0x415   :  { %v1730_v42 = vand.u32 4294901760, %v6538_v37 }
 0x416   :  { %v1321_v61 = vmul.f32 1.442695, %v1318_v46 }
 0x417   :  { %v1731_v55 = vsub.f32 %v6538_v37, %v1730_v42 }
 0x418   :  { %6127 = vpow2.f32 %v1321_v61 }
 0x41b   :  { %v1360_v63 = vpop.permute.xlu2 %1359 }
 0x41c   :  { %v1380_v1 = vand.u32 4294901760, %v1360_v63 }
 0x41e   :  { %v6519_v58 = vpop.eup %6127  ;;  %v1407_v3 = vsub.f32 %v1360_v63, %v1380_v1  ;;  %1381 = vmatpush.msrb.mxu0 %v1380_v1  ;;  %1457 = vmatpush.msrb.mxu3 %v1380_v1 }
 0x41f   :  { %v1326_v4 = vsel %vm622_vm8, %v6519_v58, 0.0 }
 0x420   :  { %v1408_v7 = vand.u32 4294901760, %v1407_v3  ;;  %1327 = vadd.xlane.f32.xlu0 %v1326_v4  ;;  %1434 = vmatpush.msrb.mxu2 %v1407_v3 }
 0x422   :  { %v1409_v9 = vsub.f32 %v1407_v3, %v1408_v7  ;;  %1511 = vrot.lane.b32.xlu1 %v6345_v23, %s6167_s23  ;;  %1483 = vmatpush.msra.mxu0 %v1408_v7 }
 0x423   :  { %v1668_v28 = vpop.permute.xlu2 %1667 }
 0x424   :  { %v1410_v10 = vand.u32 4294901760, %v1409_v9  ;;  %v1675_v33 = vsel %vm622_vm8, %v1668_v28, 0 }
 0x425   :  { %v6540_v38 = vand.u32 4294901760, %v1675_v33 }
 0x426   :  { %1411 = vmatpush.msrb.mxu1 %v1410_v10 }
 0x427   :  { %v6545_v44 = vsub.f32 %v1675_v33, %v6540_v38 }
 0x428   :  { %1505 = vmatpush.msra.mxu1 %v1380_v1  ;;  %v1732_v1 = vand.u32 4294901760, %v1731_v55 }
 0x42a   :  { %1665 = vrot.lane.b32.xlu1 %v6360_v51, %s6172_s27 }
 0x42b   :  { %v1984_v3 = vpop.permute.xlu2 %1983 }
 0x432   :  { %2161 = vrot.lane.b32.xlu1 %v6345_v23, %s6173_s1 }
 0x434   :  { %1663 = vrot.lane.b32.xlu0 %v6353_v40, %s6172_s27 }
 0x43c   :  { %1981 = vrot.lane.b32.xlu0 %v6371_v19, %s6172_s27 }
 0x47c   :  { %v1325_v11 = vpop.xlane.xlu1 %1324 }
 0x47d   :  { %6129 = vrcp.f32 %v1325_v11  ;;  %v1340_v22 = vand.u32 2147483648, %v1325_v11  ;;  %v1338_v24 = vand.u32 2147483647, %v1325_v11  ;;  %vm1334_vm15 = vweird.f32 %v1325_v11 }
 0x47f   :  { %v1341_v32 = vor.u32 1.1754944e-38, %v1340_v22  ;;  %vm1339_vm2 = vcmp.eq.f32.partialorder %v1338_v24, 8.507059e+37 }
 0x483   :  { %v6130_v12 = vpop.eup %6129 }
 0x484   :  { %v1330_v13 = vmul.f32 %v6130_v12, %v1325_v11  ;;  %vm1335_vm14 = vweird.f32 %v6130_v12 }
 0x485   :  { %vm1336_vm1 = vmor %vm1334_vm15, %vm1335_vm14 }
 0x486   :  { %v1331_v20 = vsub.f32 1.0, %v1330_v13 }
 0x488   :  { %v1332_v26 = vmul.f32 %v6130_v12, %v1331_v20 }
 0x48a   :  { %v1333_v29 = vadd.f32 %v6130_v12, %v1332_v26 }
 0x48c   :  { %v1337_v34 = vsel %vm1336_vm1, %v6130_v12, %v1333_v29  ;;  %v2011_v12 = vsel %vm622_vm8, %v1984_v3, 0 }
 0x48d   :  { %v1342_v35 = vsel %vm1339_vm2, %v1341_v32, %v1337_v34  ;;  %v2028_v26 = vand.u32 4294901760, %v2011_v12 }
 0x48e   :  { %v1343_v36 = vmul.f32 %v6126_v56, %v1342_v35  ;;  %v1736_v56 = vand.u32 4294901760, %v6545_v44 }
 0x48f   :  { %v2055_v34 = vsub.f32 %v2011_v12, %v2028_v26 }
 0x490   :  { %v1363_v39 = vsel %vm622_vm8, %v1343_v36, 0  ;;  %v1737_v9 = vsub.f32 %v6545_v44, %v1736_v56 }
 0x491   :  { %v1382_v41 = vand.u32 4294901760, %v1363_v39 }
 0x492   :  { %v1738_v22 = vand.u32 4294901760, %v1737_v9 }
 0x493   :  { %v1328_v47 = vpop.xlane.xlu0 %1327  ;;  %1413 = vmatmul.f32.vlgmr.msrb.gmra.mxu1 %v1382_v41  ;;  %v1383_v49 = vsub.f32 %v1363_v39, %v1382_v41 }
 0x494   :  { %6131 = vrcp.f32 %v1328_v47  ;;  %v1512_v50 = vpop.permute.xlu1 %1511  ;;  %v1355_v13 = vand.u32 2147483648, %v1328_v47  ;;  %v1353_v20 = vand.u32 2147483647, %v1328_v47  ;;  %vm1349_vm13 = vweird.f32 %v1328_v47 }
 0x495   :  { %v1532_v14 = vand.u32 4294901760, %v1512_v50  ;;  %1437 = vmatmul.f32.vlgmr.msrb.gmra.mxu2 %v1383_v49  ;;  %v1384_v54 = vand.u32 4294901760, %v1383_v49 }
 0x496   :  { %v1356_v24 = vor.u32 1.1754944e-38, %v1355_v13  ;;  %vm1354_vm15 = vcmp.eq.f32.partialorder %v1353_v20, 8.507059e+37 }
 0x497   :  { %v1559_v57 = vsub.f32 %v1512_v50, %v1532_v14  ;;  %1461 = vmatmul.f32.vlgmr.msrb.gmra.mxu3 %v1384_v54  ;;  %1533 = vmatpush.msra.mxu2 %v1532_v14  ;;  %v1385_v59 = vsub.f32 %v1383_v49, %v1384_v54 }
 0x498   :  { %1609 = vmatpush.msrb.mxu1 %v1532_v14 }
 0x499   :  { %v1560_v46 = vand.u32 4294901760, %v1559_v57  ;;  %v1386_v61 = vand.u32 4294901760, %v1385_v59 }
 0x49a   :  { %v6132_v63 = vpop.eup %6131 }
 0x49b   :  { %v1345_v4 = vmul.f32 %v6132_v63, %v1328_v47  ;;  %v1561_v7 = vsub.f32 %v1559_v57, %v1560_v46  ;;  %1387 = vmatmul.f32.vlgmr.msrb.gmra.mxu0 %v1386_v61  ;;  %1507 = vmatmul.f32.vlgmr.msra.gmra.mxu1 %v1382_v41  ;;  %vm1350_vm11 = vweird.f32 %v6132_v63 }
 0x49c   :  { %1586 = vmatpush.msrb.mxu0 %v1559_v57  ;;  %1635 = vmatpush.msrb.mxu2 %v1560_v46  ;;  %vm1351_vm14 = vmor %vm1349_vm13, %vm1350_vm11  ;;  %v1666_v32 = vpop.permute.xlu1 %1665 }
 0x49d   :  { %v1346_v10 = vsub.f32 1.0, %v1345_v4  ;;  %v1562_v11 = vand.u32 4294901760, %v1561_v7  ;;  %1733 = vmatpush.xpose.msra.mxu1 %v1732_v1  ;;  %v1673_v36 = vsel %vm622_vm8, %v1666_v32, 0 }
 0x49f   :  { %v1347_v17 = vmul.f32 %v6132_v63, %v1346_v10  ;;  %1563 = vmatpush.msra.mxu3 %v1562_v11 }
 0x4a1   :  { %1657 = vmatpush.msrb.mxu3 %v1532_v14  ;;  %v1348_v25 = vadd.f32 %v6132_v63, %v1347_v17  ;;  %1739 = vmatpush.xpose.msra.mxu1 %v1738_v22  ;;  %v2056_v14 = vand.u32 4294901760, %v2055_v34 }
 0x4a3   :  { %v1352_v28 = vsel %vm1351_vm14, %v6132_v63, %v1348_v25  ;;  %1485 = vmatmul.f32.vlgmr.msra.gmra.mxu0 %v1382_v41  ;;  %v6561_v41 = vand.u32 4294901760, %v1673_v36  ;;  %v2057_v59 = vsub.f32 %v2055_v34, %v2056_v14  ;;  %v2160_v25 = vpop.permute.xlu2 %2159 }
 0x4a4   :  { %v1357_v29 = vsel %vm1354_vm15, %v1356_v24, %v1352_v28  ;;  %1694 = vmatpush.xpose.msra.mxu0 %v6534_v31  ;;  %v2187_v24 = vsel %vm622_vm8, %v2160_v25, 0 }
 0x4a5   :  { %v1358_v33 = vmul.f32 %v6519_v58, %v1357_v29  ;;  %v1706_v46 = vsub.f32 %v1673_v36, %v6561_v41  ;;  %v2058_v3 = vand.u32 4294901760, %v2057_v59  ;;  %v2208_v28 = vand.u32 4294901760, %v2187_v24 }
 0x4a6   :  { %v1664_v35 = vpop.permute.xlu0 %1663 }
 0x4a7   :  { %v1671_v39 = vsel %vm622_vm8, %v1664_v35, 0  ;;  %v1515_v47 = vsel %vm622_vm8, %v1358_v33, 0  ;;  %v1707_v7 = vand.u32 4294901760, %v1706_v46  ;;  %v2209_v32 = vsub.f32 %v2187_v24, %v2208_v28 }
 0x4a8   :  { %v1697_v49 = vand.u32 4294901760, %v1671_v39  ;;  %1696 = vmatpush.xpose.msra.mxu0 %v6540_v38  ;;  %v1534_v50 = vand.u32 4294901760, %v1515_v47 }
 0x4a9   :  { %v2210_v33 = vand.u32 4294901760, %v2209_v32 }
 0x4aa   :  { %v1698_v54 = vsub.f32 %v1671_v39, %v1697_v49  ;;  %1565 = vmatmul.f32.vlgmr.msra.gmra.mxu3 %v1534_v50  ;;  %v1535_v55 = vsub.f32 %v1515_v47, %v1534_v50 }
 0x4ab   :  { %1795 = vmatpush.xpose.msra.mxu3 %v6534_v31 }
 0x4ac   :  { %v1699_v58 = vand.u32 4294901760, %v1698_v54  ;;  %1589 = vmatmul.f32.vlgmr.msrb.gmra.mxu0 %v1535_v55  ;;  %v1536_v57 = vand.u32 4294901760, %v1535_v55 }
 0x4ad   :  { %1828 = vmatpush.xpose.msrb.mxu0 %v1730_v42  ;;  %v2162_v42 = vpop.permute.xlu1 %2161 }
 0x4ae   :  { %v1700_v61 = vsub.f32 %v1698_v54, %v1699_v58  ;;  %1613 = vmatmul.f32.vlgmr.msrb.gmra.mxu1 %v1536_v57  ;;  %v1537_v63 = vsub.f32 %v1535_v55, %v1536_v57  ;;  %v2189_v9 = vsel %vm622_vm8, %v2162_v42, 0  ;;  %v1982_v10 = vpop.permute.xlu0 %1981 }
 0x4af   :  { %1797 = vmatpush.xpose.msra.mxu3 %v6540_v38  ;;  %1857 = vmatpush.xpose.msrb.mxu1 %v6534_v31  ;;  %v1708_v31 = vsub.f32 %v1706_v46, %v1707_v7 }
 0x4b0   :  { %v1538_v1 = vand.u32 4294901760, %v1537_v63  ;;  %v1701_v4 = vand.u32 4294901760, %v1700_v61 }
 0x4b1   :  { %1832 = vmatpush.xpose.msrb.mxu0 %v1736_v56  ;;  %v2206_v56 = vand.u32 4294901760, %v2189_v9  ;;  %v1709_v11 = vand.u32 4294901760, %v1708_v31 }
 0x4b2   :  { %1539 = vmatmul.f32.vlgmr.msra.gmra.mxu2 %v1538_v1  ;;  %1659 = vmatmul.f32.vlgmr.msrb.gmra.mxu3 %v1534_v50 }
 0x4b3   :  { %1765 = vmatpush.xpose.msra.mxu2 %v6538_v37  ;;  %1859 = vmatpush.xpose.msrb.mxu1 %v6540_v38  ;;  %v2233_v37 = vsub.f32 %v2189_v9, %v2206_v56  ;;  %v2009_v38 = vsel %vm622_vm8, %v1982_v10, 0 }
 0x4b4   :  { %2059 = vmatpush.xpose.msrb.mxu3 %v2058_v3  ;;  %1702 = vmatmul.f32.vlgmr.msra.gmra.mxu0 %v1701_v4  ;;  %v2030_v12 = vand.u32 4294901760, %v2009_v38 }
 0x4b5   :  { %2131 = vmatpush.xpose.msra.mxu0 %v2056_v14  ;;  %v2234_v13 = vand.u32 4294901760, %v2233_v37 }
 0x4b6   :  { %1741 = vmatmul.f32.vlgmr.msra.gmra.mxu1 %v1697_v49 }
 0x4b7   :  { %1768 = vmatpush.xpose.msra.mxu2 %v6545_v44  ;;  %2153 = vmatpush.xpose.msra.mxu1 %v2028_v26  ;;  %v2031_v44 = vsub.f32 %v2009_v38, %v2030_v12  ;;  %v2235_v17 = vsub.f32 %v2233_v37, %v2234_v13 }
 0x4b9   :  { %v2032_v20 = vand.u32 4294901760, %v2031_v44  ;;  %v2236_v22 = vand.u32 4294901760, %v2235_v17 }
 0x4ba   :  { %1637 = vmatmul.f32.vlgmr.msrb.gmra.mxu2 %v1534_v50  ;;  %1801 = vmatmul.f32.vlgmr.msra.gmra.mxu3 %v1699_v58 }
 0x4bb   :  { %2029 = vmatpush.xpose.msrb.mxu2 %v2028_v26  ;;  %2105 = vmatpush.xpose.msra.mxu3 %v2028_v26  ;;  %v2033_v26 = vsub.f32 %v2031_v44, %v2032_v20 }
 0x4bc   :  { %1710 = vmatmul.f32.gmra.mxu0 %v1709_v11 }
 0x4bd   :  { %v2034_v29 = vand.u32 4294901760, %v2033_v26 }
 0x4be   :  { %1745 = vmatmul.f32.gmra.mxu1 %v6561_v41 }
 0x4c2   :  { %1771 = vmatmul.f32.vlgmr.msra.gmra.mxu2 %v1698_v54  ;;  %1807 = vmatmul.f32.gmra.mxu3 %v1707_v7 }
 0x4c3   :  { %2082 = vmatpush.xpose.msra.mxu2 %v2055_v34  ;;  %v2211_v34 = vsub.f32 %v2209_v32, %v2210_v33 }
 0x4c4   :  { %1834 = vmatmul.f32.vlgmr.msrb.gmra.mxu0 %v1697_v49 }
 0x4c5   :  { %2260 = vmatpush.xpose.msrb.mxu0 %v2233_v37  ;;  %v2212_v35 = vand.u32 4294901760, %v2211_v34 }
 0x4c6   :  { %1861 = vmatmul.f32.vlgmr.msrb.gmra.mxu1 %v1697_v49 }
 0x4c7   :  { %2283 = vmatpush.xpose.msrb.mxu1 %v2206_v56 }
 0x4ca   :  { %1776 = vmatmul.f32.gmra.mxu2 %v1706_v46  ;;  %2061 = vmatmul.f32.vlgmr.msrb.gmra.mxu3 %v2030_v12 }
 0x4cb   :  { %2237 = vmatpush.xpose.msrb.mxu3 %v2236_v22 }
 0x4cc   :  { %1838 = vmatmul.f32.gmra.mxu0 %v6561_v41 }
 0x4ce   :  { %1865 = vmatmul.f32.gmra.mxu1 %v6561_v41 }
 0x4d2   :  { %2035 = vmatmul.f32.vlgmr.msrb.gmra.mxu2 %v2034_v29  ;;  %2109 = vmatmul.f32.vlgmr.msra.gmra.mxu3 %v2032_v20 }
 0x4d3   :  { %2207 = vmatpush.xpose.msrb.mxu2 %v2206_v56  ;;  %2331 = vmatpush.xpose.msra.mxu3 %v2206_v56 }
 0x4d4   :  { %2133 = vmatmul.f32.vlgmr.msra.gmra.mxu0 %v2030_v12 }
 0x4d6   :  { %2155 = vmatmul.f32.vlgmr.msra.gmra.mxu1 %v2030_v12 }
 0x4da   :  { %2085 = vmatmul.f32.vlgmr.msra.gmra.mxu2 %v2031_v44  ;;  %2239 = vmatmul.f32.vlgmr.msrb.gmra.mxu3 %v2208_v28 }
 0x4db   :  { %2309 = vmatpush.xpose.msra.mxu2 %v2234_v13 }
 0x4dc   :  { %2263 = vmatmul.f32.vlgmr.msrb.gmra.mxu0 %v2209_v32 }
 0x4de   :  { %2287 = vmatmul.f32.vlgmr.msrb.gmra.mxu1 %v2210_v33 }
 0x4e2   :  { %2213 = vmatmul.f32.vlgmr.msrb.gmra.mxu2 %v2212_v35  ;;  %2333 = vmatmul.f32.vlgmr.msra.gmra.mxu3 %v2208_v28 }
 0x4ea   :  { %2311 = vmatmul.f32.vlgmr.msra.gmra.mxu2 %v2208_v28 }
 0x510   :  { %v6582_v39 = vpop.f32.mrf.mxu1 }
 0x518   :  { %v6580_v36 = vpop.f32.mrf.mxu0  ;;  %v6586_v49 = vpop.f32.mrf.mxu1 }
 0x519   :  { %v6592_v41 = vpop.f32.mrf.mxu2 }
 0x51a   :  { %v6588_v50 = vpop.f32.mrf.mxu3 }
 0x520   :  { %v6584_v47 = vpop.f32.mrf.mxu0 }
 0x529   :  { %v6590_v14 = vpop.f32.mrf.mxu0 }
 0x52b   :  { %v6594_v54 = vpop.f32.mrf.mxu1 }
 0x52d   :  { %v6596_v55 = vpop.f32.mrf.mxu3 }
 0x531   :  { %v1703_v58 = vpop.f32.mrf.mxu0 }
 0x533   :  { %v1742_v59 = vpop.f32.mrf.mxu1 }
 0x534   :  { %v1743_v3 = vadd.f32 %v1742_v59, %v1703_v58 }
 0x535   :  { %v6598_v57 = vpop.f32.mrf.mxu2  ;;  %v6600_v46 = vpop.f32.mrf.mxu3 }
 0x539   :  { %v1711_v63 = vpop.f32.mrf.mxu0 }
 0x53b   :  { %v1746_v1 = vpop.f32.mrf.mxu1 }
 0x53c   :  { %v1747_v11 = vadd.f32 %v1746_v1, %v1711_v63 }
 0x53d   :  { %v6602_v61 = vpop.f32.mrf.mxu2  ;;  %v1802_v4 = vpop.f32.mrf.mxu3 }
 0x541   :  { %v1835_v31 = vpop.f32.mrf.mxu0 }
 0x543   :  { %v1862_v10 = vpop.f32.mrf.mxu1 }
 0x545   :  { %v1772_v7 = vpop.f32.mrf.mxu2  ;;  %v1808_v20 = vpop.f32.mrf.mxu3 }
 0x546   :  { %v1773_v42 = vadd.f32 %v1772_v7, %v1743_v3 }
 0x548   :  { %v1803_v9 = vadd.f32 %v1802_v4, %v1773_v42 }
 0x549   :  { %v1839_v59 = vpop.f32.mrf.mxu0 }
 0x54a   :  { %v1836_v56 = vadd.f32 %v1835_v31, %v1803_v9 }
 0x54b   :  { %v1866_v31 = vpop.f32.mrf.mxu1 }
 0x54c   :  { %v1863_v37 = vadd.f32 %v1862_v10, %v1836_v56 }
 0x54d   :  { %v1777_v38 = vpop.f32.mrf.mxu2 }
 0x54e   :  { %v1778_v12 = vadd.f32 %v1777_v38, %v1747_v11  ;;  %v1885_v13 = vperm.slane %v1863_v37, 0  ;;  %v1872_v44 = vrot.slane %v1863_v37, 2  ;;  %v1871_v17 = vrot.slane %v1863_v37, 1 }
 0x54f   :  { %v1873_v22 = vrot.slane %v1863_v37, 3  ;;  %v1875_v25 = vrot.slane %v1863_v37, 5  ;;  %v1874_v26 = vrot.slane %v1863_v37, 4  ;;  %v1876_v9 = vrot.slane %v1863_v37, 6 }
 0x550   :  { %v1809_v24 = vadd.f32 %v1808_v20, %v1778_v12  ;;  %v1917_v28 = vmul.f32 %v6388_v15, %v1885_v13  ;;  %v1887_v29 = vperm.slane %v1872_v44, 0  ;;  %v1886_v32 = vperm.slane %v1871_v17, 0 }
 0x551   :  { %v1888_v58 = vperm.slane %v1873_v22, 0  ;;  %v1890_v63 = vperm.slane %v1875_v25, 0  ;;  %v1889_v7 = vperm.slane %v1874_v26, 0  ;;  %v1877_v38 = vrot.slane %v1863_v37, 7 }
 0x552   :  { %v1933_v33 = vsel %vm889_vm12, %v1917_v28, 0.0  ;;  %v1919_v34 = vmul.f32 %v6391_v16, %v1887_v29  ;;  %v1918_v35 = vmul.f32 %v6394_v30, %v1886_v32  ;;  %v1840_v1 = vadd.f32 %v1839_v59, %v1809_v24 }
 0x553   :  { %1934 = vadd.xlane.f32.xlu0 %v1933_v33  ;;  %v1920_v42 = vmul.f32 %v6404_v43, %v1888_v58  ;;  %v1922_v10 = vmul.f32 %v6428_v2, %v1890_v63  ;;  %v1921_v11 = vmul.f32 %v6418_v53, %v1889_v7  ;;  %v1891_v13 = vperm.slane %v1876_v9, 0 }
 0x554   :  { %v1939_v3 = vsel %vm889_vm12, %v1919_v34, 0.0  ;;  %v1936_v4 = vsel %vm889_vm12, %v1918_v35, 0.0  ;;  %v1867_v56 = vadd.f32 %v1866_v31, %v1840_v1  ;;  %v1892_v20 = vperm.slane %v1877_v38, 0 }
 0x555   :  { %1940 = vadd.xlane.f32.xlu2 %v1939_v3  ;;  %1937 = vadd.xlane.f32.xlu1 %v1936_v4  ;;  %v1942_v12 = vsel %vm889_vm12, %v1920_v42, 0.0  ;;  %v1948_v44 = vsel %vm889_vm12, %v1922_v10, 0.0  ;;  %v1945_v17 = vsel %vm889_vm12, %v1921_v11, 0.0  ;;  %v1923_v25 = vmul.f32 %v6433_v8, %v1891_v13 }
 0x556   :  { %v1893_v22 = vperm.slane %v1867_v56, 0  ;;  %v1878_v26 = vrot.slane %v1867_v56, 1  ;;  %v1924_v24 = vmul.f32 %v6413_v52, %v1892_v20  ;;  %v1880_v37 = vrot.slane %v1867_v56, 3 }
 0x557   :  { %v1879_v29 = vrot.slane %v1867_v56, 2  ;;  %v1951_v32 = vsel %vm889_vm12, %v1923_v25, 0.0  ;;  %v1881_v1 = vrot.slane %v1867_v56, 4  ;;  %v1883_v7 = vrot.slane %v1867_v56, 6 }
 0x558   :  { %v1925_v28 = vmul.f32 %v6388_v15, %v1893_v22  ;;  %v1894_v33 = vperm.slane %v1878_v26, 0  ;;  %v1954_v34 = vsel %vm889_vm12, %v1924_v24, 0.0  ;;  %v1896_v58 = vperm.slane %v1880_v37, 0 }
 0x559   :  { %v1895_v59 = vperm.slane %v1879_v29, 0  ;;  %v1882_v42 = vrot.slane %v1867_v56, 5  ;;  %v1897_v31 = vperm.slane %v1881_v1, 0  ;;  %v1899_v38 = vperm.slane %v1883_v7, 0 }
 0x55a   :  { %v1957_v35 = vsel %vm889_vm12, %v1925_v28, 0.0  ;;  %v1926_v63 = vmul.f32 %v6394_v30, %v1894_v33  ;;  %v1928_v3 = vmul.f32 %v6404_v43, %v1896_v58 }
 0x55b   :  { %1943 = vadd.xlane.f32.xlu0 %v1942_v12  ;;  %v1927_v4 = vmul.f32 %v6391_v16, %v1895_v59  ;;  %v1898_v12 = vperm.slane %v1882_v42, 0  ;;  %v1929_v13 = vmul.f32 %v6418_v53, %v1897_v31  ;;  %v2036_v31 = vpop.f32.mrf.mxu2 }
 0x55c   :  { %v1960_v9 = vsel %vm889_vm12, %v1926_v63, 0.0  ;;  %v1966_v10 = vsel %vm889_vm12, %v1928_v3, 0.0 }
 0x55d   :  { %1949 = vadd.xlane.f32.xlu2 %v1948_v44  ;;  %1946 = vadd.xlane.f32.xlu1 %v1945_v17  ;;  %v1963_v11 = vsel %vm889_vm12, %v1927_v4, 0.0  ;;  %v1884_v44 = vrot.slane %v1867_v56, 7  ;;  %v1931_v17 = vmul.f32 %v6433_v8, %v1899_v38  ;;  %v1930_v20 = vmul.f32 %v6428_v2, %v1898_v12  ;;  %v2062_v38 = vpop.f32.mrf.mxu3 }
 0x55e   :  { %v1969_v22 = vsel %vm889_vm12, %v1929_v13, 0.0 }
 0x55f   :  { %v1900_v25 = vperm.slane %v1884_v44, 0  ;;  %v1975_v26 = vsel %vm889_vm12, %v1931_v17, 0.0  ;;  %v1972_v24 = vsel %vm889_vm12, %v1930_v20, 0.0 }
 0x561   :  { %v1932_v28 = vmul.f32 %v6413_v52, %v1900_v25 }
 0x563   :  { %1952 = vadd.xlane.f32.xlu0 %v1951_v32  ;;  %v1978_v37 = vsel %vm889_vm12, %v1932_v28, 0.0 }
 0x565   :  { %1955 = vadd.xlane.f32.xlu1 %v1954_v34  ;;  %1958 = vadd.xlane.f32.xlu2 %v1957_v35 }
 0x56b   :  { %1961 = vadd.xlane.f32.xlu0 %v1960_v9 }
 0x56d   :  { %1967 = vadd.xlane.f32.xlu2 %v1966_v10  ;;  %1964 = vadd.xlane.f32.xlu1 %v1963_v11 }
 0x573   :  { %1970 = vadd.xlane.f32.xlu0 %v1969_v22 }
 0x575   :  { %1976 = vadd.xlane.f32.xlu2 %v1975_v26  ;;  %1973 = vadd.xlane.f32.xlu1 %v1972_v24 }
 0x57b   :  { %1979 = vadd.xlane.f32.xlu0 %v1978_v37  ;;  %v2086_v37 = vpop.f32.mrf.mxu2 }
 0x5c6   :  { %v1935_v56 = vpop.xlane.xlu0 %1934 }
 0x5c7   :  { %v1993_v34 = vperm.slane %v1935_v56, %v6382_v0 }
 0x5c8   :  { %v1941_v29 = vpop.xlane.xlu2 %1940  ;;  %v1938_v32 = vpop.xlane.xlu1 %1937 }
 0x5c9   :  { %v1994_v33 = vperm.slane %v1938_v32, %v6382_v0  ;;  %v1995_v35 = vperm.slane %v1941_v29, %v6382_v0 }
 0x5cb   :  { %v2001_v58 = vsel %vm957_vm3, %v1994_v33, %v1993_v34  ;;  %v2110_v34 = vpop.f32.mrf.mxu3 }
 0x5cc   :  { %v2002_v4 = vsel %vm959_vm4, %v1995_v35, %v2001_v58 }
 0x5ce   :  { %v1944_v59 = vpop.xlane.xlu0 %1943 }
 0x5cf   :  { %v1996_v63 = vperm.slane %v1944_v59, %v6382_v0 }
 0x5d0   :  { %v1950_v1 = vpop.xlane.xlu2 %1949  ;;  %v1947_v3 = vpop.xlane.xlu1 %1946 }
 0x5d1   :  { %v1997_v7 = vperm.slane %v1947_v3, %v6382_v0  ;;  %v2003_v42 = vsel %vm961_vm5, %v1996_v63, %v2002_v4  ;;  %v1998_v9 = vperm.slane %v1950_v1, %v6382_v0  ;;  %v2134_v63 = vpop.f32.mrf.mxu0  ;;  %v2156_v4 = vpop.f32.mrf.mxu1 }
 0x5d3   :  { %v2004_v10 = vsel %vm963_vm6, %v1997_v7, %v2003_v42 }
 0x5d4   :  { %v2005_v13 = vsel %vm965_vm7, %v1998_v9, %v2004_v10 }
 0x5d6   :  { %v1953_v11 = vpop.xlane.xlu0 %1952 }
 0x5d7   :  { %v1999_v12 = vperm.slane %v1953_v11, %v6382_v0 }
 0x5d8   :  { %v1959_v44 = vpop.xlane.xlu2 %1958  ;;  %v1956_v17 = vpop.xlane.xlu1 %1955 }
 0x5d9   :  { %v2006_v20 = vsel %vm967_vm9, %v1999_v12, %v2005_v13  ;;  %v2000_v22 = vperm.slane %v1956_v17, %v6382_v0  ;;  %v2171_v35 = vperm.slane %v1959_v44, %v6382_v0 }
 0x5db   :  { %v2007_v25 = vsel %vm969_vm10, %v2000_v22, %v2006_v20 }
 0x5dc   :  { %v2037_v26 = vadd.f32 %v2036_v31, %v2007_v25 }
 0x5de   :  { %v2063_v24 = vadd.f32 %v2062_v38, %v2037_v26  ;;  %v1962_v28 = vpop.xlane.xlu0 %1961 }
 0x5df   :  { %v2172_v56 = vperm.slane %v1962_v28, %v6382_v0  ;;  %v2214_v28 = vpop.f32.mrf.mxu2 }
 0x5e0   :  { %v2087_v29 = vadd.f32 %v2086_v37, %v2063_v24  ;;  %v1968_v32 = vpop.xlane.xlu2 %1967  ;;  %v1965_v33 = vpop.xlane.xlu1 %1964 }
 0x5e1   :  { %v2173_v58 = vperm.slane %v1965_v33, %v6382_v0  ;;  %v2179_v1 = vsel %vm957_vm3, %v2172_v56, %v2171_v35  ;;  %v2174_v7 = vperm.slane %v1968_v32, %v6382_v0  ;;  %v2264_v35 = vpop.f32.mrf.mxu0 }
 0x5e2   :  { %v2111_v59 = vadd.f32 %v2110_v34, %v2087_v29  ;;  %v2240_v29 = vpop.f32.mrf.mxu3 }
 0x5e3   :  { %v2180_v42 = vsel %vm959_vm4, %v2173_v58, %v2179_v1 }
 0x5e4   :  { %v2135_v3 = vadd.f32 %v2134_v63, %v2111_v59  ;;  %v2181_v12 = vsel %vm961_vm5, %v2174_v7, %v2180_v42  ;;  %v2288_v59 = vpop.f32.mrf.mxu1 }
 0x5e6   :  { %v1971_v9 = vpop.xlane.xlu0 %1970  ;;  %v2157_v31 = vadd.f32 %v2156_v4, %v2135_v3 }
 0x5e7   :  { %v2175_v10 = vperm.slane %v1971_v9, %v6382_v0  ;;  %v2312_v1 = vpop.f32.mrf.mxu2 }
 0x5e8   :  { %v1974_v11 = vpop.xlane.xlu1 %1973  ;;  %v2337_v38 = vmul.f32 0.35355338, %v2157_v31  ;;  %v1977_v13 = vpop.xlane.xlu2 %1976 }
 0x5e9   :  { %v2176_v44 = vperm.slane %v1974_v11, %v6382_v0  ;;  %v2182_v17 = vsel %vm963_vm6, %v2175_v10, %v2181_v12  ;;  %v2177_v22 = vperm.slane %v1977_v13, %v6382_v0 }
 0x5ea   :  { %v2339_v20 = vadd.f32 %v2337_v38, %v6486_v62  ;;  %v2334_v4 = vpop.f32.mrf.mxu3 }
 0x5eb   :  { %v2183_v26 = vsel %vm965_vm7, %v2176_v44, %v2182_v17 }
 0x5ec   :  { %v2341_v25 = vsel %vm622_vm8, %v2339_v20, -inf  ;;  %v2184_v56 = vsel %vm967_vm9, %v2177_v22, %v2183_v26 }
 0x5ed   :  { %2342 = vmax.xlane.f32.xlu1 %v2341_v25 }
 0x5ee   :  { %v1980_v24 = vpop.xlane.xlu0 %1979 }
 0x5ef   :  { %v2178_v37 = vperm.slane %v1980_v24, %v6382_v0 }
 0x5f1   :  { %v2185_v32 = vsel %vm969_vm10, %v2178_v37, %v2184_v56 }
 0x5f2   :  { %v2215_v33 = vadd.f32 %v2214_v28, %v2185_v32 }
 0x5f4   :  { %v2241_v34 = vadd.f32 %v2240_v29, %v2215_v33 }
 0x5f6   :  { %v2265_v58 = vadd.f32 %v2264_v35, %v2241_v34 }
 0x5f8   :  { %v2289_v63 = vadd.f32 %v2288_v59, %v2265_v58 }
 0x5fa   :  { %v2313_v3 = vadd.f32 %v2312_v1, %v2289_v63 }
 0x5fc   :  { %v2335_v7 = vadd.f32 %v2334_v4, %v2313_v3 }
 0x5fe   :  { %v2338_v42 = vmul.f32 0.35355338, %v2335_v7 }
 0x600   :  { %v2340_v9 = vadd.f32 %v2338_v42, %v6504_v45 }
 0x602   :  { %v2344_v31 = vsel %vm622_vm8, %v2340_v9, -inf }
 0x603   :  { %2345 = vmax.xlane.f32.xlu2 %v2344_v31 }
 0x61b   :  { %2389 = vrot.lane.b32.xlu2 %v6341_v21, %s6174_s28 }
 0x623   :  { %3059 = vrot.lane.b32.xlu2 %v6353_v40, %s6175_s29 }
 0x62b   :  { %3377 = vrot.lane.b32.xlu2 %v6371_v19, %s6175_s29 }
 0x660   :  { %v2343_v10 = vpop.xlane.xlu1 %2342 }
 0x661   :  { %v2347_v11 = vsub.f32 %v2339_v20, %v2343_v10 }
 0x663   :  { %v2349_v38 = vmul.f32 1.442695, %v2347_v11 }
 0x665   :  { %6133 = vpow2.f32 %v2349_v38 }
 0x66b   :  { %v6134_v12 = vpop.eup %6133 }
 0x66c   :  { %v2353_v13 = vsel %vm622_vm8, %v6134_v12, 0.0 }
 0x66d   :  { %2354 = vadd.xlane.f32.xlu0 %v2353_v13 }
 0x676   :  { %v2346_v44 = vpop.xlane.xlu2 %2345 }
 0x677   :  { %v2348_v17 = vsub.f32 %v2340_v9, %v2346_v44 }
 0x679   :  { %v2351_v22 = vmul.f32 1.442695, %v2348_v17 }
 0x67b   :  { %6135 = vpow2.f32 %v2351_v22 }
 0x67e   :  { %v2390_v25 = vpop.permute.xlu2 %2389 }
 0x67f   :  { %v2410_v26 = vand.u32 4294901760, %v2390_v25 }
 0x681   :  { %v6676_v24 = vpop.eup %6135  ;;  %v2437_v28 = vsub.f32 %v2390_v25, %v2410_v26  ;;  %2411 = vmatpush.msra.mxu0 %v2410_v26  ;;  %2487 = vmatpush.msrb.mxu3 %v2410_v26 }
 0x682   :  { %2541 = vrot.lane.b32.xlu0 %v6345_v23, %s6174_s28  ;;  %v2356_v20 = vsel %vm622_vm8, %v6676_v24, 0.0 }
 0x683   :  { %v2438_v37 = vand.u32 4294901760, %v2437_v28  ;;  %2357 = vadd.xlane.f32.xlu1 %v2356_v20  ;;  %2464 = vmatpush.msrb.mxu2 %v2437_v28 }
 0x685   :  { %v2439_v56 = vsub.f32 %v2437_v28, %v2438_v37  ;;  %2513 = vmatpush.msrb.mxu0 %v2438_v37 }
 0x687   :  { %v2440_v29 = vand.u32 4294901760, %v2439_v56 }
 0x689   :  { %2441 = vmatpush.msra.mxu1 %v2440_v29 }
 0x68a   :  { %3063 = vrot.lane.b32.xlu0 %v6357_v48, %s6175_s29 }
 0x68b   :  { %2535 = vmatpush.msrb.mxu1 %v2410_v26 }
 0x692   :  { %3379 = vrot.lane.b32.xlu0 %v6341_v21, %s6176_s30 }
 0x69a   :  { %3555 = vrot.lane.b32.xlu0 %v6376_v27, %s6175_s29 }
 0x69c   :  { %3065 = vrot.lane.b32.xlu1 %v6366_v60, %s6175_s29 }
 0x6a4   :  { %3061 = vrot.lane.b32.xlu1 %v6360_v51, %s6175_s29 }
 0x6ac   :  { %3557 = vrot.lane.b32.xlu1 %v6345_v23, %s6176_s30 }
 0x6e0   :  { %v2355_v32 = vpop.xlane.xlu0 %2354 }
 0x6e1   :  { %6137 = vrcp.f32 %v2355_v32  ;;  %v2370_v58 = vand.u32 2147483648, %v2355_v32  ;;  %v2368_v63 = vand.u32 2147483647, %v2355_v32  ;;  %vm2364_vm2 = vweird.f32 %v2355_v32 }
 0x6e3   :  { %v2371_v3 = vor.u32 1.1754944e-38, %v2370_v58  ;;  %vm2369_vm13 = vcmp.eq.f32.partialorder %v2368_v63, 8.507059e+37 }
 0x6e7   :  { %v6138_v33 = vpop.eup %6137 }
 0x6e8   :  { %v2360_v34 = vmul.f32 %v6138_v33, %v2355_v32  ;;  %vm2365_vm1 = vweird.f32 %v6138_v33 }
 0x6e9   :  { %vm2366_vm11 = vmor %vm2364_vm2, %vm2365_vm1 }
 0x6ea   :  { %v2361_v35 = vsub.f32 1.0, %v2360_v34 }
 0x6ec   :  { %v2362_v59 = vmul.f32 %v6138_v33, %v2361_v35 }
 0x6ee   :  { %v2363_v1 = vadd.f32 %v6138_v33, %v2362_v59 }
 0x6f0   :  { %v2367_v4 = vsel %vm2366_vm11, %v6138_v33, %v2363_v1 }
 0x6f1   :  { %v2372_v7 = vsel %vm2369_vm13, %v2371_v3, %v2367_v4 }
 0x6f2   :  { %v2373_v42 = vmul.f32 %v6134_v12, %v2372_v7 }
 0x6f4   :  { %v2542_v9 = vpop.permute.xlu0 %2541  ;;  %v2393_v31 = vsel %vm622_vm8, %v2373_v42, 0 }
 0x6f5   :  { %v2562_v10 = vand.u32 4294901760, %v2542_v9  ;;  %v2412_v11 = vand.u32 4294901760, %v2393_v31 }
 0x6f6   :  { %v2358_v38 = vpop.xlane.xlu1 %2357 }
 0x6f7   :  { %v2589_v13 = vsub.f32 %v2542_v9, %v2562_v10  ;;  %2563 = vmatpush.msra.mxu2 %v2562_v10  ;;  %6139 = vrcp.f32 %v2358_v38  ;;  %2443 = vmatmul.f32.vlgmr.msra.gmra.mxu1 %v2412_v11  ;;  %v2413_v44 = vsub.f32 %v2393_v31, %v2412_v11  ;;  %v2385_v29 = vand.u32 2147483648, %v2358_v38  ;;  %v619_v31 = vld [vmem:[%s7186_s3 + $0x18] sm:$0xff] }
 0x6f8   :  { %2639 = vmatpush.msra.mxu1 %v2562_v10  ;;  %v2383_v33 = vand.u32 2147483647, %v2358_v38  ;;  %vm2379_vm15 = vweird.f32 %v2358_v38 }
 0x6f9   :  { %v2590_v17 = vand.u32 4294901760, %v2589_v13  ;;  %2467 = vmatmul.f32.vlgmr.msrb.gmra.mxu2 %v2413_v44  ;;  %v2414_v22 = vand.u32 4294901760, %v2413_v44  ;;  %v2386_v35 = vor.u32 1.1754944e-38, %v2385_v29 }
 0x6fa   :  { %vm2384_vm2 = vcmp.eq.f32.partialorder %v2383_v33, 8.507059e+37  ;;  %v1415_v33 = vadd.f32 %v6582_v39, %v6580_v36 }
 0x6fb   :  { %v2591_v25 = vsub.f32 %v2589_v13, %v2590_v17  ;;  %2665 = vmatpush.msrb.mxu2 %v2590_v17  ;;  %2491 = vmatmul.f32.vlgmr.msrb.gmra.mxu3 %v2414_v22  ;;  %v2415_v26 = vsub.f32 %v2413_v44, %v2414_v22 }
 0x6fd   :  { %v6140_v12 = vpop.eup %6139  ;;  %v2592_v28 = vand.u32 4294901760, %v2591_v25  ;;  %v2416_v37 = vand.u32 4294901760, %v2415_v26 }
 0x6fe   :  { %v2375_v20 = vmul.f32 %v6140_v12, %v2358_v38  ;;  %vm2380_vm14 = vweird.f32 %v6140_v12 }
 0x6ff   :  { %2593 = vmatpush.msra.mxu3 %v2592_v28  ;;  %2537 = vmatmul.f32.vlgmr.msrb.gmra.mxu1 %v2412_v11  ;;  %vm2381_vm1 = vmor %vm2379_vm15, %vm2380_vm14 }
 0x700   :  { %v2376_v56 = vsub.f32 1.0, %v2375_v20  ;;  %2417 = vmatmul.f32.vlgmr.msra.gmra.mxu0 %v2416_v37 }
 0x701   :  { %2687 = vmatpush.msrb.mxu3 %v2562_v10  ;;  %2616 = vmatpush.msra.mxu0 %v2589_v13  ;;  %v2714_v10 = vand.u32 4294901760, %v619_v31 }
 0x702   :  { %v2377_v32 = vmul.f32 %v6140_v12, %v2376_v56 }
 0x704   :  { %v2378_v34 = vadd.f32 %v6140_v12, %v2377_v32 }
 0x706   :  { %v2382_v58 = vsel %vm2381_vm1, %v6140_v12, %v2378_v34 }
 0x707   :  { %v2387_v59 = vsel %vm2384_vm2, %v2386_v35, %v2382_v58  ;;  %v618_v35 = vld [vmem:[%s7186_s3 + $0x8] sm:$0xff] }
 0x708   :  { %2515 = vmatmul.f32.vlgmr.msrb.gmra.mxu0 %v2412_v11  ;;  %v2388_v63 = vmul.f32 %v6676_v24, %v2387_v59  ;;  %v2749_v11 = vsub.f32 %v619_v31, %v2714_v10  ;;  %v2897_v59 = vand.u32 4294901760, %v618_v35 }
 0x709   :  { %2715 = vmatpush.msrb.mxu0 %v2714_v10 }
 0x70a   :  { %v2545_v1 = vsel %vm622_vm8, %v2388_v63, 0  ;;  %v2750_v24 = vand.u32 4294901760, %v2749_v11  ;;  %v1439_v63 = vadd.f32 %v6592_v41, %v1415_v33 }
 0x70b   :  { %v2564_v3 = vand.u32 4294901760, %v2545_v1 }
 0x70c   :  { %v2751_v38 = vsub.f32 %v2749_v11, %v2750_v24 }
 0x70d   :  { %2595 = vmatmul.f32.vlgmr.msra.gmra.mxu3 %v2564_v3  ;;  %v2565_v4 = vsub.f32 %v2545_v1, %v2564_v3 }
 0x70e   :  { %2808 = vmatpush.msra.mxu3 %v2714_v10  ;;  %v2752_v13 = vand.u32 4294901760, %v2751_v38 }
 0x70f   :  { %v2566_v7 = vand.u32 4294901760, %v2565_v4 }
 0x710   :  { %2619 = vmatmul.f32.vlgmr.msra.gmra.mxu0 %v2565_v4  ;;  %2753 = vmatpush.msrb.mxu1 %v2752_v13  ;;  %v3066_v13 = vpop.permute.xlu1 %3065 }
 0x711   :  { %2643 = vmatmul.f32.vlgmr.msra.gmra.mxu1 %v2566_v7  ;;  %v2567_v42 = vsub.f32 %v2565_v4, %v2566_v7  ;;  %2840 = vmatpush.msra.mxu0 %v2750_v24  ;;  %v1463_v4 = vadd.f32 %v6588_v50, %v1439_v63  ;;  %v1567_v7 = vadd.f32 %v6596_v55, %v6598_v57 }
 0x712   :  { %2866 = vmatpush.msra.mxu1 %v2714_v10 }
 0x713   :  { %v2568_v9 = vand.u32 4294901760, %v2567_v42  ;;  %v1487_v31 = vadd.f32 %v6584_v47, %v1463_v4  ;;  %v1591_v10 = vadd.f32 %v6590_v14, %v1567_v7 }
 0x715   :  { %2569 = vmatmul.f32.vlgmr.msra.gmra.mxu2 %v2568_v9  ;;  %2689 = vmatmul.f32.vlgmr.msrb.gmra.mxu3 %v2564_v3  ;;  %v1509_v38 = vadd.f32 %v6586_v49, %v1487_v31  ;;  %v1615_v55 = vadd.f32 %v6594_v54, %v1591_v10 }
 0x716   :  { %2780 = vmatpush.msra.mxu2 %v2749_v11 }
 0x717   :  { %v2877_v47 = vsel %vm622_vm8, %v1509_v38, 0 }
 0x71d   :  { %2667 = vmatmul.f32.vlgmr.msrb.gmra.mxu2 %v2564_v3  ;;  %v2932_v3 = vsub.f32 %v618_v35, %v2897_v59 }
 0x71e   :  { %2898 = vmatpush.msrb.mxu2 %v2897_v59 }
 0x71f   :  { %v2933_v39 = vand.u32 4294901760, %v2932_v3 }
 0x721   :  { %v2934_v9 = vsub.f32 %v2932_v3, %v2933_v39 }
 0x723   :  { %v2935_v41 = vand.u32 4294901760, %v2934_v9 }
 0x725   :  { %2936 = vmatpush.msrb.mxu3 %v2935_v41 }
 0x774   :  { %v2444_v44 = vpop.f32.mrf.mxu1 }
 0x77c   :  { %v2468_v25 = vpop.f32.mrf.mxu2  ;;  %v2538_v56 = vpop.f32.mrf.mxu1 }
 0x77d   :  { %v2418_v17 = vpop.f32.mrf.mxu0 }
 0x77e   :  { %v2445_v22 = vadd.f32 %v2444_v44, %v2418_v17  ;;  %v2492_v12 = vpop.f32.mrf.mxu3  ;;  %v3073_v17 = vsel %vm622_vm8, %v3066_v13, 0 }
 0x780   :  { %v2469_v26 = vadd.f32 %v2468_v25, %v2445_v22  ;;  %v1639_v22 = vadd.f32 %v6602_v61, %v1615_v55  ;;  %v3064_v25 = vpop.permute.xlu0 %3063 }
 0x781   :  { %v3071_v49 = vsel %vm622_vm8, %v3064_v25, 0 }
 0x782   :  { %v2493_v28 = vadd.f32 %v2492_v12, %v2469_v26  ;;  %v3089_v26 = vand.u32 4294901760, %v3073_v17 }
 0x785   :  { %v2516_v20 = vpop.f32.mrf.mxu0 }
 0x786   :  { %v2517_v37 = vadd.f32 %v2516_v20, %v2493_v28  ;;  %v6718_v28 = vand.u32 4294901760, %v2877_v47 }
 0x788   :  { %v2539_v29 = vadd.f32 %v2538_v56, %v2517_v37  ;;  %v1661_v37 = vadd.f32 %v6600_v46, %v1639_v22  ;;  %v2900_v35 = vsub.f32 %v2877_v47, %v6718_v28  ;;  %v3380_v41 = vpop.permute.xlu0 %3379 }
 0x789   :  { %v3407_v13 = vsel %vm622_vm8, %v3380_v41, 0 }
 0x78a   :  { %v2694_v32 = vsel %vm622_vm8, %v2539_v29, 0  ;;  %v3091_v29 = vand.u32 4294901760, %v3071_v49  ;;  %v2880_v61 = vsel %vm622_vm8, %v1661_v37, 0 }
 0x78b   :  { %v6700_v34 = vand.u32 4294901760, %v2694_v32 }
 0x78c   :  { %v6727_v63 = vsub.f32 %v3071_v49, %v3091_v29 }
 0x78d   :  { %v2717_v58 = vsub.f32 %v2694_v32, %v6700_v34  ;;  %2755 = vmatmul.f32.vlgmr.msrb.gmra.mxu1 %v6700_v34  ;;  %v2620_v44 = vpop.f32.mrf.mxu0  ;;  %v6722_v32 = vsub.f32 %v3073_v17, %v3089_v26 }
 0x78e   :  { %2991 = vmatpush.msrb.mxu1 %v2897_v59  ;;  %v2644_v14 = vpop.f32.mrf.mxu1  ;;  %v3132_v4 = vand.u32 4294901760, %v6727_v63 }
 0x78f   :  { %v2718_v1 = vand.u32 4294901760, %v2717_v58  ;;  %2783 = vmatmul.f32.vlgmr.msra.gmra.mxu2 %v2717_v58 }
 0x790   :  { %3023 = vmatpush.msra.mxu2 %v2933_v39  ;;  %v2596_v11 = vpop.f32.mrf.mxu3 }
 0x791   :  { %2812 = vmatmul.f32.vlgmr.msra.gmra.mxu3 %v2718_v1  ;;  %v2719_v36 = vsub.f32 %v2717_v58, %v2718_v1  ;;  %v3126_v1 = vand.u32 4294901760, %v6722_v32 }
 0x792   :  { %3049 = vmatpush.msra.mxu3 %v2897_v59 }
 0x793   :  { %v2720_v42 = vand.u32 4294901760, %v2719_v36  ;;  %v2907_v36 = vand.u32 4294901760, %v2880_v61  ;;  %v3127_v7 = vsub.f32 %v6722_v32, %v3126_v1 }
 0x795   :  { %2721 = vmatmul.f32.vlgmr.msrb.gmra.mxu0 %v2720_v42  ;;  %v2908_v9 = vsub.f32 %v2880_v61, %v2907_v36 }
 0x796   :  { %2963 = vmatpush.msrb.mxu0 %v2932_v3  ;;  %v2901_v3 = vand.u32 4294901760, %v2900_v35 }
 0x798   :  { %v2570_v24 = vpop.f32.mrf.mxu2  ;;  %v2690_v54 = vpop.f32.mrf.mxu3  ;;  %v2902_v42 = vsub.f32 %v2900_v35, %v2901_v3 }
 0x799   :  { %v2597_v50 = vadd.f32 %v2596_v11, %v2570_v24  ;;  %v3128_v11 = vand.u32 4294901760, %v3127_v7  ;;  %v3133_v24 = vsub.f32 %v6727_v63, %v3132_v4 }
 0x79a   :  { %v2903_v38 = vand.u32 4294901760, %v2902_v42 }
 0x79b   :  { %v2621_v57 = vadd.f32 %v2620_v44, %v2597_v50  ;;  %v2909_v50 = vand.u32 4294901760, %v2908_v9  ;;  %v3424_v44 = vand.u32 4294901760, %v3407_v13  ;;  %v3134_v55 = vand.u32 4294901760, %v3133_v24 }
 0x79d   :  { %v2645_v12 = vadd.f32 %v2644_v14, %v2621_v57  ;;  %v2910_v57 = vsub.f32 %v2908_v9, %v2909_v50  ;;  %v3451_v17 = vsub.f32 %v3407_v13, %v3424_v44  ;;  %v3060_v14 = vpop.permute.xlu2 %3059 }
 0x79f   :  { %v2911_v47 = vand.u32 4294901760, %v2910_v57  ;;  %v3452_v22 = vand.u32 4294901760, %v3451_v17 }
 0x7a0   :  { %v2668_v20 = vpop.f32.mrf.mxu2 }
 0x7a1   :  { %v2669_v56 = vadd.f32 %v2668_v20, %v2645_v12  ;;  %v3453_v25 = vsub.f32 %v3451_v17, %v3452_v22  ;;  %v3067_v12 = vsel %vm622_vm8, %v3060_v14, 0  ;;  %v3062_v20 = vpop.permute.xlu1 %3061 }
 0x7a3   :  { %v2691_v33 = vadd.f32 %v2690_v54, %v2669_v56  ;;  %v3454_v49 = vand.u32 4294901760, %v3453_v25 }
 0x7a5   :  { %v2697_v58 = vsel %vm622_vm8, %v2691_v33, 0  ;;  %v3378_v56 = vpop.permute.xlu2 %3377 }
 0x7a6   :  { %v2724_v59 = vand.u32 4294901760, %v2697_v58  ;;  %v3405_v54 = vsel %vm622_vm8, %v3378_v56, 0 }
 0x7a8   :  { %2759 = vmatmul.f32.gmra.mxu1 %v2724_v59  ;;  %v2725_v46 = vsub.f32 %v2697_v58, %v2724_v59  ;;  %v3426_v58 = vand.u32 4294901760, %v3405_v54 }
 0x7aa   :  { %2788 = vmatmul.f32.gmra.mxu2 %v2725_v46  ;;  %v2726_v39 = vand.u32 4294901760, %v2725_v46 }
 0x7ac   :  { %2818 = vmatmul.f32.gmra.mxu3 %v2726_v39  ;;  %v2727_v31 = vsub.f32 %v2725_v46, %v2726_v39  ;;  %v3556_v39 = vpop.permute.xlu0 %3555 }
 0x7ae   :  { %v2728_v10 = vand.u32 4294901760, %v2727_v31 }
 0x7b0   :  { %2729 = vmatmul.f32.gmra.mxu0 %v2728_v10  ;;  %2868 = vmatmul.f32.vlgmr.msra.gmra.mxu1 %v6700_v34 }
 0x7b1   :  { %3129 = vmatpush.xpose.msra.mxu1 %v3128_v11 }
 0x7b2   :  { %2904 = vmatmul.f32.vlgmr.msrb.gmra.mxu2 %v2903_v38 }
 0x7b3   :  { %3161 = vmatpush.xpose.msrb.mxu2 %v6722_v32  ;;  %v3558_v32 = vpop.permute.xlu1 %3557 }
 0x7b4   :  { %2938 = vmatmul.f32.vlgmr.msrb.gmra.mxu3 %v6718_v28 }
 0x7b5   :  { %3135 = vmatpush.xpose.msra.mxu1 %v3134_v55  ;;  %3191 = vmatpush.xpose.msrb.mxu3 %v3089_v26 }
 0x7b7   :  { %3164 = vmatpush.xpose.msrb.mxu2 %v6727_v63  ;;  %v3427_v63 = vsub.f32 %v3405_v54, %v3426_v58 }
 0x7b8   :  { %2842 = vmatmul.f32.vlgmr.msra.gmra.mxu0 %v6700_v34  ;;  %2872 = vmatmul.f32.gmra.mxu1 %v2724_v59  ;;  %v3093_v34 = vand.u32 4294901760, %v3067_v12 }
 0x7b9   :  { %3090 = vmatpush.xpose.msra.mxu0 %v3089_v26  ;;  %3193 = vmatpush.xpose.msrb.mxu3 %v3091_v29  ;;  %v3428_v46 = vand.u32 4294901760, %v3427_v63 }
 0x7ba   :  { %2912 = vmatmul.f32.gmra.mxu2 %v2911_v47  ;;  %v3094_v37 = vsub.f32 %v3067_v12, %v3093_v34 }
 0x7bb   :  { %v3429_v42 = vsub.f32 %v3427_v63, %v3428_v46 }
 0x7bc   :  { %2942 = vmatmul.f32.gmra.mxu3 %v2907_v36  ;;  %v3095_v33 = vand.u32 4294901760, %v3094_v37 }
 0x7bd   :  { %3092 = vmatpush.xpose.msra.mxu0 %v3091_v29  ;;  %v3430_v10 = vand.u32 4294901760, %v3429_v42 }
 0x7c0   :  { %2846 = vmatmul.f32.gmra.mxu0 %v2724_v59  ;;  %2995 = vmatmul.f32.vlgmr.msrb.gmra.mxu1 %v2901_v3 }
 0x7c1   :  { %3253 = vmatpush.xpose.msrb.mxu1 %v3089_v26  ;;  %v3069_v26 = vsel %vm622_vm8, %v3062_v20, 0 }
 0x7c2   :  { %3025 = vmatmul.f32.vlgmr.msra.gmra.mxu2 %v6718_v28  ;;  %v3101_v61 = vand.u32 4294901760, %v3069_v26 }
 0x7c3   :  { %3425 = vmatpush.xpose.msra.mxu2 %v3424_v44 }
 0x7c4   :  { %3051 = vmatmul.f32.vlgmr.msra.gmra.mxu3 %v6718_v28  ;;  %v3585_v28 = vsel %vm622_vm8, %v3558_v32, 0 }
 0x7c5   :  { %3255 = vmatpush.xpose.msrb.mxu1 %v3091_v29  ;;  %3455 = vmatpush.xpose.msra.mxu3 %v3454_v49  ;;  %v3096_v29 = vsub.f32 %v3094_v37, %v3095_v33  ;;  %v3602_v59 = vand.u32 4294901760, %v3585_v28 }
 0x7c8   :  { %2966 = vmatmul.f32.vlgmr.msrb.gmra.mxu0 %v2900_v35  ;;  %3001 = vmatmul.f32.gmra.mxu1 %v2909_v50  ;;  %v3102_v35 = vsub.f32 %v3069_v26, %v3101_v61 }
 0x7c9   :  { %3224 = vmatpush.xpose.msrb.mxu0 %v3126_v1  ;;  %v3097_v1 = vand.u32 4294901760, %v3096_v29 }
 0x7ca   :  { %3029 = vmatmul.f32.gmra.mxu2 %v2907_v36  ;;  %v3103_v3 = vand.u32 4294901760, %v3102_v35 }
 0x7cc   :  { %3055 = vmatmul.f32.gmra.mxu3 %v2907_v36  ;;  %v3629_v36 = vsub.f32 %v3585_v28, %v3602_v59 }
 0x7cd   :  { %3228 = vmatpush.xpose.msrb.mxu0 %v3132_v4  ;;  %v3104_v4 = vsub.f32 %v3102_v35, %v3103_v3 }
 0x7ce   :  { %v3630_v7 = vand.u32 4294901760, %v3629_v36 }
 0x7cf   :  { %v3105_v31 = vand.u32 4294901760, %v3104_v4 }
 0x7d0   :  { %2971 = vmatmul.f32.gmra.mxu0 %v2908_v9  ;;  %3137 = vmatmul.f32.vlgmr.msra.gmra.mxu1 %v3093_v34  ;;  %v3583_v9 = vsel %vm622_vm8, %v3556_v39, 0  ;;  %v3631_v41 = vsub.f32 %v3629_v36, %v3630_v7 }
 0x7d1   :  { %3549 = vmatpush.xpose.msra.mxu1 %v3424_v44  ;;  %v3604_v11 = vand.u32 4294901760, %v3583_v9 }
 0x7d2   :  { %3167 = vmatmul.f32.vlgmr.msrb.gmra.mxu2 %v3094_v37  ;;  %v3632_v24 = vand.u32 4294901760, %v3631_v41 }
 0x7d3   :  { %3478 = vmatpush.xpose.msrb.mxu2 %v3451_v17  ;;  %v3605_v38 = vsub.f32 %v3583_v9, %v3604_v11 }
 0x7d4   :  { %3197 = vmatmul.f32.vlgmr.msrb.gmra.mxu3 %v3095_v33 }
 0x7d5   :  { %3501 = vmatpush.xpose.msrb.mxu3 %v3424_v44  ;;  %v3606_v13 = vand.u32 4294901760, %v3605_v38 }
 0x7d7   :  { %v3607_v50 = vsub.f32 %v3605_v38, %v3606_v13 }
 0x7d8   :  { %3098 = vmatmul.f32.vlgmr.msra.gmra.mxu0 %v3097_v1  ;;  %3141 = vmatmul.f32.gmra.mxu1 %v3101_v61 }
 0x7d9   :  { %3527 = vmatpush.xpose.msra.mxu0 %v3452_v22  ;;  %v3608_v44 = vand.u32 4294901760, %v3607_v50 }
 0x7da   :  { %3172 = vmatmul.f32.gmra.mxu2 %v3102_v35 }
 0x7dc   :  { %3203 = vmatmul.f32.gmra.mxu3 %v3103_v3 }
 0x7e0   :  { %3106 = vmatmul.f32.gmra.mxu0 %v3105_v31  ;;  %3257 = vmatmul.f32.vlgmr.msrb.gmra.mxu1 %v3093_v34 }
 0x7e1   :  { %3679 = vmatpush.xpose.msrb.mxu1 %v3602_v59 }
 0x7e2   :  { %3431 = vmatmul.f32.vlgmr.msra.gmra.mxu2 %v3430_v10 }
 0x7e3   :  { %3603 = vmatpush.xpose.msra.mxu2 %v3602_v59 }
 0x7e4   :  { %3457 = vmatmul.f32.vlgmr.msra.gmra.mxu3 %v3426_v58 }
 0x7e5   :  { %3633 = vmatpush.xpose.msra.mxu3 %v3632_v24 }
 0x7e8   :  { %3230 = vmatmul.f32.vlgmr.msrb.gmra.mxu0 %v3093_v34  ;;  %3261 = vmatmul.f32.gmra.mxu1 %v3101_v61 }
 0x7e9   :  { %3656 = vmatpush.xpose.msrb.mxu0 %v3629_v36 }
 0x7ea   :  { %3481 = vmatmul.f32.vlgmr.msrb.gmra.mxu2 %v3427_v63 }
 0x7eb   :  { %3705 = vmatpush.xpose.msrb.mxu2 %v3630_v7 }
 0x7ec   :  { %3505 = vmatmul.f32.vlgmr.msrb.gmra.mxu3 %v3428_v46 }
 0x7ed   :  { %3727 = vmatpush.xpose.msrb.mxu3 %v3602_v59 }
 0x7f0   :  { %3234 = vmatmul.f32.gmra.mxu0 %v3101_v61  ;;  %3551 = vmatmul.f32.vlgmr.msra.gmra.mxu1 %v3426_v58 }
 0x7f2   :  { %3609 = vmatmul.f32.vlgmr.msra.gmra.mxu2 %v3608_v44 }
 0x7f4   :  { %3635 = vmatmul.f32.vlgmr.msra.gmra.mxu3 %v3604_v11 }
 0x7f8   :  { %3529 = vmatmul.f32.vlgmr.msra.gmra.mxu0 %v3426_v58  ;;  %3683 = vmatmul.f32.vlgmr.msrb.gmra.mxu1 %v3606_v13 }
 0x7fa   :  { %3707 = vmatmul.f32.vlgmr.msrb.gmra.mxu2 %v3604_v11 }
 0x7fc   :  { %3729 = vmatmul.f32.vlgmr.msrb.gmra.mxu3 %v3604_v11 }
 0x800   :  { %3659 = vmatmul.f32.vlgmr.msrb.gmra.mxu0 %v3605_v38 }
 0x80a   :  { %v6746_v55 = vpop.f32.mrf.mxu1 }
 0x812   :  { %v6748_v57 = vpop.f32.mrf.mxu0  ;;  %v6750_v17 = vpop.f32.mrf.mxu2 }
 0x814   :  { %v6754_v22 = vpop.f32.mrf.mxu3 }
 0x825   :  { %v6752_v47 = vpop.f32.mrf.mxu1 }
 0x82d   :  { %v6756_v25 = vpop.f32.mrf.mxu0  ;;  %v6758_v14 = vpop.f32.mrf.mxu2 }
 0x82e   :  { %v6760_v12 = vpop.f32.mrf.mxu1 }
 0x82f   :  { %v6762_v49 = vpop.f32.mrf.mxu3 }
 0x835   :  { %v6764_v20 = vpop.f32.mrf.mxu0  ;;  %v6766_v34 = vpop.f32.mrf.mxu2 }
 0x836   :  { %v6768_v37 = vpop.f32.mrf.mxu1 }
 0x837   :  { %v6770_v56 = vpop.f32.mrf.mxu3 }
 0x83d   :  { %v6772_v26 = vpop.f32.mrf.mxu0  ;;  %v6774_v54 = vpop.f32.mrf.mxu2 }
 0x83e   :  { %v6776_v32 = vpop.f32.mrf.mxu1 }
 0x83f   :  { %v6778_v33 = vpop.f32.mrf.mxu3 }
 0x845   :  { %v6780_v61 = vpop.f32.mrf.mxu0  ;;  %v6784_v28 = vpop.f32.mrf.mxu2 }
 0x846   :  { %v6782_v58 = vpop.f32.mrf.mxu1 }
 0x847   :  { %v6786_v29 = vpop.f32.mrf.mxu3 }
 0x84d   :  { %v6788_v35 = vpop.f32.mrf.mxu0  ;;  %v6790_v63 = vpop.f32.mrf.mxu2 }
 0x84e   :  { %v3138_v59 = vpop.f32.mrf.mxu1  ;;  %7199 = vst [vmem:[#allocation5_spill] sm:$0xff] %v6790_v63 }
 0x84f   :  { %v6792_v3 = vpop.f32.mrf.mxu3 }
 0x850   :  { %7200 = vst [vmem:[#allocation6_spill] sm:$0xff] %v6792_v3 }
 0x855   :  { %v3099_v1 = vpop.f32.mrf.mxu0  ;;  %v3168_v39 = vpop.f32.mrf.mxu2 }
 0x856   :  { %v3142_v36 = vpop.f32.mrf.mxu1  ;;  %v3139_v46 = vadd.f32 %v3138_v59, %v3099_v1 }
 0x857   :  { %v3198_v42 = vpop.f32.mrf.mxu3 }
 0x858   :  { %v3169_v7 = vadd.f32 %v3168_v39, %v3139_v46 }
 0x85a   :  { %v3199_v31 = vadd.f32 %v3198_v42, %v3169_v7 }
 0x85d   :  { %v3107_v4 = vpop.f32.mrf.mxu0  ;;  %v3173_v11 = vpop.f32.mrf.mxu2 }
 0x85e   :  { %v3143_v9 = vadd.f32 %v3142_v36, %v3107_v4  ;;  %v3258_v41 = vpop.f32.mrf.mxu1 }
 0x85f   :  { %v3204_v50 = vpop.f32.mrf.mxu3 }
 0x860   :  { %v3174_v38 = vadd.f32 %v3173_v11, %v3143_v9 }
 0x862   :  { %v3205_v3 = vadd.f32 %v3204_v50, %v3174_v38 }
 0x865   :  { %v3231_v10 = vpop.f32.mrf.mxu0 }
 0x866   :  { %v3232_v24 = vadd.f32 %v3231_v10, %v3199_v31 }
 0x868   :  { %v3259_v13 = vadd.f32 %v3258_v41, %v3232_v24  ;;  %v3262_v41 = vpop.f32.mrf.mxu1 }
 0x86a   :  { %v3281_v44 = vperm.slane %v3259_v13, 0  ;;  %v3268_v18 = vrot.slane %v3259_v13, 2  ;;  %v3267_v6 = vrot.slane %v3259_v13, 1  ;;  %v3269_v5 = vrot.slane %v3259_v13, 3 }
 0x86b   :  { %v3272_v63 = vrot.slane %v3259_v13, 6  ;;  %v3270_v39 = vrot.slane %v3259_v13, 4 }
 0x86c   :  { %v3313_v59 = vmul.f32 %v6388_v15, %v3281_v44  ;;  %v3283_v1 = vperm.slane %v3268_v18, 0  ;;  %v3282_v46 = vperm.slane %v3267_v6, 0  ;;  %v3284_v4 = vperm.slane %v3269_v5, 0 }
 0x86d   :  { %v3235_v36 = vpop.f32.mrf.mxu0  ;;  %v3287_v10 = vperm.slane %v3272_v63, 0  ;;  %v3285_v18 = vperm.slane %v3270_v39, 0  ;;  %v3271_v6 = vrot.slane %v3259_v13, 5  ;;  %v3273_v44 = vrot.slane %v3259_v13, 7 }
 0x86e   :  { %v3236_v7 = vadd.f32 %v3235_v36, %v3205_v3  ;;  %v3329_v42 = vsel %vm889_vm12, %v3313_v59, 0.0  ;;  %v3315_v9 = vmul.f32 %v6391_v16, %v3283_v1  ;;  %v3314_v31 = vmul.f32 %v6394_v30, %v3282_v46 }
 0x86f   :  { %3330 = vadd.xlane.f32.xlu2 %v3329_v42  ;;  %v3316_v5 = vmul.f32 %v6404_v43, %v3284_v4  ;;  %v3319_v3 = vmul.f32 %v6433_v8, %v3287_v10  ;;  %v3317_v50 = vmul.f32 %v6418_v53, %v3285_v18  ;;  %v3286_v63 = vperm.slane %v3271_v6, 0 }
 0x870   :  { %v3263_v11 = vadd.f32 %v3262_v41, %v3236_v7  ;;  %v3335_v24 = vsel %vm889_vm12, %v3315_v9, 0.0  ;;  %v3332_v38 = vsel %vm889_vm12, %v3314_v31, 0.0  ;;  %v3288_v39 = vperm.slane %v3273_v44, 0 }
 0x871   :  { %3336 = vadd.xlane.f32.xlu0 %v3335_v24  ;;  %3333 = vadd.xlane.f32.xlu1 %v3332_v38  ;;  %v3338_v1 = vsel %vm889_vm12, %v3316_v5, 0.0  ;;  %v3347_v46 = vsel %vm889_vm12, %v3319_v3, 0.0  ;;  %v3341_v36 = vsel %vm889_vm12, %v3317_v50, 0.0  ;;  %v3318_v4 = vmul.f32 %v6428_v2, %v3286_v63 }
 0x872   :  { %v3274_v59 = vrot.slane %v3263_v11, 1  ;;  %v3320_v42 = vmul.f32 %v6413_v52, %v3288_v39  ;;  %v3275_v13 = vrot.slane %v3263_v11, 2  ;;  %v3277_v31 = vrot.slane %v3263_v11, 4 }
 0x873   :  { %v3344_v41 = vsel %vm889_vm12, %v3318_v4, 0.0  ;;  %v3289_v10 = vperm.slane %v3263_v11, 0  ;;  %v3276_v3 = vrot.slane %v3263_v11, 3 }
 0x874   :  { %v3290_v7 = vperm.slane %v3274_v59, 0  ;;  %v3350_v24 = vsel %vm889_vm12, %v3320_v42, 0.0  ;;  %v3291_v18 = vperm.slane %v3275_v13, 0  ;;  %v3293_v5 = vperm.slane %v3277_v31, 0 }
 0x875   :  { %v3321_v6 = vmul.f32 %v6388_v15, %v3289_v10  ;;  %v3278_v59 = vrot.slane %v3263_v11, 5 }
 0x876   :  { %v3322_v9 = vmul.f32 %v6394_v30, %v3290_v7  ;;  %v3323_v50 = vmul.f32 %v6391_v16, %v3291_v18  ;;  %v3325_v44 = vmul.f32 %v6418_v53, %v3293_v5 }
 0x877   :  { %3339 = vadd.xlane.f32.xlu2 %v3338_v1  ;;  %v3280_v1 = vrot.slane %v3263_v11, 7  ;;  %v3353_v63 = vsel %vm889_vm12, %v3321_v6, 0.0  ;;  %v3294_v7 = vperm.slane %v3278_v59, 0 }
 0x878   :  { %v3356_v38 = vsel %vm889_vm12, %v3322_v9, 0.0  ;;  %v3365_v39 = vsel %vm889_vm12, %v3325_v44, 0.0  ;;  %v3279_v9 = vrot.slane %v3263_v11, 6 }
 0x879   :  { %3348 = vadd.xlane.f32.xlu0 %v3347_v46  ;;  %3342 = vadd.xlane.f32.xlu1 %v3341_v36  ;;  %v3292_v46 = vperm.slane %v3276_v3, 0  ;;  %v3359_v36 = vsel %vm889_vm12, %v3323_v50, 0.0  ;;  %v3296_v4 = vperm.slane %v3280_v1, 0  ;;  %v3326_v13 = vmul.f32 %v6428_v2, %v3294_v7 }
 0x87a   :  { %v3295_v10 = vperm.slane %v3279_v9, 0 }
 0x87b   :  { %v3324_v42 = vmul.f32 %v6404_v43, %v3292_v46  ;;  %v3328_v31 = vmul.f32 %v6413_v52, %v3296_v4 }
 0x87c   :  { %v3327_v18 = vmul.f32 %v6433_v8, %v3295_v10 }
 0x87e   :  { %v3371_v5 = vsel %vm889_vm12, %v3327_v18, 0.0 }
 0x87f   :  { %3345 = vadd.xlane.f32.xlu2 %v3344_v41  ;;  %v3362_v41 = vsel %vm889_vm12, %v3324_v42, 0.0  ;;  %v3432_v42 = vpop.f32.mrf.mxu2 }
 0x881   :  { %3351 = vadd.xlane.f32.xlu1 %v3350_v24  ;;  %3357 = vadd.xlane.f32.xlu0 %v3356_v38  ;;  %v3368_v24 = vsel %vm889_vm12, %v3326_v13, 0.0  ;;  %v3374_v38 = vsel %vm889_vm12, %v3328_v31, 0.0  ;;  %v3458_v31 = vpop.f32.mrf.mxu3 }
 0x887   :  { %3354 = vadd.xlane.f32.xlu2 %v3353_v63 }
 0x889   :  { %3360 = vadd.xlane.f32.xlu1 %v3359_v36  ;;  %3366 = vadd.xlane.f32.xlu0 %v3365_v39 }
 0x88f   :  { %3363 = vadd.xlane.f32.xlu2 %v3362_v41 }
 0x891   :  { %3369 = vadd.xlane.f32.xlu1 %v3368_v24  ;;  %3375 = vadd.xlane.f32.xlu0 %v3374_v38 }
 0x897   :  { %3372 = vadd.xlane.f32.xlu2 %v3371_v5 }
 0x8e2   :  { %v3331_v11 = vpop.xlane.xlu2 %3330 }
 0x8e3   :  { %v3389_v59 = vperm.slane %v3331_v11, %v6382_v0 }
 0x8e4   :  { %v3337_v6 = vpop.xlane.xlu0 %3336  ;;  %v3334_v3 = vpop.xlane.xlu1 %3333 }
 0x8e5   :  { %v3390_v50 = vperm.slane %v3334_v3, %v6382_v0  ;;  %v3391_v1 = vperm.slane %v3337_v6, %v6382_v0 }
 0x8e7   :  { %v3397_v36 = vsel %vm957_vm3, %v3390_v50, %v3389_v59 }
 0x8e8   :  { %v3398_v7 = vsel %vm959_vm4, %v3391_v1, %v3397_v36  ;;  %v3482_v1 = vpop.f32.mrf.mxu2 }
 0x8ea   :  { %v3340_v44 = vpop.xlane.xlu2 %3339 }
 0x8eb   :  { %v3392_v39 = vperm.slane %v3340_v44, %v6382_v0 }
 0x8ec   :  { %v3349_v63 = vpop.xlane.xlu0 %3348  ;;  %v3343_v46 = vpop.xlane.xlu1 %3342 }
 0x8ed   :  { %v3393_v4 = vperm.slane %v3343_v46, %v6382_v0  ;;  %v3399_v9 = vsel %vm961_vm5, %v3392_v39, %v3398_v7  ;;  %v3395_v10 = vperm.slane %v3349_v63, %v6382_v0  ;;  %v3506_v39 = vpop.f32.mrf.mxu3 }
 0x8ef   :  { %v3400_v24 = vsel %vm963_vm6, %v3393_v4, %v3399_v9  ;;  %v3530_v4 = vpop.f32.mrf.mxu0 }
 0x8f2   :  { %v3346_v13 = vpop.xlane.xlu2 %3345 }
 0x8f3   :  { %v3394_v41 = vperm.slane %v3346_v13, %v6382_v0 }
 0x8f4   :  { %v3352_v38 = vpop.xlane.xlu1 %3351  ;;  %v3358_v5 = vpop.xlane.xlu0 %3357 }
 0x8f5   :  { %v3401_v18 = vsel %vm965_vm7, %v3394_v41, %v3400_v24  ;;  %v3396_v11 = vperm.slane %v3352_v38, %v6382_v0  ;;  %v3568_v13 = vperm.slane %v3358_v5, %v6382_v0  ;;  %v3552_v24 = vpop.f32.mrf.mxu1 }
 0x8f6   :  { %v3402_v6 = vsel %vm967_vm9, %v3395_v10, %v3401_v18 }
 0x8f7   :  { %v3403_v3 = vsel %vm969_vm10, %v3396_v11, %v3402_v6 }
 0x8f8   :  { %v3433_v50 = vadd.f32 %v3432_v42, %v3403_v3 }
 0x8fa   :  { %v3459_v44 = vadd.f32 %v3458_v31, %v3433_v50  ;;  %v3355_v59 = vpop.xlane.xlu2 %3354 }
 0x8fb   :  { %v3567_v63 = vperm.slane %v3355_v59, %v6382_v0 }
 0x8fc   :  { %v3483_v46 = vadd.f32 %v3482_v1, %v3459_v44  ;;  %v3361_v36 = vpop.xlane.xlu1 %3360  ;;  %v3367_v9 = vpop.xlane.xlu0 %3366 }
 0x8fd   :  { %v3569_v10 = vperm.slane %v3361_v36, %v6382_v0  ;;  %v3575_v38 = vsel %vm957_vm3, %v3568_v13, %v3567_v63  ;;  %v3571_v5 = vperm.slane %v3367_v9, %v6382_v0 }
 0x8fe   :  { %v3507_v7 = vadd.f32 %v3506_v39, %v3483_v46 }
 0x8ff   :  { %v3576_v6 = vsel %vm959_vm4, %v3569_v10, %v3575_v38 }
 0x900   :  { %v3531_v41 = vadd.f32 %v3530_v4, %v3507_v7  ;;  %v3610_v7 = vpop.f32.mrf.mxu2 }
 0x902   :  { %v3364_v42 = vpop.xlane.xlu2 %3363  ;;  %v3553_v31 = vadd.f32 %v3552_v24, %v3531_v41  ;;  %v3636_v24 = vpop.f32.mrf.mxu3 }
 0x903   :  { %v3570_v18 = vperm.slane %v3364_v42, %v6382_v0  ;;  %v3660_v42 = vpop.f32.mrf.mxu0 }
 0x904   :  { %v3733_v11 = vmul.f32 0.35355338, %v3553_v31  ;;  %v3370_v3 = vpop.xlane.xlu1 %3369  ;;  %v3376_v46 = vpop.xlane.xlu0 %3375 }
 0x905   :  { %v3577_v50 = vsel %vm961_vm5, %v3570_v18, %v3576_v6  ;;  %v3572_v59 = vperm.slane %v3370_v3, %v6382_v0  ;;  %v3574_v4 = vperm.slane %v3376_v46, %v6382_v0  ;;  %v3684_v18 = vpop.f32.mrf.mxu1 }
 0x906   :  { %v3735_v44 = vadd.f32 %v3733_v11, %v6486_v62  ;;  %v3578_v36 = vsel %vm963_vm6, %v3571_v5, %v3577_v50 }
 0x907   :  { %v3579_v13 = vsel %vm965_vm7, %v3572_v59, %v3578_v36 }
 0x908   :  { %v3737_v1 = vsel %vm622_vm8, %v3735_v44, -inf  ;;  %v3708_v6 = vpop.f32.mrf.mxu2 }
 0x909   :  { %3738 = vmax.xlane.f32.xlu1 %v3737_v1 }
 0x90a   :  { %v3373_v39 = vpop.xlane.xlu2 %3372  ;;  %v3730_v50 = vpop.f32.mrf.mxu3 }
 0x90b   :  { %v3573_v63 = vperm.slane %v3373_v39, %v6382_v0 }
 0x90d   :  { %v3580_v41 = vsel %vm967_vm9, %v3573_v63, %v3579_v13 }
 0x90e   :  { %v3581_v9 = vsel %vm969_vm10, %v3574_v4, %v3580_v41 }
 0x90f   :  { %v3611_v10 = vadd.f32 %v3610_v7, %v3581_v9 }
 0x911   :  { %v3637_v38 = vadd.f32 %v3636_v24, %v3611_v10 }
 0x913   :  { %v3661_v31 = vadd.f32 %v3660_v42, %v3637_v38 }
 0x915   :  { %v3685_v11 = vadd.f32 %v3684_v18, %v3661_v31 }
 0x917   :  { %v3709_v3 = vadd.f32 %v3708_v6, %v3685_v11 }
 0x919   :  { %v3731_v5 = vadd.f32 %v3730_v50, %v3709_v3 }
 0x91b   :  { %v3734_v1 = vmul.f32 0.35355338, %v3731_v5 }
 0x91d   :  { %v3736_v46 = vadd.f32 %v3734_v1, %v6504_v45 }
 0x91f   :  { %v3740_v59 = vsel %vm622_vm8, %v3736_v46, -inf }
 0x920   :  { %3741 = vmax.xlane.f32.xlu2 %v3740_v59 }
 0x938   :  { %3785 = vrot.lane.b32.xlu2 %v6341_v21, %s6177_s10 }
 0x940   :  { %4274 = vrot.lane.b32.xlu2 %v6353_v40, %s6178_s11 }
 0x948   :  { %4592 = vrot.lane.b32.xlu2 %v6371_v19, %s6178_s11 }
 0x97c   :  { %v3739_v36 = vpop.xlane.xlu1 %3738 }
 0x97d   :  { %v3743_v39 = vsub.f32 %v3735_v44, %v3739_v36 }
 0x97f   :  { %v3745_v63 = vmul.f32 1.442695, %v3743_v39 }
 0x981   :  { %6141 = vpow2.f32 %v3745_v63 }
 0x987   :  { %v6142_v7 = vpop.eup %6141 }
 0x988   :  { %v3749_v4 = vsel %vm622_vm8, %v6142_v7, 0.0 }
 0x989   :  { %3750 = vadd.xlane.f32.xlu0 %v3749_v4 }
 0x993   :  { %v3742_v13 = vpop.xlane.xlu2 %3741 }
 0x994   :  { %v3744_v41 = vsub.f32 %v3736_v46, %v3742_v13 }
 0x996   :  { %v3747_v24 = vmul.f32 1.442695, %v3744_v41 }
 0x998   :  { %6143 = vpow2.f32 %v3747_v24 }
 0x99b   :  { %v3786_v9 = vpop.permute.xlu2 %3785 }
 0x99c   :  { %v3806_v10 = vand.u32 4294901760, %v3786_v9 }
 0x99d   :  { %3937 = vrot.lane.b32.xlu0 %v6345_v23, %s6177_s10 }
 0x99e   :  { %v6867_v40 = vpop.eup %6143  ;;  %v3833_v38 = vsub.f32 %v3786_v9, %v3806_v10  ;;  %3807 = vmatpush.msra.mxu0 %v3806_v10  ;;  %3883 = vmatpush.msra.mxu3 %v3806_v10 }
 0x99f   :  { %v3752_v19 = vsel %vm622_vm8, %v6867_v40, 0.0 }
 0x9a0   :  { %v3834_v44 = vand.u32 4294901760, %v3833_v38  ;;  %3753 = vadd.xlane.f32.xlu1 %v3752_v19  ;;  %3860 = vmatpush.msra.mxu2 %v3833_v38 }
 0x9a2   :  { %v3835_v42 = vsub.f32 %v3833_v38, %v3834_v44  ;;  %3909 = vmatpush.msrb.mxu0 %v3834_v44 }
 0x9a4   :  { %v3836_v31 = vand.u32 4294901760, %v3835_v42 }
 0x9a5   :  { %4278 = vrot.lane.b32.xlu0 %v6357_v48, %s6178_s11 }
 0x9a6   :  { %3837 = vmatpush.msra.mxu1 %v3836_v31 }
 0x9a8   :  { %3931 = vmatpush.msrb.mxu1 %v3806_v10 }
 0x9ad   :  { %4276 = vrot.lane.b32.xlu0 %v6360_v51, %s6178_s11 }
 0x9b5   :  { %4772 = vrot.lane.b32.xlu0 %v6345_v23, %s6179_s12 }
 0x9b9   :  { %4280 = vrot.lane.b32.xlu1 %v6366_v60, %s6178_s11 }
 0x9c1   :  { %4594 = vrot.lane.b32.xlu1 %v6341_v21, %s6179_s12 }
 0x9c9   :  { %4770 = vrot.lane.b32.xlu1 %v6376_v27, %s6178_s11 }
 0x9fc   :  { %v3751_v18 = vpop.xlane.xlu0 %3750 }
 0x9fd   :  { %6145 = vrcp.f32 %v3751_v18  ;;  %v3766_v3 = vand.u32 2147483648, %v3751_v18  ;;  %v3764_v51 = vand.u32 2147483647, %v3751_v18  ;;  %vm3760_vm13 = vweird.f32 %v3751_v18 }
 0x9ff   :  { %v3767_v1 = vor.u32 1.1754944e-38, %v3766_v3  ;;  %vm3765_vm15 = vcmp.eq.f32.partialorder %v3764_v51, 8.507059e+37 }
 0xa03   :  { %v6146_v11 = vpop.eup %6145 }
 0xa04   :  { %v3756_v48 = vmul.f32 %v6146_v11, %v3751_v18  ;;  %vm3761_vm11 = vweird.f32 %v6146_v11 }
 0xa05   :  { %vm3762_vm14 = vmor %vm3760_vm13, %vm3761_vm11 }
 0xa06   :  { %v3757_v6 = vsub.f32 1.0, %v3756_v48 }
 0xa08   :  { %v3758_v50 = vmul.f32 %v6146_v11, %v3757_v6  ;;  %v620_v6 = vld [vmem:[%s7186_s3 + $0x28] sm:$0xff] }
 0xa09   :  { %v4110_v51 = vand.u32 4294901760, %v620_v6 }
 0xa0a   :  { %v3759_v5 = vadd.f32 %v6146_v11, %v3758_v50 }
 0xa0c   :  { %v3763_v46 = vsel %vm3762_vm14, %v6146_v11, %v3759_v5 }
 0xa0d   :  { %v3768_v60 = vsel %vm3765_vm15, %v3767_v1, %v3763_v46 }
 0xa0e   :  { %v3769_v59 = vmul.f32 %v6142_v7, %v3768_v60 }
 0xa0f   :  { %v3938_v36 = vpop.permute.xlu0 %3937 }
 0xa10   :  { %v3958_v39 = vand.u32 4294901760, %v3938_v36  ;;  %v3789_v27 = vsel %vm622_vm8, %v3769_v59, 0 }
 0xa11   :  { %v3808_v63 = vand.u32 4294901760, %v3789_v27 }
 0xa12   :  { %v3985_v4 = vsub.f32 %v3938_v36, %v3958_v39  ;;  %3959 = vmatpush.msrb.mxu2 %v3958_v39 }
 0xa13   :  { %3839 = vmatmul.f32.vlgmr.msra.gmra.mxu1 %v3808_v63  ;;  %v3754_v13 = vpop.xlane.xlu1 %3753  ;;  %v3809_v41 = vsub.f32 %v3789_v27, %v3808_v63 }
 0xa14   :  { %v3986_v24 = vand.u32 4294901760, %v3985_v4  ;;  %4035 = vmatpush.msra.mxu1 %v3958_v39  ;;  %6147 = vrcp.f32 %v3754_v13  ;;  %v3781_v18 = vand.u32 2147483648, %v3754_v13  ;;  %v3779_v48 = vand.u32 2147483647, %v3754_v13 }
 0xa15   :  { %3863 = vmatmul.f32.vlgmr.msra.gmra.mxu2 %v3809_v41  ;;  %v3810_v9 = vand.u32 4294901760, %v3809_v41  ;;  %vm3775_vm2 = vweird.f32 %v3754_v13 }
 0xa16   :  { %v3987_v10 = vsub.f32 %v3985_v4, %v3986_v24  ;;  %4061 = vmatpush.msra.mxu2 %v3986_v24  ;;  %v3782_v50 = vor.u32 1.1754944e-38, %v3781_v18  ;;  %vm3780_vm13 = vcmp.eq.f32.partialorder %v3779_v48, 8.507059e+37 }
 0xa17   :  { %3887 = vmatmul.f32.vlgmr.msra.gmra.mxu3 %v3810_v9  ;;  %v3811_v38 = vsub.f32 %v3809_v41, %v3810_v9  ;;  %v4279_v1 = vpop.permute.xlu0 %4278 }
 0xa18   :  { %v3988_v7 = vand.u32 4294901760, %v3987_v10  ;;  %v4286_v59 = vsel %vm622_vm8, %v4279_v1, 0 }
 0xa19   :  { %v3812_v19 = vand.u32 4294901760, %v3811_v38  ;;  %v4306_v27 = vand.u32 4294901760, %v4286_v59 }
 0xa1a   :  { %v6148_v44 = vpop.eup %6147  ;;  %3989 = vmatpush.msrb.mxu3 %v3988_v7 }
 0xa1b   :  { %v3771_v42 = vmul.f32 %v6148_v44, %v3754_v13  ;;  %3813 = vmatmul.f32.vlgmr.msra.gmra.mxu0 %v3812_v19  ;;  %3933 = vmatmul.f32.vlgmr.msrb.gmra.mxu1 %v3808_v63  ;;  %vm3776_vm1 = vweird.f32 %v6148_v44  ;;  %v4346_v9 = vsub.f32 %v4286_v59, %v4306_v27 }
 0xa1c   :  { %4012 = vmatpush.msra.mxu0 %v3985_v4  ;;  %4083 = vmatpush.msra.mxu3 %v3958_v39  ;;  %vm3777_vm11 = vmor %vm3775_vm2, %vm3776_vm1 }
 0xa1d   :  { %v3772_v31 = vsub.f32 1.0, %v3771_v42  ;;  %v4347_v19 = vand.u32 4294901760, %v4346_v9 }
 0xa1f   :  { %v3773_v11 = vmul.f32 %v6148_v44, %v3772_v31  ;;  %v4348_v18 = vsub.f32 %v4346_v9, %v4347_v19 }
 0xa21   :  { %v3774_v3 = vadd.f32 %v6148_v44, %v3773_v11  ;;  %v4349_v11 = vand.u32 4294901760, %v4348_v18 }
 0xa23   :  { %v3778_v5 = vsel %vm3777_vm11, %v6148_v44, %v3774_v3  ;;  %3911 = vmatmul.f32.vlgmr.msrb.gmra.mxu0 %v3808_v63 }
 0xa24   :  { %v3783_v46 = vsel %vm3780_vm13, %v3782_v50, %v3778_v5  ;;  %4111 = vmatpush.msrb.mxu0 %v4110_v51  ;;  %vm5802_vm13 = vcmask 523264  }
 0xa25   :  { %v3784_v60 = vmul.f32 %v6867_v40, %v3783_v46  ;;  %v4145_v40 = vsub.f32 %v620_v6, %v4110_v51 }
 0xa27   :  { %v3941_v36 = vsel %vm622_vm8, %v3784_v60, 0  ;;  %v4146_v48 = vand.u32 4294901760, %v4145_v40 }
 0xa28   :  { %v3960_v39 = vand.u32 4294901760, %v3941_v36 }
 0xa29   :  { %v4147_v3 = vsub.f32 %v4145_v40, %v4146_v48 }
 0xa2a   :  { %3991 = vmatmul.f32.vlgmr.msrb.gmra.mxu3 %v3960_v39  ;;  %v3961_v4 = vsub.f32 %v3941_v36, %v3960_v39 }
 0xa2b   :  { %v4281_v13 = vpop.permute.xlu1 %4280  ;;  %4204 = vmatpush.msrb.mxu3 %v4110_v51  ;;  %v4148_v50 = vand.u32 4294901760, %v4147_v3  ;;  %v4275_v3 = vpop.permute.xlu2 %4274 }
 0xa2c   :  { %v4288_v41 = vsel %vm622_vm8, %v4281_v13, 0  ;;  %4015 = vmatmul.f32.vlgmr.msra.gmra.mxu0 %v3961_v4  ;;  %v3962_v24 = vand.u32 4294901760, %v3961_v4 }
 0xa2d   :  { %v4304_v63 = vand.u32 4294901760, %v4288_v41  ;;  %4236 = vmatpush.msra.mxu0 %v4146_v48  ;;  %4149 = vmatpush.msrb.mxu1 %v4148_v50 }
 0xa2e   :  { %4039 = vmatmul.f32.vlgmr.msra.gmra.mxu1 %v3962_v24  ;;  %v3963_v10 = vsub.f32 %v3961_v4, %v3962_v24 }
 0xa2f   :  { %v4340_v38 = vsub.f32 %v4288_v41, %v4304_v63  ;;  %4262 = vmatpush.msra.mxu1 %v4110_v51 }
 0xa30   :  { %v3964_v7 = vand.u32 4294901760, %v3963_v10 }
 0xa31   :  { %v4341_v44 = vand.u32 4294901760, %v4340_v38 }
 0xa32   :  { %3965 = vmatmul.f32.vlgmr.msrb.gmra.mxu2 %v3964_v7  ;;  %4085 = vmatmul.f32.vlgmr.msra.gmra.mxu3 %v3960_v39 }
 0xa33   :  { %v4342_v42 = vsub.f32 %v4340_v38, %v4341_v44  ;;  %4176 = vmatpush.msrb.mxu2 %v4145_v40 }
 0xa35   :  { %v4343_v31 = vand.u32 4294901760, %v4342_v42 }
 0xa37   :  { %4344 = vmatpush.xpose.msra.mxu3 %v4343_v31 }
 0xa3a   :  { %4063 = vmatmul.f32.vlgmr.msra.gmra.mxu2 %v3960_v39 }
 0xa3b   :  { %4305 = vmatpush.xpose.msra.mxu2 %v4304_v63  ;;  %4350 = vmatpush.xpose.msra.mxu3 %v4349_v11  ;;  %v4595_v11 = vpop.permute.xlu1 %4594 }
 0xa3f   :  { %4307 = vmatpush.xpose.msra.mxu2 %v4306_v27 }
 0xa90   :  { %v3840_v6 = vpop.f32.mrf.mxu1 }
 0xa98   :  { %v3814_v5 = vpop.f32.mrf.mxu0  ;;  %v3864_v46 = vpop.f32.mrf.mxu2 }
 0xa99   :  { %v3841_v1 = vadd.f32 %v3840_v6, %v3814_v5  ;;  %v3934_v41 = vpop.f32.mrf.mxu1  ;;  %v4622_v5 = vsel %vm622_vm8, %v4595_v11, 0 }
 0xa9a   :  { %v3888_v59 = vpop.f32.mrf.mxu3 }
 0xa9b   :  { %v3865_v60 = vadd.f32 %v3864_v46, %v3841_v1  ;;  %v4639_v46 = vand.u32 4294901760, %v4622_v5 }
 0xa9d   :  { %v3889_v36 = vadd.f32 %v3888_v59, %v3865_v60 }
 0xaa0   :  { %v3912_v4 = vpop.f32.mrf.mxu0 }
 0xaa1   :  { %v3913_v13 = vadd.f32 %v3912_v4, %v3889_v36  ;;  %v4666_v36 = vsub.f32 %v4622_v5, %v4639_v46 }
 0xaa3   :  { %v3935_v39 = vadd.f32 %v3934_v41, %v3913_v13 }
 0xaa5   :  { %v4090_v24 = vsel %vm622_vm8, %v3935_v39, 0 }
 0xaa6   :  { %v6890_v10 = vand.u32 4294901760, %v4090_v24 }
 0xaa8   :  { %v4113_v40 = vsub.f32 %v4090_v24, %v6890_v10  ;;  %4151 = vmatmul.f32.vlgmr.msrb.gmra.mxu1 %v6890_v10  ;;  %v4667_v24 = vand.u32 4294901760, %v4666_v36 }
 0xaa9   :  { %4406 = vmatpush.xpose.msrb.mxu1 %v4304_v63  ;;  %v4016_v50 = vpop.f32.mrf.mxu0 }
 0xaaa   :  { %v4114_v51 = vand.u32 4294901760, %v4113_v40  ;;  %4179 = vmatmul.f32.vlgmr.msrb.gmra.mxu2 %v4113_v40 }
 0xaab   :  { %4439 = vmatpush.xpose.msrb.mxu2 %v4341_v44  ;;  %v4282_v44 = vsel %vm622_vm8, %v4275_v3, 0  ;;  %v4040_v1 = vpop.f32.mrf.mxu1 }
 0xaac   :  { %v4115_v7 = vsub.f32 %v4113_v40, %v4114_v51  ;;  %4208 = vmatmul.f32.vlgmr.msrb.gmra.mxu3 %v4114_v51  ;;  %v4308_v60 = vand.u32 4294901760, %v4282_v44 }
 0xaad   :  { %4408 = vmatpush.xpose.msrb.mxu1 %v4306_v27  ;;  %4468 = vmatpush.xpose.msrb.mxu3 %v4304_v63  ;;  %v3992_v31 = vpop.f32.mrf.mxu3 }
 0xaae   :  { %v4116_v42 = vand.u32 4294901760, %v4115_v7  ;;  %v4309_v4 = vsub.f32 %v4282_v44, %v4308_v60 }
 0xaaf   :  { %4443 = vmatpush.xpose.msrb.mxu2 %v4347_v19 }
 0xab0   :  { %4117 = vmatmul.f32.vlgmr.msrb.gmra.mxu0 %v4116_v42  ;;  %v4310_v40 = vand.u32 4294901760, %v4309_v4 }
 0xab1   :  { %4376 = vmatpush.xpose.msrb.mxu0 %v4340_v38  ;;  %4470 = vmatpush.xpose.msrb.mxu3 %v4306_v27  ;;  %v4277_v38 = vpop.permute.xlu0 %4276 }
 0xab2   :  { %v4284_v13 = vsel %vm622_vm8, %v4277_v38, 0 }
 0xab3   :  { %v4316_v51 = vand.u32 4294901760, %v4284_v13 }
 0xab5   :  { %4379 = vmatpush.xpose.msrb.mxu0 %v4346_v9  ;;  %v3966_v18 = vpop.f32.mrf.mxu2  ;;  %v4086_v27 = vpop.f32.mrf.mxu3  ;;  %v4317_v11 = vsub.f32 %v4284_v13, %v4316_v51 }
 0xab6   :  { %v3993_v48 = vadd.f32 %v3992_v31, %v3966_v18  ;;  %v4668_v31 = vsub.f32 %v4666_v36, %v4667_v24  ;;  %v4311_v18 = vsub.f32 %v4309_v4, %v4310_v40  ;;  %v4593_v13 = vpop.permute.xlu2 %4592 }
 0xab7   :  { %v4318_v44 = vand.u32 4294901760, %v4317_v11 }
 0xab8   :  { %v4017_v6 = vadd.f32 %v4016_v50, %v3993_v48  ;;  %v4312_v5 = vand.u32 4294901760, %v4311_v18 }
 0xab9   :  { %v4773_v3 = vpop.permute.xlu0 %4772 }
 0xaba   :  { %v4041_v63 = vadd.f32 %v4040_v1, %v4017_v6  ;;  %v4669_v6 = vand.u32 4294901760, %v4668_v31  ;;  %v4800_v1 = vsel %vm622_vm8, %v4773_v3, 0 }
 0xabd   :  { %v4064_v19 = vpop.f32.mrf.mxu2 }
 0xabe   :  { %v4065_v59 = vadd.f32 %v4064_v19, %v4041_v63  ;;  %v4817_v63 = vand.u32 4294901760, %v4800_v1  ;;  %v4319_v19 = vsub.f32 %v4317_v11, %v4318_v44 }
 0xac0   :  { %v4087_v9 = vadd.f32 %v4086_v27, %v4065_v59  ;;  %v4844_v59 = vsub.f32 %v4800_v1, %v4817_v63  ;;  %v4320_v38 = vand.u32 4294901760, %v4319_v19 }
 0xac2   :  { %v4093_v41 = vsel %vm622_vm8, %v4087_v9, 0  ;;  %v4845_v27 = vand.u32 4294901760, %v4844_v59 }
 0xac3   :  { %v4120_v39 = vand.u32 4294901760, %v4093_v41 }
 0xac4   :  { %v4846_v9 = vsub.f32 %v4844_v59, %v4845_v27 }
 0xac5   :  { %4155 = vmatmul.f32.gmra.mxu1 %v4120_v39  ;;  %v4121_v7 = vsub.f32 %v4093_v41, %v4120_v39  ;;  %v4771_v41 = vpop.permute.xlu1 %4770 }
 0xac7   :  { %4184 = vmatmul.f32.gmra.mxu2 %v4121_v7  ;;  %v4122_v42 = vand.u32 4294901760, %v4121_v7 }
 0xac9   :  { %4214 = vmatmul.f32.gmra.mxu3 %v4122_v42  ;;  %v4123_v48 = vsub.f32 %v4121_v7, %v4122_v42  ;;  %v4847_v7 = vand.u32 4294901760, %v4846_v9 }
 0xacb   :  { %v4124_v50 = vand.u32 4294901760, %v4123_v48 }
 0xacd   :  { %4125 = vmatmul.f32.gmra.mxu0 %v4124_v50  ;;  %4264 = vmatmul.f32.vlgmr.msra.gmra.mxu1 %v6890_v10 }
 0xace   :  { %4670 = vmatpush.xpose.msra.mxu1 %v4669_v6 }
 0xacf   :  { %4313 = vmatmul.f32.vlgmr.msra.gmra.mxu2 %v4312_v5 }
 0xad0   :  { %4693 = vmatpush.xpose.msra.mxu2 %v4666_v36  ;;  %v4620_v36 = vsel %vm622_vm8, %v4593_v13, 0 }
 0xad1   :  { %4352 = vmatmul.f32.vlgmr.msra.gmra.mxu3 %v4308_v60  ;;  %v4641_v42 = vand.u32 4294901760, %v4620_v36 }
 0xad2   :  { %4716 = vmatpush.xpose.msra.mxu3 %v4639_v46 }
 0xad3   :  { %v4642_v18 = vsub.f32 %v4620_v36, %v4641_v42 }
 0xad5   :  { %4238 = vmatmul.f32.vlgmr.msra.gmra.mxu0 %v6890_v10  ;;  %4268 = vmatmul.f32.gmra.mxu1 %v4120_v39  ;;  %v4798_v10 = vsel %vm622_vm8, %v4771_v41, 0 }
 0xad6   :  { %4640 = vmatpush.xpose.msra.mxu0 %v4639_v46  ;;  %v4819_v31 = vand.u32 4294901760, %v4798_v10 }
 0xad7   :  { %4321 = vmatmul.f32.gmra.mxu2 %v4320_v38 }
 0xad9   :  { %4356 = vmatmul.f32.gmra.mxu3 %v4316_v51 }
 0xadd   :  { %4242 = vmatmul.f32.gmra.mxu0 %v4120_v39  ;;  %4412 = vmatmul.f32.vlgmr.msrb.gmra.mxu1 %v4310_v40  ;;  %v4820_v39 = vsub.f32 %v4798_v10, %v4819_v31 }
 0xade   :  { %4764 = vmatpush.xpose.msrb.mxu1 %v4639_v46  ;;  %v4643_v46 = vand.u32 4294901760, %v4642_v18 }
 0xadf   :  { %4445 = vmatmul.f32.vlgmr.msrb.gmra.mxu2 %v4308_v60  ;;  %v4821_v40 = vand.u32 4294901760, %v4820_v39 }
 0xae0   :  { %4818 = vmatpush.xpose.msrb.mxu2 %v4817_v63  ;;  %v4644_v48 = vsub.f32 %v4642_v18, %v4643_v46 }
 0xae1   :  { %4472 = vmatmul.f32.vlgmr.msrb.gmra.mxu3 %v4308_v60  ;;  %v4822_v60 = vsub.f32 %v4820_v39, %v4821_v40 }
 0xae2   :  { %4848 = vmatpush.xpose.msrb.mxu3 %v4847_v7  ;;  %v4645_v3 = vand.u32 4294901760, %v4644_v48 }
 0xae3   :  { %v4823_v50 = vand.u32 4294901760, %v4822_v60 }
 0xae5   :  { %4382 = vmatmul.f32.vlgmr.msrb.gmra.mxu0 %v4309_v4  ;;  %4418 = vmatmul.f32.gmra.mxu1 %v4318_v44 }
 0xae6   :  { %4742 = vmatpush.xpose.msrb.mxu0 %v4667_v24 }
 0xae7   :  { %4449 = vmatmul.f32.gmra.mxu2 %v4316_v51 }
 0xae9   :  { %4476 = vmatmul.f32.gmra.mxu3 %v4316_v51 }
 0xaed   :  { %4387 = vmatmul.f32.gmra.mxu0 %v4317_v11  ;;  %4672 = vmatmul.f32.vlgmr.msra.gmra.mxu1 %v4641_v42 }
 0xaee   :  { %4894 = vmatpush.xpose.msra.mxu1 %v4817_v63 }
 0xaef   :  { %4696 = vmatmul.f32.vlgmr.msra.gmra.mxu2 %v4642_v18 }
 0xaf0   :  { %4920 = vmatpush.xpose.msra.mxu2 %v4845_v27 }
 0xaf1   :  { %4720 = vmatmul.f32.vlgmr.msra.gmra.mxu3 %v4643_v46 }
 0xaf2   :  { %4942 = vmatpush.xpose.msra.mxu3 %v4817_v63 }
 0xaf5   :  { %4646 = vmatmul.f32.vlgmr.msra.gmra.mxu0 %v4645_v3  ;;  %4766 = vmatmul.f32.vlgmr.msrb.gmra.mxu1 %v4641_v42 }
 0xaf6   :  { %4871 = vmatpush.xpose.msra.mxu0 %v4844_v59 }
 0xaf7   :  { %4824 = vmatmul.f32.vlgmr.msrb.gmra.mxu2 %v4823_v50 }
 0xaf9   :  { %4850 = vmatmul.f32.vlgmr.msrb.gmra.mxu3 %v4819_v31 }
 0xafd   :  { %4744 = vmatmul.f32.vlgmr.msrb.gmra.mxu0 %v4641_v42  ;;  %4898 = vmatmul.f32.vlgmr.msra.gmra.mxu1 %v4821_v40 }
 0xaff   :  { %4922 = vmatmul.f32.vlgmr.msra.gmra.mxu2 %v4819_v31 }
 0xb01   :  { %4944 = vmatmul.f32.vlgmr.msra.gmra.mxu3 %v4819_v31 }
 0xb05   :  { %4874 = vmatmul.f32.vlgmr.msra.gmra.mxu0 %v4820_v39 }
 0xb25   :  { %v4152_v4 = vpop.f32.mrf.mxu1 }
 0xb2d   :  { %v4118_v24 = vpop.f32.mrf.mxu0  ;;  %v4180_v11 = vpop.f32.mrf.mxu2 }
 0xb2e   :  { %v4153_v51 = vadd.f32 %v4152_v4, %v4118_v24 }
 0xb2f   :  { %v4209_v5 = vpop.f32.mrf.mxu3 }
 0xb30   :  { %v4181_v6 = vadd.f32 %v4180_v11, %v4153_v51 }
 0xb32   :  { %v4210_v44 = vadd.f32 %v4209_v5, %v4181_v6 }
 0xb42   :  { %v4156_v1 = vpop.f32.mrf.mxu1 }
 0xb4a   :  { %v4126_v63 = vpop.f32.mrf.mxu0  ;;  %v4185_v19 = vpop.f32.mrf.mxu2 }
 0xb4b   :  { %v4157_v38 = vadd.f32 %v4156_v1, %v4126_v63  ;;  %v4265_v9 = vpop.f32.mrf.mxu1 }
 0xb4c   :  { %v4215_v27 = vpop.f32.mrf.mxu3 }
 0xb4d   :  { %v4186_v59 = vadd.f32 %v4185_v19, %v4157_v38 }
 0xb4f   :  { %v4216_v13 = vadd.f32 %v4215_v27, %v4186_v59 }
 0xb52   :  { %v4239_v41 = vpop.f32.mrf.mxu0  ;;  %v4314_v36 = vpop.f32.mrf.mxu2 }
 0xb53   :  { %v4240_v7 = vadd.f32 %v4239_v41, %v4210_v44  ;;  %v4269_v31 = vpop.f32.mrf.mxu1 }
 0xb54   :  { %v4353_v10 = vpop.f32.mrf.mxu3 }
 0xb55   :  { %v6903_v42 = vadd.f32 %v4265_v9, %v4240_v7  ;;  %v4354_v60 = vadd.f32 %v4353_v10, %v4314_v36 }
 0xb5a   :  { %v4243_v18 = vpop.f32.mrf.mxu0  ;;  %v4322_v46 = vpop.f32.mrf.mxu2 }
 0xb5b   :  { %v4244_v39 = vadd.f32 %v4243_v18, %v4216_v13  ;;  %v4413_v3 = vpop.f32.mrf.mxu1 }
 0xb5c   :  { %v4357_v48 = vpop.f32.mrf.mxu3 }
 0xb5d   :  { %v6905_v40 = vadd.f32 %v4269_v31, %v4244_v39  ;;  %v4358_v5 = vadd.f32 %v4357_v48, %v4322_v46 }
 0xb62   :  { %v4383_v50 = vpop.f32.mrf.mxu0  ;;  %v4446_v51 = vpop.f32.mrf.mxu2 }
 0xb63   :  { %v4384_v4 = vadd.f32 %v4383_v50, %v4354_v60  ;;  %v4419_v59 = vpop.f32.mrf.mxu1 }
 0xb64   :  { %v4473_v6 = vpop.f32.mrf.mxu3 }
 0xb65   :  { %v4414_v24 = vadd.f32 %v4413_v3, %v4384_v4 }
 0xb67   :  { %v4447_v11 = vadd.f32 %v4446_v51, %v4414_v24 }
 0xb69   :  { %v4474_v44 = vadd.f32 %v4473_v6, %v4447_v11 }
 0xb6a   :  { %v4388_v1 = vpop.f32.mrf.mxu0  ;;  %v4450_v60 = vpop.f32.mrf.mxu2 }
 0xb6b   :  { %v4389_v63 = vadd.f32 %v4388_v1, %v4358_v5  ;;  %v4496_v19 = vperm.slane %v4474_v44, 0  ;;  %v4483_v38 = vrot.slane %v4474_v44, 2  ;;  %v4482_v27 = vrot.slane %v4474_v44, 1 }
 0xb6c   :  { %v4484_v9 = vrot.slane %v4474_v44, 3  ;;  %v4486_v13 = vrot.slane %v4474_v44, 5  ;;  %v4485_v41 = vrot.slane %v4474_v44, 4  ;;  %v4487_v6 = vrot.slane %v4474_v44, 6  ;;  %v4477_v5 = vpop.f32.mrf.mxu3 }
 0xb6d   :  { %v4420_v7 = vadd.f32 %v4419_v59, %v4389_v63  ;;  %v4528_v36 = vmul.f32 %v6388_v15, %v4496_v19  ;;  %v4498_v10 = vperm.slane %v4483_v38, 0  ;;  %v4497_v31 = vperm.slane %v4482_v27, 0 }
 0xb6e   :  { %v4499_v48 = vperm.slane %v4484_v9, 0  ;;  %v4501_v3 = vperm.slane %v4486_v13, 0  ;;  %v4500_v51 = vperm.slane %v4485_v41, 0  ;;  %v4488_v38 = vrot.slane %v4474_v44, 7 }
 0xb6f   :  { %v4544_v18 = vsel %vm889_vm12, %v4528_v36, 0.0  ;;  %v4530_v39 = vmul.f32 %v6391_v16, %v4498_v10  ;;  %v4529_v46 = vmul.f32 %v6394_v30, %v4497_v31  ;;  %v4451_v50 = vadd.f32 %v4450_v60, %v4420_v7 }
 0xb70   :  { %4545 = vadd.xlane.f32.xlu2 %v4544_v18  ;;  %v4531_v11 = vmul.f32 %v6404_v43, %v4499_v48  ;;  %v4533_v63 = vmul.f32 %v6428_v2, %v4501_v3  ;;  %v4532_v19 = vmul.f32 %v6418_v53, %v4500_v51  ;;  %v4502_v59 = vperm.slane %v4487_v6, 0 }
 0xb71   :  { %v4550_v4 = vsel %vm889_vm12, %v4530_v39, 0.0  ;;  %v4547_v24 = vsel %vm889_vm12, %v4529_v46, 0.0  ;;  %v4478_v1 = vadd.f32 %v4477_v5, %v4451_v50  ;;  %v4503_v41 = vperm.slane %v4488_v38, 0 }
 0xb72   :  { %4551 = vadd.xlane.f32.xlu1 %v4550_v4  ;;  %4548 = vadd.xlane.f32.xlu0 %v4547_v24  ;;  %v4553_v27 = vsel %vm889_vm12, %v4531_v11, 0.0  ;;  %v4559_v9 = vsel %vm889_vm12, %v4533_v63, 0.0  ;;  %v4556_v13 = vsel %vm889_vm12, %v4532_v19, 0.0  ;;  %v4534_v36 = vmul.f32 %v6433_v8, %v4502_v59 }
 0xb73   :  { %v4504_v7 = vperm.slane %v4478_v1, 0  ;;  %v4489_v10 = vrot.slane %v4478_v1, 1  ;;  %v4535_v31 = vmul.f32 %v6413_v52, %v4503_v41  ;;  %v4491_v44 = vrot.slane %v4478_v1, 3 }
 0xb74   :  { %v4490_v39 = vrot.slane %v4478_v1, 2  ;;  %v4562_v46 = vsel %vm889_vm12, %v4534_v36, 0.0  ;;  %v4492_v51 = vrot.slane %v4478_v1, 4  ;;  %v4494_v6 = vrot.slane %v4478_v1, 6 }
 0xb75   :  { %v4536_v18 = vmul.f32 %v6388_v15, %v4504_v7  ;;  %v4505_v48 = vperm.slane %v4489_v10, 0  ;;  %v4565_v60 = vsel %vm889_vm12, %v4535_v31, 0.0  ;;  %v4507_v50 = vperm.slane %v4491_v44, 0 }
 0xb76   :  { %v4506_v4 = vperm.slane %v4490_v39, 0  ;;  %v4493_v5 = vrot.slane %v4478_v1, 5  ;;  %v4508_v19 = vperm.slane %v4492_v51, 0  ;;  %v4510_v59 = vperm.slane %v4494_v6, 0 }
 0xb77   :  { %v4568_v3 = vsel %vm889_vm12, %v4536_v18, 0.0  ;;  %v4537_v24 = vmul.f32 %v6394_v30, %v4505_v48  ;;  %v4539_v11 = vmul.f32 %v6404_v43, %v4507_v50 }
 0xb78   :  { %4554 = vadd.xlane.f32.xlu2 %v4553_v27  ;;  %v4538_v15 = vmul.f32 %v6391_v16, %v4506_v4  ;;  %v4540_v30 = vmul.f32 %v6418_v53, %v4508_v19  ;;  %v4542_v43 = vmul.f32 %v6433_v8, %v4510_v59 }
 0xb79   :  { %v4571_v63 = vsel %vm889_vm12, %v4537_v24, 0.0  ;;  %v4577_v38 = vsel %vm889_vm12, %v4539_v11, 0.0 }
 0xb7a   :  { %4560 = vadd.xlane.f32.xlu1 %v4559_v9  ;;  %4557 = vadd.xlane.f32.xlu0 %v4556_v13  ;;  %v4574_v27 = vsel %vm889_vm12, %v4538_v15, 0.0  ;;  %v4509_v9 = vperm.slane %v4493_v5, 0  ;;  %v4495_v13 = vrot.slane %v4478_v1, 7  ;;  %v4580_v41 = vsel %vm889_vm12, %v4540_v30, 0.0 }
 0xb7b   :  { %v4586_v36 = vsel %vm889_vm12, %v4542_v43, 0.0 }
 0xb7c   :  { %v4541_v16 = vmul.f32 %v6428_v2, %v4509_v9  ;;  %v4511_v7 = vperm.slane %v4495_v13, 0  ;;  %v4673_v9 = vpop.f32.mrf.mxu1 }
 0xb7e   :  { %v4583_v10 = vsel %vm889_vm12, %v4541_v16, 0.0  ;;  %v4543_v31 = vmul.f32 %v6413_v52, %v4511_v7 }
 0xb80   :  { %4563 = vadd.xlane.f32.xlu2 %v4562_v46  ;;  %v4589_v18 = vsel %vm889_vm12, %v4543_v31, 0.0 }
 0xb82   :  { %4566 = vadd.xlane.f32.xlu0 %v4565_v60  ;;  %4569 = vadd.xlane.f32.xlu1 %v4568_v3 }
 0xb88   :  { %4572 = vadd.xlane.f32.xlu2 %v4571_v63 }
 0xb8a   :  { %4578 = vadd.xlane.f32.xlu1 %v4577_v38  ;;  %4575 = vadd.xlane.f32.xlu0 %v4574_v27  ;;  %v4647_v38 = vpop.f32.mrf.mxu0 }
 0xb90   :  { %4581 = vadd.xlane.f32.xlu2 %v4580_v41  ;;  %v4697_v41 = vpop.f32.mrf.mxu2 }
 0xb92   :  { %4587 = vadd.xlane.f32.xlu1 %v4586_v36  ;;  %4584 = vadd.xlane.f32.xlu0 %v4583_v10 }
 0xb98   :  { %4590 = vadd.xlane.f32.xlu2 %v4589_v18  ;;  %v4721_v18 = vpop.f32.mrf.mxu3 }
 0xbe3   :  { %v4546_v53 = vpop.xlane.xlu2 %4545 }
 0xbe4   :  { %v4604_v44 = vperm.slane %v4546_v53, %v6382_v0 }
 0xbe5   :  { %v4549_v1 = vpop.xlane.xlu0 %4548  ;;  %v4552_v8 = vpop.xlane.xlu1 %4551 }
 0xbe6   :  { %v4605_v2 = vperm.slane %v4549_v1, %v6382_v0  ;;  %v4606_v39 = vperm.slane %v4552_v8, %v6382_v0 }
 0xbe8   :  { %v4612_v46 = vsel %vm957_vm3, %v4605_v2, %v4604_v44  ;;  %v4745_v2 = vpop.f32.mrf.mxu0 }
 0xbe9   :  { %v4613_v52 = vsel %vm959_vm4, %v4606_v39, %v4612_v46  ;;  %v4767_v46 = vpop.f32.mrf.mxu1 }
 0xbeb   :  { %v4555_v48 = vpop.xlane.xlu2 %4554 }
 0xbec   :  { %v4607_v60 = vperm.slane %v4555_v48, %v6382_v0 }
 0xbed   :  { %v4558_v3 = vpop.xlane.xlu0 %4557  ;;  %v4561_v50 = vpop.xlane.xlu1 %4560 }
 0xbee   :  { %v4608_v4 = vperm.slane %v4558_v3, %v6382_v0  ;;  %v4614_v24 = vsel %vm961_vm5, %v4607_v60, %v4613_v52  ;;  %v4609_v51 = vperm.slane %v4561_v50, %v6382_v0 }
 0xbf0   :  { %v4615_v11 = vsel %vm963_vm6, %v4608_v4, %v4614_v24 }
 0xbf1   :  { %v4616_v5 = vsel %vm965_vm7, %v4609_v51, %v4615_v11 }
 0xbf3   :  { %v4564_v15 = vpop.xlane.xlu2 %4563 }
 0xbf4   :  { %v4610_v6 = vperm.slane %v4564_v15, %v6382_v0 }
 0xbf5   :  { %v4567_v63 = vpop.xlane.xlu0 %4566  ;;  %v4570_v19 = vpop.xlane.xlu1 %4569 }
 0xbf6   :  { %v4617_v27 = vsel %vm967_vm9, %v4610_v6, %v4616_v5  ;;  %v4611_v59 = vperm.slane %v4567_v63, %v6382_v0  ;;  %v4782_v53 = vperm.slane %v4570_v19, %v6382_v0 }
 0xbf8   :  { %v4618_v30 = vsel %vm969_vm10, %v4611_v59, %v4617_v27  ;;  %v4825_v59 = vpop.f32.mrf.mxu2 }
 0xbf9   :  { %v4648_v13 = vadd.f32 %v4647_v38, %v4618_v30 }
 0xbfb   :  { %v4674_v43 = vadd.f32 %v4673_v9, %v4648_v13  ;;  %v4573_v16 = vpop.xlane.xlu2 %4572  ;;  %v4851_v13 = vpop.f32.mrf.mxu3 }
 0xbfc   :  { %v4783_v7 = vperm.slane %v4573_v16, %v6382_v0 }
 0xbfd   :  { %v4698_v36 = vadd.f32 %v4697_v41, %v4674_v43  ;;  %v4576_v10 = vpop.xlane.xlu0 %4575  ;;  %v4579_v31 = vpop.xlane.xlu1 %4578 }
 0xbfe   :  { %v4784_v1 = vperm.slane %v4576_v10, %v6382_v0  ;;  %v4790_v44 = vsel %vm957_vm3, %v4783_v7, %v4782_v53  ;;  %v4785_v48 = vperm.slane %v4579_v31, %v6382_v0  ;;  %v4875_v7 = vpop.f32.mrf.mxu0 }
 0xbff   :  { %v4722_v8 = vadd.f32 %v4721_v18, %v4698_v36  ;;  %v4899_v36 = vpop.f32.mrf.mxu1 }
 0xc00   :  { %v4791_v60 = vsel %vm959_vm4, %v4784_v1, %v4790_v44  ;;  %v4923_v31 = vpop.f32.mrf.mxu2 }
 0xc01   :  { %v4746_v39 = vadd.f32 %v4745_v2, %v4722_v8  ;;  %v4792_v51 = vsel %vm961_vm5, %v4785_v48, %v4791_v60 }
 0xc03   :  { %v4582_v3 = vpop.xlane.xlu2 %4581  ;;  %v4768_v50 = vadd.f32 %v4767_v46, %v4746_v39  ;;  %v4945_v53 = vpop.f32.mrf.mxu3 }
 0xc04   :  { %v4786_v52 = vperm.slane %v4582_v3, %v6382_v0 }
 0xc05   :  { %v4585_v4 = vpop.xlane.xlu0 %4584  ;;  %v4948_v24 = vmul.f32 0.35355338, %v4768_v50  ;;  %v4588_v15 = vpop.xlane.xlu1 %4587 }
 0xc06   :  { %v4787_v11 = vperm.slane %v4585_v4, %v6382_v0  ;;  %v4793_v6 = vsel %vm963_vm6, %v4786_v52, %v4792_v51  ;;  %v4788_v63 = vperm.slane %v4588_v15, %v6382_v0 }
 0xc07   :  { %v4950_v5 = vadd.f32 %v4948_v24, %v6486_v62 }
 0xc08   :  { %v4794_v38 = vsel %vm965_vm7, %v4787_v11, %v4793_v6 }
 0xc09   :  { %v4952_v19 = vsel %vm622_vm8, %v4950_v5, -inf  ;;  %v4795_v30 = vsel %vm967_vm9, %v4788_v63, %v4794_v38 }
 0xc0a   :  { %4953 = vmax.xlane.f32.xlu0 %v4952_v19 }
 0xc0b   :  { %v4591_v27 = vpop.xlane.xlu2 %4590 }
 0xc0c   :  { %v4789_v9 = vperm.slane %v4591_v27, %v6382_v0 }
 0xc0e   :  { %v4796_v43 = vsel %vm969_vm10, %v4789_v9, %v4795_v30 }
 0xc0f   :  { %v4826_v16 = vadd.f32 %v4825_v59, %v4796_v43 }
 0xc11   :  { %v4852_v41 = vadd.f32 %v4851_v13, %v4826_v16 }
 0xc13   :  { %v4876_v62 = vadd.f32 %v4875_v7, %v4852_v41 }
 0xc15   :  { %v4900_v10 = vadd.f32 %v4899_v36, %v4876_v62 }
 0xc17   :  { %v4924_v18 = vadd.f32 %v4923_v31, %v4900_v10 }
 0xc19   :  { %v4946_v1 = vadd.f32 %v4945_v53, %v4924_v18 }
 0xc1b   :  { %v4949_v8 = vmul.f32 0.35355338, %v4946_v1 }
 0xc1d   :  { %v4951_v2 = vadd.f32 %v4949_v8, %v6504_v45 }
 0xc1f   :  { %v4955_v0 = vsel %vm622_vm8, %v4951_v2, -inf }
 0xc20   :  { %4956 = vmax.xlane.f32.xlu1 %v4955_v0 }
 0xc39   :  { %5000 = vrot.lane.b32.xlu1 %v6341_v21, %s6180_s15 }
 0xc7d   :  { %v4954_v44 = vpop.xlane.xlu0 %4953 }
 0xc7e   :  { %v4958_v39 = vsub.f32 %v4950_v5, %v4954_v44  ;;  %v6983_v5 = vld [vmem:[%s7185_s5 + $0x3] ss:$0 sm:$0xff] }
 0xc80   :  { %v4960_v46 = vmul.f32 1.442695, %v4958_v39 }
 0xc82   :  { %6149 = vpow2.f32 %v4960_v46 }
 0xc88   :  { %v6150_v48 = vpop.eup %6149 }
 0xc89   :  { %v4964_v60 = vsel %vm622_vm8, %v6150_v48, 0.0 }
 0xc8a   :  { %4965 = vadd.xlane.f32.xlu2 %v4964_v60 }
 0xc93   :  { %v4957_v3 = vpop.xlane.xlu1 %4956 }
 0xc94   :  { %v4959_v50 = vsub.f32 %v4951_v2, %v4957_v3 }
 0xc96   :  { %v4962_v52 = vmul.f32 1.442695, %v4959_v50 }
 0xc98   :  { %6151 = vpow2.f32 %v4962_v52 }
 0xc9e   :  { %v6975_v4 = vpop.eup %6151 }
 0xc9f   :  { %v4967_v45 = vsel %vm622_vm8, %v6975_v4, 0.0 }
 0xca0   :  { %4968 = vadd.xlane.f32.xlu0 %v4967_v45 }
 0xca2   :  { %5152 = vrot.lane.b32.xlu2 %v6345_v23, %s6180_s15 }
 0xcab   :  { %v5001_v21 = vpop.permute.xlu1 %5000 }
 0xcac   :  { %v5021_v24 = vand.u32 4294901760, %v5001_v21 }
 0xcae   :  { %v5048_v51 = vsub.f32 %v5001_v21, %v5021_v24  ;;  %5022 = vmatpush.msrb.mxu0 %v5021_v24  ;;  %5098 = vmatpush.msrb.mxu3 %v5021_v24 }
 0xcb0   :  { %v5049_v11 = vand.u32 4294901760, %v5048_v51  ;;  %5075 = vmatpush.msrb.mxu2 %v5048_v51 }
 0xcb2   :  { %v5050_v15 = vsub.f32 %v5048_v51, %v5049_v11  ;;  %5124 = vmatpush.msra.mxu0 %v5049_v11 }
 0xcb4   :  { %v5051_v6 = vand.u32 4294901760, %v5050_v15  ;;  %5489 = vrot.lane.b32.xlu0 %v6983_v5, %s6170_s19 }
 0xcb6   :  { %5052 = vmatpush.msrb.mxu1 %v5051_v6 }
 0xcb8   :  { %5146 = vmatpush.msra.mxu1 %v5021_v24 }
 0xcfd   :  { %v4966_v23 = vpop.xlane.xlu2 %4965 }
 0xcfe   :  { %6153 = vrcp.f32 %v4966_v23  ;;  %v4981_v9 = vand.u32 2147483648, %v4966_v23  ;;  %v4979_v43 = vand.u32 2147483647, %v4966_v23  ;;  %vm4975_vm3 = vweird.f32 %v4966_v23 }
 0xd00   :  { %v4982_v7 = vor.u32 1.1754944e-38, %v4981_v9  ;;  %vm4980_vm5 = vcmp.eq.f32.partialorder %v4979_v43, 8.507059e+37 }
 0xd04   :  { %v6154_v63 = vpop.eup %6153 }
 0xd05   :  { %v4971_v19 = vmul.f32 %v6154_v63, %v4966_v23  ;;  %v5153_v38 = vpop.permute.xlu2 %5152  ;;  %vm4976_vm12 = vweird.f32 %v6154_v63 }
 0xd06   :  { %v5173_v27 = vand.u32 4294901760, %v5153_v38  ;;  %vm4977_vm4 = vmor %vm4975_vm3, %vm4976_vm12 }
 0xd07   :  { %v4972_v59 = vsub.f32 1.0, %v4971_v19 }
 0xd08   :  { %v5200_v30 = vsub.f32 %v5153_v38, %v5173_v27  ;;  %5174 = vmatpush.msra.mxu2 %v5173_v27 }
 0xd09   :  { %v4973_v13 = vmul.f32 %v6154_v63, %v4972_v59 }
 0xd0a   :  { %v5201_v16 = vand.u32 4294901760, %v5200_v30 }
 0xd0b   :  { %v4974_v41 = vadd.f32 %v6154_v63, %v4973_v13 }
 0xd0c   :  { %v5202_v62 = vsub.f32 %v5200_v30, %v5201_v16 }
 0xd0d   :  { %v4978_v36 = vsel %vm4977_vm4, %v6154_v63, %v4974_v41 }
 0xd0e   :  { %v4983_v10 = vsel %vm4980_vm5, %v4982_v7, %v4978_v36  ;;  %v5203_v31 = vand.u32 4294901760, %v5202_v62 }
 0xd0f   :  { %v4984_v18 = vmul.f32 %v6150_v48, %v4983_v10 }
 0xd10   :  { %5204 = vmatpush.msra.mxu3 %v5203_v31 }
 0xd11   :  { %v5004_v53 = vsel %vm622_vm8, %v4984_v18, 0 }
 0xd12   :  { %v5023_v1 = vand.u32 4294901760, %v5004_v53 }
 0xd13   :  { %v4969_v8 = vpop.xlane.xlu0 %4968 }
 0xd14   :  { %6155 = vrcp.f32 %v4969_v8  ;;  %5054 = vmatmul.f32.vlgmr.msrb.gmra.mxu1 %v5023_v1  ;;  %v5024_v2 = vsub.f32 %v5004_v53, %v5023_v1  ;;  %v4996_v3 = vand.u32 2147483648, %v4969_v8  ;;  %v4994_v52 = vand.u32 2147483647, %v4969_v8 }
 0xd15   :  { %5250 = vmatpush.msrb.mxu1 %v5173_v27  ;;  %vm4990_vm7 = vweird.f32 %v4969_v8 }
 0xd16   :  { %5078 = vmatmul.f32.vlgmr.msrb.gmra.mxu2 %v5024_v2  ;;  %v5025_v0 = vand.u32 4294901760, %v5024_v2  ;;  %v4997_v21 = vor.u32 1.1754944e-38, %v4996_v3  ;;  %vm4995_vm10 = vcmp.eq.f32.partialorder %v4994_v52, 8.507059e+37 }
 0xd17   :  { %5276 = vmatpush.msrb.mxu2 %v5201_v16 }
 0xd18   :  { %5102 = vmatmul.f32.vlgmr.msrb.gmra.mxu3 %v5025_v0  ;;  %v5026_v44 = vsub.f32 %v5024_v2, %v5025_v0 }
 0xd19   :  { %5298 = vmatpush.msrb.mxu3 %v5173_v27  ;;  %v621_v27 = vld [vmem:[%s7186_s3 + $0x38] sm:$0xff] }
 0xd1a   :  { %v6156_v39 = vpop.eup %6155  ;;  %v5027_v60 = vand.u32 4294901760, %v5026_v44  ;;  %v5325_v59 = vand.u32 4294901760, %v621_v27  ;;  %5561 = vrot.lane.b32.xlu0 %v621_v27, %s6170_s19 }
 0xd1b   :  { %v4986_v46 = vmul.f32 %v6156_v39, %v4969_v8  ;;  %vm4991_vm6 = vweird.f32 %v6156_v39 }
 0xd1c   :  { %5148 = vmatmul.f32.vlgmr.msra.gmra.mxu1 %v5023_v1  ;;  %5028 = vmatmul.f32.vlgmr.msrb.gmra.mxu0 %v5027_v60  ;;  %vm4992_vm9 = vmor %vm4990_vm7, %vm4991_vm6 }
 0xd1d   :  { %v4987_v48 = vsub.f32 1.0, %v4986_v46  ;;  %5227 = vmatpush.msrb.mxu0 %v5200_v30 }
 0xd1f   :  { %v4988_v50 = vmul.f32 %v6156_v39, %v4987_v48 }
 0xd21   :  { %v4989_v45 = vadd.f32 %v6156_v39, %v4988_v50 }
 0xd23   :  { %v4993_v24 = vsel %vm4992_vm9, %v6156_v39, %v4989_v45 }
 0xd24   :  { %v4998_v51 = vsel %vm4995_vm10, %v4997_v21, %v4993_v24  ;;  %5126 = vmatmul.f32.vlgmr.msra.gmra.mxu0 %v5023_v1 }
 0xd25   :  { %v4999_v11 = vmul.f32 %v6975_v4, %v4998_v51  ;;  %v5360_v4 = vsub.f32 %v621_v27, %v5325_v59  ;;  %5326 = vmatpush.msra.mxu0 %v5325_v59 }
 0xd27   :  { %v5156_v15 = vsel %vm622_vm8, %v4999_v11, 0  ;;  %v5361_v9 = vand.u32 4294901760, %v5360_v4 }
 0xd28   :  { %v5175_v6 = vand.u32 4294901760, %v5156_v15 }
 0xd29   :  { %v5362_v30 = vsub.f32 %v5360_v4, %v5361_v9 }
 0xd2a   :  { %5206 = vmatmul.f32.vlgmr.msra.gmra.mxu3 %v5175_v6  ;;  %v5176_v23 = vsub.f32 %v5156_v15, %v5175_v6 }
 0xd2b   :  { %5419 = vmatpush.msra.mxu3 %v5325_v59  ;;  %v5363_v13 = vand.u32 4294901760, %v5362_v30  ;;  %v2761_v30 = vadd.f32 %v6752_v47, %v6756_v25 }
 0xd2c   :  { %v5177_v63 = vand.u32 4294901760, %v5176_v23  ;;  %5230 = vmatmul.f32.vlgmr.msrb.gmra.mxu0 %v5176_v23 }
 0xd2d   :  { %5451 = vmatpush.msrb.mxu0 %v5361_v9  ;;  %5364 = vmatpush.msra.mxu1 %v5363_v13 }
 0xd2e   :  { %5254 = vmatmul.f32.vlgmr.msrb.gmra.mxu1 %v5177_v63  ;;  %v5178_v19 = vsub.f32 %v5176_v23, %v5177_v63 }
 0xd2f   :  { %5477 = vmatpush.msrb.mxu1 %v5325_v59  ;;  %v2757_v59 = vadd.f32 %v6746_v55, %v6748_v57 }
 0xd30   :  { %v5179_v38 = vand.u32 4294901760, %v5178_v19 }
 0xd32   :  { %5180 = vmatmul.f32.vlgmr.msra.gmra.mxu2 %v5179_v38  ;;  %5300 = vmatmul.f32.vlgmr.msrb.gmra.mxu3 %v5175_v6 }
 0xd33   :  { %5391 = vmatpush.msra.mxu2 %v5360_v4  ;;  %v2785_v4 = vadd.f32 %v6750_v17, %v2757_v59 }
 0xd35   :  { %v2814_v9 = vadd.f32 %v6754_v22, %v2785_v4 }
 0xd37   :  { %v2844_v13 = vadd.f32 %v6764_v20, %v2814_v9 }
 0xd3a   :  { %5278 = vmatmul.f32.vlgmr.msrb.gmra.mxu2 %v5175_v6 }
 0xd91   :  { %v5055_v43 = vpop.f32.mrf.mxu1 }
 0xd99   :  { %v5029_v16 = vpop.f32.mrf.mxu0  ;;  %v5079_v7 = vpop.f32.mrf.mxu2 }
 0xd9a   :  { %v5056_v41 = vadd.f32 %v5055_v43, %v5029_v16  ;;  %v5149_v53 = vpop.f32.mrf.mxu1  ;;  %v2790_v43 = vadd.f32 %v6758_v14, %v2761_v30  ;;  %v2870_v16 = vadd.f32 %v6760_v12, %v2844_v13 }
 0xd9b   :  { %v5103_v36 = vpop.f32.mrf.mxu3 }
 0xd9c   :  { %v5080_v62 = vadd.f32 %v5079_v7, %v5056_v41  ;;  %v2820_v41 = vadd.f32 %v6762_v49, %v2790_v43 }
 0xd9e   :  { %v5104_v10 = vadd.f32 %v5103_v36, %v5080_v62  ;;  %v2906_v62 = vadd.f32 %v6766_v34, %v2870_v16  ;;  %v2848_v55 = vadd.f32 %v6772_v26, %v2820_v41 }
 0xda0   :  { %v2940_v17 = vadd.f32 %v6770_v56, %v2906_v62  ;;  %v2874_v22 = vadd.f32 %v6768_v37, %v2848_v55 }
 0xda1   :  { %v5127_v31 = vpop.f32.mrf.mxu0 }
 0xda2   :  { %v5128_v18 = vadd.f32 %v5127_v31, %v5104_v10  ;;  %v2968_v47 = vadd.f32 %v6780_v61, %v2940_v17  ;;  %v2914_v20 = vadd.f32 %v6774_v54, %v2874_v22 }
 0xda4   :  { %v5150_v1 = vadd.f32 %v5149_v53, %v5128_v18  ;;  %v2997_v12 = vadd.f32 %v6776_v32, %v2968_v47  ;;  %v2944_v10 = vadd.f32 %v6778_v33, %v2914_v20  ;;  %v6165_v20 = vld [vmem:[%s7186_s3 + $0x8] sm:$0xff] }
 0xda6   :  { %v5305_v8 = vsel %vm622_vm8, %v5150_v1, 0  ;;  %v3027_v26 = vadd.f32 %v6784_v28, %v2997_v12  ;;  %v2973_v31 = vadd.f32 %v6788_v35, %v2944_v10 }
 0xda7   :  { %v5327_v2 = vand.u32 4294901760, %v5305_v8 }
 0xda8   :  { %v3053_v1 = vadd.f32 %v6786_v29, %v3027_v26  ;;  %v3003_v54 = vadd.f32 %v6782_v58, %v2973_v31 }
 0xda9   :  { %v5328_v0 = vsub.f32 %v5305_v8, %v5327_v2  ;;  %5366 = vmatmul.f32.vlgmr.msra.gmra.mxu1 %v5327_v2  ;;  %v5231_v50 = vpop.f32.mrf.mxu0 }
 0xdaa   :  { %v4272_v32 = vadd.f32 %v6903_v42, %v3053_v1 }
 0xdab   :  { %v5329_v44 = vand.u32 4294901760, %v5328_v0  ;;  %5394 = vmatmul.f32.vlgmr.msra.gmra.mxu2 %v5328_v0  ;;  %v5255_v45 = vpop.f32.mrf.mxu1 }
 0xdad   :  { %v5330_v39 = vsub.f32 %v5328_v0, %v5329_v44  ;;  %5423 = vmatmul.f32.vlgmr.msra.gmra.mxu3 %v5329_v44  ;;  %v5207_v60 = vpop.f32.mrf.mxu3  ;;  %v5490_v44 = vpop.permute.xlu0 %5489 }
 0xdaf   :  { %v5331_v46 = vand.u32 4294901760, %v5330_v39  ;;  %v7201_v39 = vld [vmem:[#allocation5_spill] sm:$0xff] }
 0xdb0   :  { %v3031_v28 = vadd.f32 %v7201_v39, %v3003_v54 }
 0xdb1   :  { %5332 = vmatmul.f32.vlgmr.msra.gmra.mxu0 %v5331_v46 }
 0xdb5   :  { %v5181_v48 = vpop.f32.mrf.mxu2  ;;  %v5301_v11 = vpop.f32.mrf.mxu3 }
 0xdb6   :  { %v5208_v3 = vadd.f32 %v5207_v60, %v5181_v48  ;;  %v5562_v43 = vpop.permute.xlu0 %5561 }
 0xdb7   :  { %v7044_v41 = vand.u32 4294901760, %v5562_v43 }
 0xdb8   :  { %v5232_v52 = vadd.f32 %v5231_v50, %v5208_v3  ;;  %v7202_v50 = vld [vmem:[#allocation6_spill] sm:$0xff] }
 0xdb9   :  { %v7050_v62 = vsub.f32 %v5562_v43, %v7044_v41  ;;  %5586 = vmatpush.msrb.mxu2 %v7044_v41  ;;  %5703 = vmatpush.msra.mxu1 %v7044_v41 }
 0xdba   :  { %v5256_v21 = vadd.f32 %v5255_v45, %v5232_v52  ;;  %v3057_v52 = vadd.f32 %v7202_v50, %v3031_v28  ;;  %v7203_v45 = vld [vmem:[#allocation2_spill] sm:$0xff] }
 0xdbb   :  { %5669 = vmatpush.msra.mxu0 %v7050_v62 }
 0xdbd   :  { %v5279_v24 = vpop.f32.mrf.mxu2 }
 0xdbe   :  { %v5280_v51 = vadd.f32 %v5279_v24, %v5256_v21  ;;  %v4273_v24 = vadd.f32 %v6905_v40, %v3057_v52  ;;  %v6163_v40 = vld [vmem:[%s7186_s3 + $0x18] sm:$0xff] }
 0xdc0   :  { %v5302_v15 = vadd.f32 %v5301_v11, %v5280_v51 }
 0xdc2   :  { %v5308_v6 = vsel %vm622_vm8, %v5302_v15, 0 }
 0xdc3   :  { %v5335_v23 = vand.u32 4294901760, %v5308_v6 }
 0xdc5   :  { %5370 = vmatmul.f32.gmra.mxu1 %v5335_v23  ;;  %v5336_v63 = vsub.f32 %v5308_v6, %v5335_v23  ;;  %v7204_v6 = vld [vmem:[#allocation3_spill] sm:$0xff] }
 0xdc7   :  { %5399 = vmatmul.f32.gmra.mxu2 %v5336_v63  ;;  %v5337_v19 = vand.u32 4294901760, %v5336_v63 }
 0xdc9   :  { %5429 = vmatmul.f32.gmra.mxu3 %v5337_v19  ;;  %v5338_v38 = vsub.f32 %v5336_v63, %v5337_v19  ;;  %v6162_v19 = vld [vmem:[%s7185_s5 + $0x2] ss:$0 sm:$0xff] }
 0xdcb   :  { %v5339_v27 = vand.u32 4294901760, %v5338_v38 }
 0xdcd   :  { %5340 = vmatmul.f32.gmra.mxu0 %v5339_v27  ;;  %5479 = vmatmul.f32.vlgmr.msrb.gmra.mxu1 %v5327_v2  ;;  %v7205_v27 = vld [vmem:[#allocation4_spill] sm:$0xff] }
 0xdd5   :  { %5453 = vmatmul.f32.vlgmr.msrb.gmra.mxu0 %v5327_v2  ;;  %5483 = vmatmul.f32.gmra.mxu1 %v5335_v23 }
 0xddd   :  { %5457 = vmatmul.f32.gmra.mxu0 %v5335_v23 }
 0xe26   :  { %v5367_v7 = vpop.f32.mrf.mxu1 }
 0xe2e   :  { %v5333_v57 = vpop.f32.mrf.mxu0  ;;  %v5395_v49 = vpop.f32.mrf.mxu2 }
 0xe2f   :  { %v5368_v14 = vadd.f32 %v5367_v7, %v5333_v57  ;;  %v5624_v57 = vand.u32 4294901760, %v7050_v62 }
 0xe30   :  { %v5424_v56 = vpop.f32.mrf.mxu3 }
 0xe31   :  { %v5396_v34 = vadd.f32 %v5395_v49, %v5368_v14  ;;  %v5625_v22 = vsub.f32 %v7050_v62, %v5624_v57 }
 0xe33   :  { %v5425_v18 = vadd.f32 %v5424_v56, %v5396_v34  ;;  %v5626_v47 = vand.u32 4294901760, %v5625_v22 }
 0xe35   :  { %5627 = vmatpush.msrb.mxu3 %v5626_v47 }
 0xe42   :  { %v5371_v25 = vpop.f32.mrf.mxu1 }
 0xe4a   :  { %v5341_v36 = vpop.f32.mrf.mxu0  ;;  %v5480_v53 = vpop.f32.mrf.mxu1 }
 0xe4b   :  { %v5372_v37 = vadd.f32 %v5371_v25, %v5341_v36  ;;  %v5400_v2 = vpop.f32.mrf.mxu2  ;;  %v6164_v25 = vld [vmem:[%s7186_s3 + $0x28] sm:$0xff] }
 0xe4c   :  { %v5430_v35 = vpop.f32.mrf.mxu3 }
 0xe4d   :  { %v5401_v0 = vadd.f32 %v5400_v2, %v5372_v37 }
 0xe4f   :  { %v5431_v60 = vadd.f32 %v5430_v35, %v5401_v0 }
 0xe52   :  { %v5454_v61 = vpop.f32.mrf.mxu0  ;;  %v5484_v21 = vpop.f32.mrf.mxu1 }
 0xe53   :  { %v5455_v8 = vadd.f32 %v5454_v61, %v5425_v18 }
 0xe55   :  { %v5481_v33 = vadd.f32 %v5480_v53, %v5455_v8 }
 0xe57   :  { %v5487_v46 = vadd.f32 %v5481_v33, %v4272_v32 }
 0xe59   :  { %v5492_v48 = vadd.f32 %v5490_v44, %v5487_v46 }
 0xe5a   :  { %v5458_v3 = vpop.f32.mrf.mxu0 }
 0xe5b   :  { %v7022_v29 = vadd.f32 %v5492_v48, %v7203_v45  ;;  %v5459_v58 = vadd.f32 %v5458_v3, %v5431_v60 }
 0xe5d   :  { %v5485_v42 = vadd.f32 %v5484_v21, %v5459_v58  ;;  %v5496_v51 = vsel %vm34_vm0, %v7022_v29, 0.0 }
 0xe5e   :  { %5497 = vadd.xlane.f32.xlu2 %v5496_v51 }
 0xe5f   :  { %v5488_v11 = vadd.f32 %v5485_v42, %v4273_v24 }
 0xe61   :  { %v5493_v15 = vadd.f32 %v5490_v44, %v5488_v11 }
 0xe63   :  { %v7028_v23 = vadd.f32 %v5493_v15, %v7204_v6 }
 0xe65   :  { %v5499_v63 = vsel %vm34_vm0, %v7028_v23, 0.0 }
 0xe66   :  { %5500 = vadd.xlane.f32.xlu1 %v5499_v63 }
 0xe7f   :  { %5540 = vrot.lane.b32.xlu1 %v6162_v19, %s6170_s19 }
 0xe87   :  { %5557 = vrot.lane.b32.xlu1 %v6163_v40, %s6170_s19 }
 0xed1   :  { %v5498_v38 = vpop.xlane.xlu2 %5497 }
 0xed2   :  { %v5502_v59 = vmul.f32 %v5498_v38, %v7205_v27 }
 0xed4   :  { %v5504_v4 = vsub.f32 %v7022_v29, %v5502_v59 }
 0xed6   :  { %v5506_v9 = vmul.f32 %v5504_v4, %v5504_v4 }
 0xed8   :  { %v5508_v30 = vsel %vm34_vm0, %v5506_v9, 0.0 }
 0xed9   :  { %5509 = vadd.xlane.f32.xlu0 %v5508_v30  ;;  %v5501_v13 = vpop.xlane.xlu1 %5500 }
 0xeda   :  { %v5503_v16 = vmul.f32 %v5501_v13, %v7205_v27 }
 0xedc   :  { %v7047_v7 = vsub.f32 %v7028_v23, %v5503_v16 }
 0xede   :  { %v5507_v55 = vmul.f32 %v7047_v7, %v7047_v7 }
 0xee0   :  { %v5511_v17 = vsel %vm34_vm0, %v5507_v55, 0.0 }
 0xee1   :  { %5512 = vadd.xlane.f32.xlu2 %v5511_v17 }
 0xeed   :  { %5559 = vrot.lane.b32.xlu0 %v6164_v25, %s6170_s19  ;;  %v5797_v25 = vld [vmem:[%s7190_s4 + $0x30] sm:$0xff] }
 0xef1   :  { %v7073_v14 = vpop.permute.xlu1 %5540 }
 0xef5   :  { %5555 = vrot.lane.b32.xlu0 %v6165_v20, %s6170_s19 }
 0xef9   :  { %5545 = vrot.lane.b32.xlu2 %v6162_v19, %s6167_s23  ;;  %v5558_v34 = vpop.permute.xlu1 %5557 }
 0xefa   :  { %v7077_v18 = vand.u32 4294901760, %v5558_v34 }
 0xf01   :  { %5799 = vrot.lane.b32.xlu2 %v6983_v5, %s6167_s23  ;;  %v5635_v5 = vsub.f32 %v5558_v34, %v7077_v18  ;;  %v5795_v34 = vld [vmem:[%s7190_s4 + $0x20] sm:$0xff] }
 0xf03   :  { %v5636_v2 = vand.u32 4294901760, %v5635_v5 }
 0xf05   :  { %v5637_v35 = vsub.f32 %v5635_v5, %v5636_v2 }
 0xf07   :  { %v5638_v24 = vand.u32 4294901760, %v5637_v35 }
 0xf4c   :  { %v5510_v36 = vpop.xlane.xlu0 %5509 }
 0xf4d   :  { %v5514_v12 = vmul.f32 %v5510_v36, %v7205_v27  ;;  %v5796_v36 = vld [vmem:[%s7190_s4 + $0x28] sm:$0xff] }
 0xf4f   :  { %v5516_v49 = vadd.f32 1e-05, %v5514_v12 }
 0xf51   :  { %6157 = vrsqrt.f32 %v5516_v49  ;;  %vm5524_vm14 = vweird.f32 %v5516_v49 }
 0xf54   :  { %v5513_v10 = vpop.xlane.xlu2 %5512 }
 0xf55   :  { %v5515_v26 = vmul.f32 %v5513_v10, %v7205_v27  ;;  %v7114_v10 = vand.u32 4294901760, %v5796_v36 }
 0xf57   :  { %v6158_v31 = vpop.eup %6157  ;;  %v5517_v56 = vadd.f32 1e-05, %v5515_v26 }
 0xf58   :  { %v5519_v37 = vmul.f32 %v6158_v31, %v5516_v49  ;;  %vm5525_vm8 = vweird.f32 %v6158_v31 }
 0xf59   :  { %6159 = vrsqrt.f32 %v5517_v56  ;;  %vm5526_vm15 = vmor %vm5524_vm14, %vm5525_vm8  ;;  %vm5534_vm2 = vweird.f32 %v5517_v56 }
 0xf5a   :  { %v5520_v53 = vmul.f32 %v6158_v31, %v5519_v37  ;;  %v5794_v37 = vld [vmem:[%s7190_s4 + $0x18] sm:$0xff] }
 0xf5c   :  { %v5521_v61 = vmul.f32 0.5, %v5520_v53  ;;  %v5546_v48 = vpop.permute.xlu2 %5545 }
 0xf5e   :  { %v5522_v1 = vsub.f32 1.5, %v5521_v61 }
 0xf5f   :  { %v6160_v54 = vpop.eup %6159  ;;  %v5560_v8 = vpop.permute.xlu0 %5559 }
 0xf60   :  { %v5529_v32 = vmul.f32 %v6160_v54, %v5517_v56  ;;  %v5523_v0 = vmul.f32 %v6158_v31, %v5522_v1  ;;  %v5587_v33 = vand.u32 4294901760, %v5560_v8  ;;  %vm5535_vm1 = vweird.f32 %v6160_v54 }
 0xf61   :  { %vm5536_vm11 = vmor %vm5534_vm2, %vm5535_vm1  ;;  %v7126_v56 = vsub.f32 %v5796_v36, %v7114_v10 }
 0xf62   :  { %v5530_v44 = vmul.f32 %v6160_v54, %v5529_v32  ;;  %v5527_v39 = vsel %vm5526_vm15, %v6158_v31, %v5523_v0  ;;  %v5629_v28 = vsub.f32 %v5560_v8, %v5587_v33  ;;  %5588 = vmatpush.msrb.mxu2 %v5587_v33  ;;  %5705 = vmatpush.msra.mxu1 %v5587_v33  ;;  %v5793_v8 = vld [vmem:[%s7190_s4 + $0x10] sm:$0xff] }
 0xf63   :  { %v5538_v46 = vmul.f32 %v5527_v39, %v5504_v4  ;;  %v5872_v61 = vand.u32 4294901760, %v7126_v56  ;;  %v5792_v39 = vld [vmem:[%s7190_s4 + $0x8] sm:$0xff] }
 0xf64   :  { %v5531_v60 = vmul.f32 0.5, %v5530_v44  ;;  %5590 = vmatpush.msrb.mxu2 %v7077_v18  ;;  %5672 = vmatpush.msra.mxu0 %v5629_v28  ;;  %v5630_v3 = vand.u32 4294901760, %v5629_v28 }
 0xf65   :  { %v5543_v50 = vmul.f32 %v7073_v14, %v5538_v46  ;;  %5707 = vmatpush.msra.mxu1 %v7077_v18  ;;  %v5873_v32 = vsub.f32 %v7126_v56, %v5872_v61 }
 0xf66   :  { %v5532_v52 = vsub.f32 1.5, %v5531_v60  ;;  %5675 = vmatpush.msra.mxu0 %v5635_v5  ;;  %v5631_v45 = vsub.f32 %v5629_v28, %v5630_v3  ;;  %v5829_v60 = vand.u32 4294901760, %v5792_v39 }
 0xf67   :  { %v5548_v58 = vadd.f32 %v5546_v48, %v5543_v50  ;;  %v5556_v21 = vpop.permute.xlu0 %5555  ;;  %v5874_v28 = vand.u32 4294901760, %v5873_v32 }
 0xf68   :  { %v5533_v42 = vmul.f32 %v6160_v54, %v5532_v52  ;;  %v5591_v51 = vand.u32 4294901760, %v5556_v21  ;;  %v5632_v11 = vand.u32 4294901760, %v5631_v45  ;;  %v5895_v45 = vsub.f32 %v5792_v39, %v5829_v60  ;;  %v5800_v39 = vpop.permute.xlu2 %5799 }
 0xf69   :  { %v5568_v15 = vsel %vm34_vm0, %v5548_v58, 0 }
 0xf6a   :  { %v5537_v6 = vsel %vm5536_vm11, %v6160_v54, %v5533_v42  ;;  %v5593_v63 = vand.u32 4294901760, %v5568_v15  ;;  %v5641_v19 = vsub.f32 %v5556_v21, %v5591_v51  ;;  %5592 = vmatpush.msrb.mxu2 %v5591_v51  ;;  %5633 = vmatpush.msrb.mxu3 %v5632_v11  ;;  %v7141_v54 = vand.u32 4294901760, %v5794_v37 }
 0xf6b   :  { %v5539_v40 = vmul.f32 %v5537_v6, %v7047_v7  ;;  %5709 = vmatpush.msra.mxu1 %v5591_v51  ;;  %v5896_v42 = vand.u32 4294901760, %v5895_v45 }
 0xf6c   :  { %5738 = vmatpush.msra.mxu2 %v5624_v57  ;;  %v5594_v38 = vsub.f32 %v5568_v15, %v5593_v63  ;;  %v5642_v27 = vand.u32 4294901760, %v5641_v19  ;;  %5678 = vmatpush.msra.mxu0 %v5641_v19  ;;  %v5883_v44 = vsub.f32 %v5794_v37, %v7141_v54 }
 0xf6d   :  { %5639 = vmatpush.msrb.mxu3 %v5638_v24  ;;  %v5544_v59 = vmul.f32 %v7073_v14, %v5539_v40  ;;  %v7102_v14 = vand.u32 4294901760, %v5797_v25  ;;  %v5897_v6 = vsub.f32 %v5895_v45, %v5896_v42 }
 0xf6e   :  { %5742 = vmatpush.msra.mxu2 %v5630_v3  ;;  %v5595_v4 = vand.u32 4294901760, %v5594_v38  ;;  %5681 = vmatmul.f32.vlgmr.msra.gmra.mxu0 %v5594_v38  ;;  %v5643_v9 = vsub.f32 %v5641_v19, %v5642_v27  ;;  %v5791_v3 = vld [vmem:[%s7190_s4] sm:$0xff] }
 0xf6f   :  { %v5549_v30 = vadd.f32 %v5546_v48, %v5544_v59  ;;  %v7111_v49 = vsub.f32 %v5797_v25, %v7102_v14  ;;  %v5884_v48 = vand.u32 4294901760, %v5883_v44  ;;  %v5831_v21 = vand.u32 4294901760, %v5791_v3 }
 0xf70   :  { %5746 = vmatpush.msra.mxu2 %v5636_v2  ;;  %v5596_v13 = vsub.f32 %v5594_v38, %v5595_v4  ;;  %5713 = vmatmul.f32.vlgmr.msra.gmra.mxu1 %v5595_v4  ;;  %v5644_v43 = vand.u32 4294901760, %v5643_v9  ;;  %v5898_v19 = vand.u32 4294901760, %v5897_v6  ;;  %v6166_v4 = vld [vmem:[%s7185_s5 + $0x1] ss:$0 sm:$0xff] }
 0xf71   :  { %v5571_v16 = vsel %vm34_vm0, %v5549_v30, 0  ;;  %v5866_v31 = vand.u32 4294901760, %v7111_v49  ;;  %v5885_v58 = vsub.f32 %v5883_v44, %v5884_v48  ;;  %v5901_v11 = vsub.f32 %v5791_v3, %v5831_v21 }
 0xf72   :  { %5750 = vmatpush.msra.mxu2 %v5642_v27  ;;  %v5597_v7 = vand.u32 4294901760, %v5596_v13  ;;  %v5601_v62 = vand.u32 4294901760, %v5571_v16  ;;  %5645 = vmatpush.msrb.mxu3 %v5644_v43 }
 0xf73   :  { %5647 = vmatmul.f32.vlgmr.msrb.gmra.mxu3 %v5593_v63  ;;  %v5867_v5 = vsub.f32 %v7111_v49, %v5866_v31 }
 0xf74   :  { %5773 = vmatpush.msra.mxu3 %v7044_v41  ;;  %5598 = vmatmul.f32.vlgmr.msrb.gmra.mxu2 %v5597_v7  ;;  %v5602_v55 = vsub.f32 %v5571_v16, %v5601_v62  ;;  %v5798_v41 = vld [vmem:[%s7190_s4 + $0x38] sm:$0xff] }
 0xf75   :  { %v7094_v47 = vand.u32 4294901760, %v5798_v41  ;;  %v5868_v2 = vand.u32 4294901760, %v5867_v5 }
 0xf76   :  { %5775 = vmatpush.msra.mxu3 %v5587_v33  ;;  %5686 = vmatmul.f32.gmra.mxu0 %v5602_v55  ;;  %v5603_v57 = vand.u32 4294901760, %v5602_v55  ;;  %v7148_v33 = vand.u32 4294901760, %v5793_v8 }
 0xf77   :  { %v7100_v20 = vsub.f32 %v5798_v41, %v7094_v47  ;;  %5818 = vmatpush.msrb.mxu0 %v7094_v47 }
 0xf78   :  { %5777 = vmatpush.msra.mxu3 %v7077_v18  ;;  %5719 = vmatmul.f32.gmra.mxu1 %v5603_v57  ;;  %v5604_v17 = vsub.f32 %v5602_v55, %v5603_v57  ;;  %v7129_v18 = vand.u32 4294901760, %v5795_v34  ;;  %v5889_v35 = vsub.f32 %v5793_v8, %v7148_v33 }
 0xf79   :  { %v5860_v12 = vand.u32 4294901760, %v7100_v20  ;;  %5925 = vmatpush.msrb.mxu2 %v7100_v20  ;;  %5820 = vmatpush.msrb.mxu0 %v7102_v14 }
 0xf7a   :  { %5779 = vmatpush.msra.mxu3 %v5591_v51  ;;  %v5605_v22 = vand.u32 4294901760, %v5604_v17  ;;  %v5877_v1 = vsub.f32 %v5795_v34, %v7129_v18  ;;  %v5890_v52 = vand.u32 4294901760, %v5889_v35  ;;  %v5886_v51 = vand.u32 4294901760, %v5885_v58 }
 0xf7b   :  { %5651 = vmatmul.f32.gmra.mxu3 %v5601_v62  ;;  %v5861_v26 = vsub.f32 %v7100_v20, %v5860_v12  ;;  %5928 = vmatpush.msrb.mxu2 %v7111_v49 }
 0xf7c   :  { %5606 = vmatmul.f32.gmra.mxu2 %v5605_v22  ;;  %5967 = vmatpush.msrb.mxu3 %v7094_v47  ;;  %v5878_v0 = vand.u32 4294901760, %v5877_v1  ;;  %v5891_v24 = vsub.f32 %v5889_v35, %v5890_v52 }
 0xf7d   :  { %5822 = vmatpush.msrb.mxu0 %v7114_v10  ;;  %v5862_v53 = vand.u32 4294901760, %v5861_v26  ;;  %5931 = vmatpush.msrb.mxu2 %v7126_v56 }
 0xf7e   :  { %5969 = vmatpush.msrb.mxu3 %v7102_v14  ;;  %v5879_v46 = vsub.f32 %v5877_v1, %v5878_v0  ;;  %v5892_v15 = vand.u32 4294901760, %v5891_v24 }
 0xf7f   :  { %5824 = vmatpush.msrb.mxu0 %v7129_v18  ;;  %5863 = vmatpush.msrb.mxu1 %v5862_v53 }
 0xf80   :  { %5971 = vmatpush.msrb.mxu3 %v7114_v10  ;;  %5934 = vmatpush.msrb.mxu2 %v5877_v1  ;;  %v5880_v50 = vand.u32 4294901760, %v5879_v46 }
 0xf81   :  { %5826 = vmatpush.msrb.mxu0 %v7141_v54  ;;  %5869 = vmatpush.msrb.mxu1 %v5868_v2 }
 0xf82   :  { %5973 = vmatpush.msrb.mxu3 %v7129_v18  ;;  %5937 = vmatpush.msrb.mxu2 %v5883_v44 }
 0xf83   :  { %5781 = vmatmul.f32.vlgmr.msra.gmra.mxu3 %v5593_v63  ;;  %5875 = vmatpush.msrb.mxu1 %v5874_v28 }
 0xf84   :  { %5752 = vmatmul.f32.vlgmr.msra.gmra.mxu2 %v5593_v63  ;;  %5975 = vmatpush.msrb.mxu3 %v7141_v54  ;;  %v5902_v63 = vand.u32 4294901760, %v5901_v11 }
 0xf85   :  { %5828 = vmatpush.msrb.mxu0 %v7148_v33  ;;  %5940 = vmatpush.msrb.mxu2 %v5889_v35 }
 0xf86   :  { %5977 = vmatpush.msrb.mxu3 %v7148_v33  ;;  %5881 = vmatpush.msrb.mxu1 %v5880_v50  ;;  %v5903_v40 = vsub.f32 %v5901_v11, %v5902_v63 }
 0xf87   :  { %5830 = vmatpush.msrb.mxu0 %v5829_v60  ;;  %5943 = vmatpush.msrb.mxu2 %v5895_v45 }
 0xf88   :  { %5979 = vmatpush.msrb.mxu3 %v5829_v60  ;;  %5887 = vmatpush.msrb.mxu1 %v5886_v51  ;;  %v5904_v38 = vand.u32 4294901760, %v5903_v40 }
 0xf89   :  { %5832 = vmatpush.msrb.mxu0 %v5831_v21  ;;  %5946 = vmatpush.msrb.mxu2 %v5901_v11 }
 0xf8a   :  { %5981 = vmatpush.msrb.mxu3 %v5831_v21  ;;  %5893 = vmatpush.msrb.mxu1 %v5892_v15 }
 0xf8b   :  { %5785 = vmatmul.f32.gmra.mxu3 %v5601_v62  ;;  %6006 = vmatpush.msra.mxu0 %v5860_v12 }
 0xf8c   :  { %5756 = vmatmul.f32.gmra.mxu2 %v5601_v62  ;;  %5899 = vmatpush.msrb.mxu1 %v5898_v19 }
 0xf8d   :  { %6010 = vmatpush.msra.mxu0 %v5866_v31 }
 0xf8e   :  { %5905 = vmatpush.msrb.mxu1 %v5904_v38 }
 0xf8f   :  { %6014 = vmatpush.msra.mxu0 %v5872_v61 }
 0xf90   :  { %6053 = vmatpush.msra.mxu1 %v7094_v47 }
 0xf91   :  { %6018 = vmatpush.msra.mxu0 %v5878_v0 }
 0xf92   :  { %6055 = vmatpush.msra.mxu1 %v7102_v14 }
 0xf93   :  { %6022 = vmatpush.msra.mxu0 %v5884_v48 }
 0xf94   :  { %6057 = vmatpush.msra.mxu1 %v7114_v10 }
 0xf95   :  { %6026 = vmatpush.msra.mxu0 %v5890_v52 }
 0xf96   :  { %6059 = vmatpush.msra.mxu1 %v7129_v18 }
 0xf97   :  { %6030 = vmatpush.msra.mxu0 %v5896_v42 }
 0xf98   :  { %6061 = vmatpush.msra.mxu1 %v7141_v54 }
 0xf99   :  { %6034 = vmatpush.msra.mxu0 %v5902_v63 }
 0xf9a   :  { %6063 = vmatpush.msra.mxu1 %v7148_v33 }
 0xf9c   :  { %6065 = vmatpush.msra.mxu1 %v5829_v60 }
 0xf9e   :  { %6067 = vmatpush.msra.mxu1 %v5831_v21 }
 0xfeb   :  { %v5682_v43 = vpop.f32.mrf.mxu0 }
 0xfed   :  { %v5714_v55 = vpop.f32.mrf.mxu1 }
 0xff3   :  { %v5687_v25 = vpop.f32.mrf.mxu0 }
 0xff5   :  { %v5720_v12 = vpop.f32.mrf.mxu1 }
 0xff6   :  { %v5648_v27 = vpop.f32.mrf.mxu3 }
 0xff7   :  { %v5599_v59 = vpop.f32.mrf.mxu2 }
 0xff8   :  { %v5600_v9 = vadd.f32 %v6166_v4, %v5599_v59 }
 0xffa   :  { %v5649_v30 = vadd.f32 %v5648_v27, %v5600_v9 }
 0xffc   :  { %v5683_v62 = vadd.f32 %v5682_v43, %v5649_v30 }
 0xffe   :  { %v5652_v13 = vpop.f32.mrf.mxu3  ;;  %v5715_v17 = vadd.f32 %v5714_v55, %v5683_v62 }
 0xfff   :  { %v5607_v16 = vpop.f32.mrf.mxu2 }
0x1000   :  { %v5608_v7 = vadd.f32 %v6166_v4, %v5607_v16 }
0x1002   :  { %v5653_v57 = vadd.f32 %v5652_v13, %v5608_v7 }
0x1004   :  { %v5688_v14 = vadd.f32 %v5687_v25, %v5653_v57 }
0x1006   :  { %v5782_v22 = vpop.f32.mrf.mxu3  ;;  %v5721_v10 = vadd.f32 %v5720_v12, %v5688_v14 }
0x1007   :  { %v5753_v41 = vpop.f32.mrf.mxu2 }
0x1008   :  { %v5754_v47 = vadd.f32 %v5753_v41, %v5715_v17 }
0x100a   :  { %v5783_v20 = vadd.f32 %v5782_v22, %v5754_v47 }
0x100c   :  { %v5789_v36 = vmax.f32 %v5783_v20, 0.0 }
0x100e   :  { %v5804_v49 = vsel %vm5802_vm13, %v5789_v36, 0  ;;  %v5786_v18 = vpop.f32.mrf.mxu3 }
0x100f   :  { %v5833_v34 = vand.u32 4294901760, %v5804_v49  ;;  %v5757_v26 = vpop.f32.mrf.mxu2 }
0x1010   :  { %v5758_v31 = vadd.f32 %v5757_v26, %v5721_v10 }
0x1011   :  { %v5834_v56 = vsub.f32 %v5804_v49, %v5833_v34  ;;  %5907 = vmatmul.f32.vlgmr.msrb.gmra.mxu1 %v5833_v34 }
0x1012   :  { %v5787_v37 = vadd.f32 %v5786_v18, %v5758_v31 }
0x1013   :  { %v5835_v53 = vand.u32 4294901760, %v5834_v56  ;;  %5949 = vmatmul.f32.vlgmr.msrb.gmra.mxu2 %v5834_v56 }
0x1014   :  { %v5790_v5 = vmax.f32 %v5787_v37, 0.0 }
0x1015   :  { %v5836_v61 = vsub.f32 %v5834_v56, %v5835_v53  ;;  %5985 = vmatmul.f32.vlgmr.msrb.gmra.mxu3 %v5835_v53 }
0x1016   :  { %v5807_v1 = vsel %vm5802_vm13, %v5790_v5, 0 }
0x1017   :  { %v5837_v54 = vand.u32 4294901760, %v5836_v61  ;;  %v5841_v8 = vand.u32 4294901760, %v5807_v1 }
0x1019   :  { %5838 = vmatmul.f32.vlgmr.msrb.gmra.mxu0 %v5837_v54  ;;  %5911 = vmatmul.f32.gmra.mxu1 %v5841_v8  ;;  %v5842_v2 = vsub.f32 %v5807_v1, %v5841_v8 }
0x101b   :  { %5954 = vmatmul.f32.gmra.mxu2 %v5842_v2  ;;  %v5843_v32 = vand.u32 4294901760, %v5842_v2 }
0x101d   :  { %5991 = vmatmul.f32.gmra.mxu3 %v5843_v32  ;;  %v5844_v0 = vsub.f32 %v5842_v2, %v5843_v32 }
0x101f   :  { %v5845_v33 = vand.u32 4294901760, %v5844_v0 }
0x1021   :  { %5846 = vmatmul.f32.gmra.mxu0 %v5845_v33  ;;  %6069 = vmatmul.f32.vlgmr.msra.gmra.mxu1 %v5833_v34 }
0x1029   :  { %6036 = vmatmul.f32.vlgmr.msra.gmra.mxu0 %v5833_v34  ;;  %6073 = vmatmul.f32.gmra.mxu1 %v5841_v8 }
0x1031   :  { %6040 = vmatmul.f32.gmra.mxu0 %v5841_v8 }
0x108e   :  { %v5908_v44 = vpop.f32.mrf.mxu1 }
0x1096   :  { %v5839_v28 = vpop.f32.mrf.mxu0  ;;  %v5912_v35 = vpop.f32.mrf.mxu1 }
0x1097   :  { %v5840_v46 = vadd.f32 %v5839_v28, %v5800_v39  ;;  %v5950_v48 = vpop.f32.mrf.mxu2 }
0x1098   :  { %v5986_v45 = vpop.f32.mrf.mxu3 }
0x1099   :  { %v5909_v60 = vadd.f32 %v5908_v44, %v5840_v46 }
0x109b   :  { %v5951_v50 = vadd.f32 %v5950_v48, %v5909_v60 }
0x109d   :  { %v5987_v58 = vadd.f32 %v5986_v45, %v5951_v50 }
0x109e   :  { %v5847_v3 = vpop.f32.mrf.mxu0  ;;  %v6070_v24 = vpop.f32.mrf.mxu1 }
0x109f   :  { %v5848_v52 = vadd.f32 %v5847_v3, %v5800_v39  ;;  %v5955_v11 = vpop.f32.mrf.mxu2 }
0x10a0   :  { %v5992_v19 = vpop.f32.mrf.mxu3 }
0x10a1   :  { %v5913_v21 = vadd.f32 %v5912_v35, %v5848_v52 }
0x10a3   :  { %v5956_v15 = vadd.f32 %v5955_v11, %v5913_v21 }
0x10a5   :  { %v5993_v40 = vadd.f32 %v5992_v19, %v5956_v15 }
0x10a6   :  { %v6037_v42 = vpop.f32.mrf.mxu0  ;;  %v6074_v59 = vpop.f32.mrf.mxu1 }
0x10a7   :  { %v6038_v51 = vadd.f32 %v6037_v42, %v5987_v58 }
0x10a9   :  { %v6071_v6 = vadd.f32 %v6070_v24, %v6038_v51 }
0x10ab   :  { %v6077_v63 = vadd.f32 %v6071_v6, %v7022_v29 }
0x10ad   :  { %6079 = vst.msk [vmem:[%s7191_s6] sm:$0xff] %vm34_vm0, %v6077_v63 }
0x10ae   :  { %v6041_v38 = vpop.f32.mrf.mxu0 }
0x10af   :  { %v6042_v27 = vadd.f32 %v6041_v38, %v5993_v40 }
0x10b1   :  { %v6075_v4 = vadd.f32 %v6074_v59, %v6042_v27 }
0x10b3   :  { %v6078_v9 = vadd.f32 %v6075_v4, %v7028_v23 }
0x10b5   :  { %6080 = vst.msk [vmem:[%s7191_s6 + $0x8] sm:$0xff] %vm34_vm0, %v6078_v9 }

</bundles_post_ra>
